<compile_context>
chip_gen: v7x
topology: tpu7x:2x2x1
jax: 0.10.0
libtpu: 0.0.40
codegen_flags: <defaults>
</compile_context>

<pallas_src>
import jax
import jax.numpy as jnp
import numpy as np
from jax.experimental import pallas as pl
from jax.experimental.pallas import tpu as pltpu


def dagnn_kernel(adj_ref, x_ref, w_ref, b_ref, o_ref, xbuf, acc):
    """One grid step = (hop index kk in [0, K), output row tile i, contraction tile c).

    adj_ref: (T, T)  bf16  normalized adjacency tile             (streamed every hop)
    x_ref:   (T, F)  f32   input feature tile, block index c     (consumed at kk==0 only)
    w_ref:   (1, F)  f32   Linear weight row                     (resident)
    b_ref:   (1,)    f32   Linear bias                           (SMEM scalar)
    o_ref:   (N, F)  f32   out = sum_k sigmoid(x_k W + b) * x_k  (resident accumulator)
    xbuf:    (2N, F) bf16  ping-pong carry of x_kk / x_{kk+1}
    acc:     (T, F)  f32   per-(hop, row-tile) matmul accumulator
    """
    kk = pl.program_id(0)                 # grid hop index; actual hop = kk + 1
    i = pl.program_id(1)                  # output row tile
    c = pl.program_id(2)                  # contraction (column) tile
    nc = pl.num_programs(2)
    last_hop = pl.num_programs(0) - 1

    t = adj_ref.shape[0]
    n = o_ref.shape[0]
    row = pl.multiple_of(i * t, t)
    bias = b_ref[0]

    def score(h):
        # (T, F) * (1, F) on the VPU + lane reduction on the XLU; avoids a
        # lane-width-1 MXU matvec serializing behind the propagation matmul.
        return jax.nn.sigmoid(
            jnp.sum(h * w_ref[...], axis=-1, keepdims=True) + bias)

    @pl.when(c == 0)
    def _zero():
        acc[...] = jnp.zeros_like(acc)

    # Hop-0 output term folded into the first propagation pass: with square tiles,
    # the x tile streamed for contraction index c == i is exactly row tile i of x0.
    # This executes before the c == nc-1 accumulation below, so it initializes the
    # output rows (in exact f32) before anything is added to them.
    @pl.when((kk == 0) & (c == i))
    def _hop0():
        x0 = x_ref[...]                                      # (T, F) f32, exact
        o_ref[pl.ds(row, t), :] = score(x0) * x0

    # x_{kk+1} = adj @ x_kk, tiled over the contraction axis.  Hop 1 consumes the
    # streamed f32 input tiles (cast to bf16 for the MXU); later hops read the bf16
    # carry buffer directly -- no per-inner-step cast in the hot loop.
    @pl.when(kk == 0)
    def _mm_first():
        acc[...] += jnp.dot(adj_ref[...], x_ref[...].astype(jnp.bfloat16),
                            preferred_element_type=jnp.float32)

    @pl.when(kk > 0)
    def _mm_rest():
        src = pl.multiple_of(((kk - 1) % 2) * n + c * t, t)
        acc[...] += jnp.dot(adj_ref[...], xbuf[pl.ds(src, t), :],
                            preferred_element_type=jnp.float32)

    @pl.when(c == nc - 1)
    def _finish():
        new_x = acc[...]                                     # f32, single load, reused

        @pl.when(kk < last_hop)                              # carry only if consumed
        def _carry():
            dst = pl.multiple_of((kk % 2) * n + row, t)
            xbuf[pl.ds(dst, t), :] = new_x.astype(jnp.bfloat16)

        o_ref[pl.ds(row, t), :] += score(new_x) * new_x


# ------------------------- tiling / VMEM budgeting --------------------------

_TILE_CANDIDATES = (1024, 512, 256, 128)   # 256-multiples feed v6e/v7x's 2x256^2 MXU


def _vmem_bytes(n, f, t):
    """Conservative VMEM footprint of the kernel for square tile size t."""
    out_b = 2 * n * f * 4        # resident f32 output (assume 2 buffers)
    xbuf_b = 2 * n * f * 2       # bf16 ping-pong carry
    adj_b = 2 * t * t * 2        # double-buffered bf16 adjacency tile
    x_b = 2 * t * f * 4          # double-buffered f32 input-feature tile
    acc_b = t * f * 4            # f32 matmul accumulator
    w_b = 2 * f * 4              # weight row
    return out_b + xbuf_b + adj_b + x_b + acc_b + w_b


def _vmem_capacity_bytes():
    try:
        return int(pltpu.get_tpu_info().vmem_capacity_bytes)
    except Exception:
        return 64 * 1024 * 1024  # v7x per-TensorCore VMEM: safe lower bound


def _pick_tile(n, f, budget, requested):
    if requested is not None:
        if requested > n or n % requested != 0:
            raise ValueError(f"tile={requested} must divide N={n}")
        if _vmem_bytes(n, f, requested) > budget:
            raise ValueError(f"tile={requested} does not fit the VMEM budget")
        return requested
    for t in _TILE_CANDIDATES:
        if t <= n and n % t == 0 and _vmem_bytes(n, f, t) <= budget:
            return t
    if n < 128 and _vmem_bytes(n, f, n) <= budget:
        return n                 # tiny graph: one tile == full array dims
    # TODO(synk): pad ragged N to a multiple of 128 upstream, and add an
    # F-tiling path (partial lane-sums for the score) for graphs whose resident
    # (N, F) buffers exceed VMEM.
    raise ValueError(
        f"cannot tile N={n}, F={f} within the {budget}-byte VMEM budget; "
        "pad N to a multiple of 128 and/or reduce F")


# ------------------------------- entry point --------------------------------

def dagnn_conv(x, adj_norm, weight, bias, K, *, tile=None):
    """DAGNNConv forward.

    x:        [N, F] node features            (F ideally a multiple of 128: lane-dense stores)
    adj_norm: [N, N] GCN-normalized dense adjacency
    weight:   [1, F] Linear weight (torch layout (out_channels, in_channels))
    bias:     [1]    Linear bias
    K:        number of propagation steps
    tile:     square adjacency tile; None = auto (largest candidate that fits VMEM)
    """
    N, F = x.shape
    assert adj_norm.shape == (N, N)

    x = x.astype(jnp.float32)
    w_row = weight.reshape(1, F).astype(jnp.float32)
    b = bias.reshape(1).astype(jnp.float32)

    if K == 0:  # degenerate: no propagation, out = sigmoid(x W + b) * x
        return jax.nn.sigmoid(x @ w_row.T + b) * x

    cap = int(_vmem_capacity_bytes() * 0.85)
    t = _pick_tile(N, F, cap - (4 << 20), tile)
    needed = _vmem_bytes(N, F, t)
    vmem_limit = int(min(cap, max(needed + (4 << 20), 16 << 20)))

    # Adjacency streamed K times as bf16 MXU tiles (halves HBM bytes vs f32).
    # TODO(synk): int8+scale adjacency on v5e/v6e (native int MXU) or fp8 on v7x
    # would halve the dominant HBM stream again; needs a tolerance re-check.
    adj_bf16 = adj_norm.astype(jnp.bfloat16)

    def adj_index_map(kk, i, c):
        return i, c

    def x_index_map(kk, i, c):
        # Consumed as the contraction operand only on the first hop; pinned
        # afterwards so no HBM bandwidth is wasted re-streaming it.
        return jnp.where(kk == 0, c, 0), 0

    grid = (K, N // t, N // t)

    return pl.pallas_call(
        dagnn_kernel,
        out_shape=jax.ShapeDtypeStruct((N, F), jnp.float32),
        grid_spec=pltpu.PrefetchScalarGridSpec(
            num_scalar_prefetch=0,
            grid=grid,
            in_specs=[
                pl.BlockSpec((t, t), adj_index_map),                 # streamed adj tiles
                pl.BlockSpec((t, F), x_index_map),                   # input features (hop 1)
                pl.BlockSpec((1, F), lambda kk, i, c: (0, 0)),       # weight row (resident)
                pl.BlockSpec(memory_space=pltpu.MemorySpace.SMEM),   # bias scalar in SMEM
            ],
            out_specs=pl.BlockSpec((N, F), lambda kk, i, c: (0, 0)),  # resident f32 accumulator
            scratch_shapes=[
                pltpu.VMEM((2 * N, F), jnp.bfloat16),  # bf16 ping-pong propagated features
                pltpu.VMEM((t, F), jnp.float32),       # per-row-tile matmul accumulator
            ],
        ),
        compiler_params=pltpu.CompilerParams(
            # The hop axis carries the ping-pong state, row/contraction tiles share the
            # private carry buffer and the output is a resident accumulator, so the grid
            # runs sequentially on one TensorCore.
            # TODO(synk): on v7x, split the row-tile axis over the two TensorCores
            # (carry in VMEM_SHARED/CMEM + core_barrier per hop) for ~2x.
            dimension_semantics=("arbitrary", "arbitrary", "arbitrary"),
            vmem_limit_bytes=vmem_limit,
        ),
    )(adj_bf16, x, w_row, b)


# ---------------- glue: dense GCN normalization, init & reference -------------

def dense_gcn_norm(adj, add_self_loops=True):
    """D^{-1/2} (A [+ I]) D^{-1/2}, matching torch_geometric dense gcn_norm."""
    if add_self_loops:
        adj = adj + jnp.eye(adj.shape[0], dtype=adj.dtype)
    deg = adj.sum(axis=1)
    deg_inv_sqrt = jnp.where(deg > 0, jax.lax.rsqrt(deg), 0.0)
    return deg_inv_sqrt[:, None] * adj * deg_inv_sqrt[None, :]


def glorot_weight(key, in_channels, out_channels=1, dtype=jnp.float32):
    limit = float(np.sqrt(6.0 / (in_channels + out_channels)))
    # torch Linear weight layout: (out_channels, in_channels) = (1, F)
    return jax.random.uniform(key, (out_channels, in_channels),
                              dtype=dtype, minval=-limit, maxval=limit)


def reference_dagnn(x, adj, weight, bias, K, *, matmul_dtype=jnp.float32):
    """Pure-JAX DAGNNConv forward.  matmul_dtype=bf16 mirrors the kernel's MXU
    precision (bf16 operands, f32 accumulation); f32 is the exact module math."""
    adj = adj.astype(matmul_dtype)
    h = x.astype(jnp.float32)
    xs = [h]
    for _ in range(K):
        h = jnp.dot(adj, h.astype(matmul_dtype),
                    preferred_element_type=jnp.float32)
        xs.append(h)
    H = jnp.stack(xs, axis=1)                                            # [N, K+1, F]
    S = jax.nn.sigmoid(jnp.einsum("nkf,f->nk", H, weight[0]) + bias[0])  # [N, K+1]
    return jnp.einsum("nk,nkf->nf", S, H)                                # [N, F]


if __name__ == "__main__":
    key = jax.random.PRNGKey(0)
    k_x, k_adj, k_w, k_b = jax.random.split(key, 4)

    # Small, tile-friendly graph (N multiple of 128; F multiple of 128 keeps
    # output/carry stores lane-dense).
    N, F, K = 512, 128, 3

    x = jax.random.normal(k_x, (N, F), dtype=jnp.float32)

    # deterministic random undirected graph (dense adjacency, no self loops)
    logits = jax.random.uniform(k_adj, (N, N))
    a = (logits < 0.05).astype(jnp.float32)
    adj = jnp.maximum(a, a.T) * (1.0 - jnp.eye(N, dtype=jnp.float32))
    adj_norm = dense_gcn_norm(adj, add_self_loops=True)

    # DAGNNConv parameters: Linear(in_channels=F, out_channels=1), glorot weight
    weight = glorot_weight(k_w, F, 1)                                    # (1, F)
    bias = jax.random.uniform(k_b, (1,), dtype=jnp.float32,
                              minval=-0.1, maxval=0.1)                   # (1,)

    # Multi-tile grid (exercises the folded hop-0 path and the contraction loop) ...
    out_tiled = jax.block_until_ready(dagnn_conv(x, adj_norm, weight, bias, K, tile=256))
    # ... and the auto-picked (largest-fitting) tile.
    out_auto = jax.block_until_ready(dagnn_conv(x, adj_norm, weight, bias, K))

    # Precision-matched reference (bf16 matmul operands, f32 accumulate, like the MXU path).
    ref_bf16 = reference_dagnn(x, adj_norm, weight, bias, K,
                               matmul_dtype=jnp.bfloat16)
    # Full-f32 module semantics: the kernel only deviates by bf16 rounding of the
    # adjacency / carried features fed to the MXU.
    ref_f32 = reference_dagnn(x, adj_norm, weight, bias, K,
                              matmul_dtype=jnp.float32)

    for out in (out_tiled, out_auto):
        np.testing.assert_allclose(np.asarray(out), np.asarray(ref_bf16),
                                   rtol=2e-3, atol=2e-3)
        np.testing.assert_allclose(np.asarray(out), np.asarray(ref_f32),
                                   rtol=5e-2, atol=5e-2)

    print("KERNEL_OK")
</pallas_src>

<mosaic_0001>
module attributes {stable_mosaic.version = 11 : i64} {
  func.func @dagnn_kernel(%arg0: i32, %arg1: i32, %arg2: i32, %arg3: memref<256x256xbf16, #tpu.memory_space<vmem>>, %arg4: memref<256x128xf32, #tpu.memory_space<vmem>>, %arg5: memref<1x128xf32, #tpu.memory_space<vmem>>, %arg6: memref<1xf32, #tpu.memory_space<smem>>, %arg7: memref<512x128xf32, #tpu.memory_space<vmem>>, %arg8: memref<1024x128xbf16, #tpu.memory_space<vmem>>, %arg9: memref<256x128xf32, #tpu.memory_space<vmem>>) attributes {dimension_semantics = [#tpu.dimension_semantics<arbitrary>, #tpu.dimension_semantics<arbitrary>, #tpu.dimension_semantics<arbitrary>], iteration_bounds = array<i64: 3, 2, 2>, scalar_prefetch = 0 : i64, scratch_operands = 2 : i64, tpu.core_type = #tpu.core_type<tc>, window_params = [{transform_indices = @transform_0, window_bounds = array<i64: 256, 256>}, {transform_indices = @transform_1, window_bounds = array<i64: 256, 128>}, {pipeline_mode = #tpu.pipeline_mode<synchronous>, transform_indices = @transform_2, window_bounds = array<i64: 1, 128>}, {transform_indices = @transform_3, window_bounds = array<i64: 1>}, {pipeline_mode = #tpu.pipeline_mode<synchronous>, transform_indices = @transform_4, window_bounds = array<i64: 512, 128>}]} {
    %c256_i32 = arith.constant 256 : i32
    %0 = arith.muli %arg1, %c256_i32 : i32
    %1 = tpu.assume_multiple %0, 256 : i32
    %c0 = arith.constant 0 : index
    %2 = memref.load %arg6[%c0] : memref<1xf32, #tpu.memory_space<smem>>
    %c0_i32 = arith.constant 0 : i32
    %3 = arith.cmpi eq, %arg2, %c0_i32 : i32
    %4 = arith.extui %3 : i1 to i32
    %c0_i32_0 = arith.constant 0 : i32
    %5 = arith.cmpi ne, %4, %c0_i32_0 : i32
    scf.if %5 {
      %cst = arith.constant 0.000000e+00 : f32
      %20 = vector.broadcast %cst : f32 to vector<256x128xf32>
      %c0_8 = arith.constant 0 : index
      %c0_9 = arith.constant 0 : index
      %21 = vector.load %arg9[%c0_8, %c0_9] : memref<256x128xf32, #tpu.memory_space<vmem>>, vector<256x128xf32>
      tpu.vector_store %arg9[%c0_8, %c0_9], %20 {strides = array<i32>} : memref<256x128xf32, #tpu.memory_space<vmem>>, vector<256x128xf32>,
    } else {
    }
    %c0_i32_1 = arith.constant 0 : i32
    %6 = arith.cmpi eq, %arg0, %c0_i32_1 : i32
    %7 = arith.cmpi eq, %arg2, %arg1 : i32
    %8 = arith.andi %6, %7 : i1
    %9 = arith.extui %8 : i1 to i32
    %c0_i32_2 = arith.constant 0 : i32
    %10 = arith.cmpi ne, %9, %c0_i32_2 : i32
    scf.if %10 {
      %c0_8 = arith.constant 0 : index
      %c0_9 = arith.constant 0 : index
      %20 = vector.load %arg4[%c0_8, %c0_9] : memref<256x128xf32, #tpu.memory_space<vmem>>, vector<256x128xf32>
      %c0_10 = arith.constant 0 : index
      %c0_11 = arith.constant 0 : index
      %21 = vector.load %arg5[%c0_10, %c0_11] : memref<1x128xf32, #tpu.memory_space<vmem>>, vector<1x128xf32>
      %22 = vector.broadcast %21 : vector<1x128xf32> to vector<256x128xf32>
      %23 = arith.mulf %20, %22 : vector<256x128xf32>
      %cst = arith.constant dense<0.000000e+00> : vector<256xf32>
      %24 = vector.multi_reduction <add>, %23, %cst [1] : vector<256x128xf32> to vector<256xf32>
      %25 = vector.shape_cast %24 : vector<256xf32> to vector<256x1xf32>
      %26 = vector.broadcast %2 : f32 to vector<256x1xf32>
      %27 = arith.addf %25, %26 : vector<256x1xf32>
      %28 = arith.negf %27 : vector<256x1xf32>
      %29 = math.exp %28 : vector<256x1xf32>
      %cst_12 = arith.constant 1.000000e+00 : f32
      %30 = vector.broadcast %cst_12 : f32 to vector<256x1xf32>
      %31 = arith.addf %30, %29 : vector<256x1xf32>
      %32 = arith.divf %30, %31 : vector<256x1xf32>
      %33 = vector.broadcast %32 : vector<256x1xf32> to vector<256x128xf32>
      %34 = arith.mulf %33, %20 : vector<256x128xf32>
      %35 = arith.index_cast %1 : i32 to index
      %c0_13 = arith.constant 0 : index
      %36 = vector.load %arg7[%35, %c0_13] : memref<512x128xf32, #tpu.memory_space<vmem>>, vector<256x128xf32>
      tpu.vector_store %arg7[%35, %c0_13], %34 {strides = array<i32>} : memref<512x128xf32, #tpu.memory_space<vmem>>, vector<256x128xf32>,
    } else {
    }
    %c0_i32_3 = arith.constant 0 : i32
    %11 = arith.cmpi eq, %arg0, %c0_i32_3 : i32
    %12 = arith.extui %11 : i1 to i32
    %c0_i32_4 = arith.constant 0 : i32
    %13 = arith.cmpi ne, %12, %c0_i32_4 : i32
    scf.if %13 {
      %c0_8 = arith.constant 0 : index
      %c0_9 = arith.constant 0 : index
      %20 = vector.load %arg9[%c0_8, %c0_9] : memref<256x128xf32, #tpu.memory_space<vmem>>, vector<256x128xf32>
      %c0_10 = arith.constant 0 : index
      %c0_11 = arith.constant 0 : index
      %21 = vector.load %arg3[%c0_10, %c0_11] : memref<256x256xbf16, #tpu.memory_space<vmem>>, vector<256x256xbf16>
      %c0_12 = arith.constant 0 : index
      %c0_13 = arith.constant 0 : index
      %22 = vector.load %arg4[%c0_12, %c0_13] : memref<256x128xf32, #tpu.memory_space<vmem>>, vector<256x128xf32>
      %23 = arith.truncf %22 : vector<256x128xf32> to vector<256x128xbf16>
      %cst = arith.constant dense<0.000000e+00> : vector<256x128xf32>
      %24 = tpu.matmul %21, %23, %cst {dimension_numbers = #tpu.dot_dimension_numbers<[1], [0], [0], [1], [0, 0, 1, 1], [], []>} : vector<256x256xbf16>, vector<256x128xbf16>, vector<256x128xf32> -> vector<256x128xf32>
      %25 = arith.addf %20, %24 : vector<256x128xf32>
      %c0_14 = arith.constant 0 : index
      %c0_15 = arith.constant 0 : index
      %26 = vector.load %arg9[%c0_14, %c0_15] : memref<256x128xf32, #tpu.memory_space<vmem>>, vector<256x128xf32>
      tpu.vector_store %arg9[%c0_14, %c0_15], %25 {strides = array<i32>} : memref<256x128xf32, #tpu.memory_space<vmem>>, vector<256x128xf32>,
    } else {
    }
    %c0_i32_5 = arith.constant 0 : i32
    %14 = arith.cmpi sgt, %arg0, %c0_i32_5 : i32
    %15 = arith.extui %14 : i1 to i32
    %c0_i32_6 = arith.constant 0 : i32
    %16 = arith.cmpi ne, %15, %c0_i32_6 : i32
    scf.if %16 {
      %c1_i32_8 = arith.constant 1 : i32
      %20 = arith.subi %arg0, %c1_i32_8 : i32
      %c2_i32 = arith.constant 2 : i32
      %c0_i32_9 = arith.constant 0 : i32
      %21 = arith.cmpi eq, %c2_i32, %c0_i32_9 : i32
      %c1_i32_10 = arith.constant 1 : i32
      %22 = arith.select %21, %c1_i32_10, %c2_i32 : i32
      %23 = arith.remsi %20, %22 : i32
      %c0_i32_11 = arith.constant 0 : i32
      %24 = arith.cmpi ne, %23, %c0_i32_11 : i32
      %c0_i32_12 = arith.constant 0 : i32
      %25 = arith.cmpi slt, %23, %c0_i32_12 : i32
      %c0_i32_13 = arith.constant 0 : i32
      %26 = arith.cmpi slt, %22, %c0_i32_13 : i32
      %27 = arith.xori %25, %26 : i1
      %28 = arith.andi %27, %24 : i1
      %29 = arith.addi %23, %22 : i32
      %30 = arith.select %28, %29, %23 : i32
      %c512_i32 = arith.constant 512 : i32
      %31 = arith.muli %30, %c512_i32 : i32
      %c256_i32_14 = arith.constant 256 : i32
      %32 = arith.muli %arg2, %c256_i32_14 : i32
      %33 = arith.addi %31, %32 : i32
      %34 = tpu.assume_multiple %33, 256 : i32
      %c0_15 = arith.constant 0 : index
      %c0_16 = arith.constant 0 : index
      %35 = vector.load %arg9[%c0_15, %c0_16] : memref<256x128xf32, #tpu.memory_space<vmem>>, vector<256x128xf32>
      %c0_17 = arith.constant 0 : index
      %c0_18 = arith.constant 0 : index
      %36 = vector.load %arg3[%c0_17, %c0_18] : memref<256x256xbf16, #tpu.memory_space<vmem>>, vector<256x256xbf16>
      %37 = arith.index_cast %34 : i32 to index
      %c0_19 = arith.constant 0 : index
      %38 = vector.load %arg8[%37, %c0_19] : memref<1024x128xbf16, #tpu.memory_space<vmem>>, vector<256x128xbf16>
      %cst = arith.constant dense<0.000000e+00> : vector<256x128xf32>
      %39 = tpu.matmul %36, %38, %cst {dimension_numbers = #tpu.dot_dimension_numbers<[1], [0], [0], [1], [0, 0, 1, 1], [], []>} : vector<256x256xbf16>, vector<256x128xbf16>, vector<256x128xf32> -> vector<256x128xf32>
      %40 = arith.addf %35, %39 : vector<256x128xf32>
      %c0_20 = arith.constant 0 : index
      %c0_21 = arith.constant 0 : index
      %41 = vector.load %arg9[%c0_20, %c0_21] : memref<256x128xf32, #tpu.memory_space<vmem>>, vector<256x128xf32>
      tpu.vector_store %arg9[%c0_20, %c0_21], %40 {strides = array<i32>} : memref<256x128xf32, #tpu.memory_space<vmem>>, vector<256x128xf32>,
    } else {
    }
    %c1_i32 = arith.constant 1 : i32
    %17 = arith.cmpi eq, %arg2, %c1_i32 : i32
    %18 = arith.extui %17 : i1 to i32
    %c0_i32_7 = arith.constant 0 : i32
    %19 = arith.cmpi ne, %18, %c0_i32_7 : i32
    scf.if %19 {
      %c0_8 = arith.constant 0 : index
      %c0_9 = arith.constant 0 : index
      %20 = vector.load %arg9[%c0_8, %c0_9] : memref<256x128xf32, #tpu.memory_space<vmem>>, vector<256x128xf32>
      %c2_i32 = arith.constant 2 : i32
      %21 = arith.cmpi slt, %arg0, %c2_i32 : i32
      %22 = arith.extui %21 : i1 to i32
      %c0_i32_10 = arith.constant 0 : i32
      %23 = arith.cmpi ne, %22, %c0_i32_10 : i32
      scf.if %23 {
        %c2_i32_16 = arith.constant 2 : i32
        %c0_i32_17 = arith.constant 0 : i32
        %43 = arith.cmpi eq, %c2_i32_16, %c0_i32_17 : i32
        %c1_i32_18 = arith.constant 1 : i32
        %44 = arith.select %43, %c1_i32_18, %c2_i32_16 : i32
        %45 = arith.remsi %arg0, %44 : i32
        %c0_i32_19 = arith.constant 0 : i32
        %46 = arith.cmpi ne, %45, %c0_i32_19 : i32
        %c0_i32_20 = arith.constant 0 : i32
        %47 = arith.cmpi slt, %45, %c0_i32_20 : i32
        %c0_i32_21 = arith.constant 0 : i32
        %48 = arith.cmpi slt, %44, %c0_i32_21 : i32
        %49 = arith.xori %47, %48 : i1
        %50 = arith.andi %49, %46 : i1
        %51 = arith.addi %45, %44 : i32
        %52 = arith.select %50, %51, %45 : i32
        %c512_i32 = arith.constant 512 : i32
        %53 = arith.muli %52, %c512_i32 : i32
        %54 = arith.addi %53, %1 : i32
        %55 = tpu.assume_multiple %54, 256 : i32
        %56 = arith.truncf %20 : vector<256x128xf32> to vector<256x128xbf16>
        %57 = arith.index_cast %55 : i32 to index
        %c0_22 = arith.constant 0 : index
        %58 = vector.load %arg8[%57, %c0_22] : memref<1024x128xbf16, #tpu.memory_space<vmem>>, vector<256x128xbf16>
        tpu.vector_store %arg8[%57, %c0_22], %56 {strides = array<i32>} : memref<1024x128xbf16, #tpu.memory_space<vmem>>, vector<256x128xbf16>,
      } else {
      }
      %24 = arith.index_cast %1 : i32 to index
      %c0_11 = arith.constant 0 : index
      %25 = vector.load %arg7[%24, %c0_11] : memref<512x128xf32, #tpu.memory_space<vmem>>, vector<256x128xf32>
      %c0_12 = arith.constant 0 : index
      %c0_13 = arith.constant 0 : index
      %26 = vector.load %arg5[%c0_12, %c0_13] : memref<1x128xf32, #tpu.memory_space<vmem>>, vector<1x128xf32>
      %27 = vector.broadcast %26 : vector<1x128xf32> to vector<256x128xf32>
      %28 = arith.mulf %20, %27 : vector<256x128xf32>
      %cst = arith.constant dense<0.000000e+00> : vector<256xf32>
      %29 = vector.multi_reduction <add>, %28, %cst [1] : vector<256x128xf32> to vector<256xf32>
      %30 = vector.shape_cast %29 : vector<256xf32> to vector<256x1xf32>
      %31 = vector.broadcast %2 : f32 to vector<256x1xf32>
      %32 = arith.addf %30, %31 : vector<256x1xf32>
      %33 = arith.negf %32 : vector<256x1xf32>
      %34 = math.exp %33 : vector<256x1xf32>
      %cst_14 = arith.constant 1.000000e+00 : f32
      %35 = vector.broadcast %cst_14 : f32 to vector<256x1xf32>
      %36 = arith.addf %35, %34 : vector<256x1xf32>
      %37 = arith.divf %35, %36 : vector<256x1xf32>
      %38 = vector.broadcast %37 : vector<256x1xf32> to vector<256x128xf32>
      %39 = arith.mulf %38, %20 : vector<256x128xf32>
      %40 = arith.addf %25, %39 : vector<256x128xf32>
      %41 = arith.index_cast %1 : i32 to index
      %c0_15 = arith.constant 0 : index
      %42 = vector.load %arg7[%41, %c0_15] : memref<512x128xf32, #tpu.memory_space<vmem>>, vector<256x128xf32>
      tpu.vector_store %arg7[%41, %c0_15], %40 {strides = array<i32>} : memref<512x128xf32, #tpu.memory_space<vmem>>, vector<256x128xf32>,
    } else {
    }
    return
  }
  func.func @transform_0(%arg0: i32, %arg1: i32, %arg2: i32) -> (i32, i32) {
    %c0_i32 = arith.constant 0 : i32
    return %arg1, %arg2 : i32, i32
  }
  func.func @transform_1(%arg0: i32, %arg1: i32, %arg2: i32) -> (i32, i32) {
    %c0_i32 = arith.constant 0 : i32
    %0 = arith.cmpi eq, %arg0, %c0_i32 : i32
    %c0_i32_0 = arith.constant 0 : i32
    %1 = arith.select %0, %arg2, %c0_i32_0 : i32
    %c0_i32_1 = arith.constant 0 : i32
    %c0_i32_2 = arith.constant 0 : i32
    return %1, %c0_i32_1 : i32, i32
  }
  func.func @transform_2(%arg0: i32, %arg1: i32, %arg2: i32) -> (i32, i32) {
    %c0_i32 = arith.constant 0 : i32
    %c0_i32_0 = arith.constant 0 : i32
    %c0_i32_1 = arith.constant 0 : i32
    return %c0_i32, %c0_i32_0 : i32, i32
  }
  func.func @transform_3(%arg0: i32, %arg1: i32, %arg2: i32) -> i32 {
    %c0_i32 = arith.constant 0 : i32
    %c0_i32_0 = arith.constant 0 : i32
    return %c0_i32 : i32
  }
  func.func @transform_4(%arg0: i32, %arg1: i32, %arg2: i32) -> (i32, i32) {
    %c0_i32 = arith.constant 0 : i32
    %c0_i32_0 = arith.constant 0 : i32
    %c0_i32_1 = arith.constant 0 : i32
    return %c0_i32, %c0_i32_0 : i32, i32
  }
}

</mosaic_0001>

<bundles_post_ra>
// kernel: tpu_custom_call.1
= control target key start
LH: loop header
LB: loop body
LE: loop exit
PB: predicated region body
PF: predicated region fallthrough
CT: control target
= control target key end

     0   :  { %s4532_s0 = inlined_call_operand.hbm [shape: bf16[512,512], index: 0, kind: input, shape index: {}]   ;;  %s4533_s1 = inlined_call_operand.hbm [shape: f32[512,128], index: 1, kind: input, shape index: {}]   ;;  %s4534_s2 = inlined_call_operand.vmem [shape: f32[1,128], index: 2, kind: input, shape index: {}]   ;;  %s4535_s3 = inlined_call_operand.<no memory space> [shape: f32[1], index: 3, kind: input, shape index: {}]   ;;  %s4536_s4 = inlined_call_operand.hbm [shape: f32[512,128], index: 4, kind: output, shape index: {}]  }
   0x1   :  { %4548 = sst [smem:[#allocation18_spill]] %s4532_s0 }
   0x2   :  { %9 = sst [smem:[#allocation4]] %s4535_s3 }
   0x3   :  { %10 = vsyncpa [#allocation6], 0 }
   0x4   :  { %12 = vsyncpa [#allocation6 + $0x1], 0 }
   0x5   :  { %13 = vsyncpa [#allocation9], 0 }
   0x6   :  { %15 = vsyncpa [#allocation9 + $0x1], 0 }
   0x7   :  { %16 = vsyncpa [#allocation7], 0  ;;  %s3541_s17 = smov 0   ;;  %s3543_s18 = smov 0  }
   0x8   :  { %s3545_s19 = smov 0   ;;  %s3547_s20 = smov 0  }
   0x9   :  { %s3549_s21 = smov 0   ;;  %s3551_s22 = smov 0  }
   0xa   :  { %s3553_s23 = smov 0   ;;  %s3555_s3 = smov 0  }
   0xb   :  { %s3557_s24 = smov 0   ;;  %s3559_s25 = smov 0  }
   0xc   :  { %s3561_s26 = smov 0   ;;  %s3563_s27 = smov 0  }
   0xd   :  { %s3565_s28 = smov 0  }
   0xe LB: > { %4549 = sst [smem:[#allocation14_spill]] %s3498_s27  ;;  %s37_s29 = sadd.s32 1, %s3494_s26  ;;  %s3502_s28 = sphi %s3565_s28, %s22_s28   ;;  %s3498_s27 = sphi %s3563_s27, %s4574_s27   ;;  %s3494_s26 = sphi %s3561_s26, %s4585_s26   ;;  %s3490_s25 = sphi %s3559_s25, %s4584_s25   ;;  %s3486_s24 = sphi %s3557_s24, %s4571_s24   ;;  %s3482_s3 = sphi %s3555_s3, %s4583_s3   ;;  %s3478_s23 = sphi %s3553_s23, %s4582_s23   ;;  %s3474_s22 = sphi %s3551_s22, %s4581_s22   ;;  %s3470_s21 = sphi %s3549_s21, %s4580_s21   ;;  %s3466_s20 = sphi %s3547_s20, %s4579_s20   ;;  %s3462_s19 = sphi %s3545_s19, %s4578_s19   ;;  %s3458_s18 = sphi %s3543_s18, %s4577_s18   ;;  %s3454_s17 = sphi %s3541_s17, %s4576_s17  }
   0xf   : > { %s50_s30 = sadd.s32 1, %s3474_s22  ;;  %p57_p0 = scmp.ne.s32.totalorder %s3474_s22, %s3470_s21 }
  0x10   : > { %p4538_p1 = scmp.eq.s32.totalorder %s3502_s28, 0  ;;  %p63_p2 = scmp.ne.s32.totalorder %s3470_s21, %s3466_s20 }
  0x11   : > { %p4537_p4 = scmp.lt.s32.totalorder %s3502_s28, 12  ;;  %s186_s5 = sand.u32 1, %s3474_s22  }
  0x12   : > { %p59_p3 = por %p4538_p1, %p57_p0  ;;  %s2402_s6 = sshll.u32 %s3490_s25, 1 }
  0x13   : > { %s2400_s7 = sshll.u32 %s186_s5, 8  ;;  %s2563_s8 = sshll.u32 %s3494_s26, 7 }
  0x14   : > { %s197_s9 = sadd.s32 %s2563_s8, %s2402_s6  ;;  %s190_s10 = scalar_lea.vmem [#allocation5], %s2400_s7 }
  0x15   : > { %s200_s11 = sshll.u32 %s190_s10, 4  ;;  %s2404_s12 = sshll.u32 %s197_s9, 6  ;;  %s3619_s11 = int_to_ptr.vmem [resolvable:$true] %s200_s11 }
  0x16   : > { %s4550_s0 = sld [smem:[#allocation18_spill]]  ;;  %p3628_p5 = pnand %p4537_p4, %p59_p3 }
  0x17   : > { %s3632_s6 = scalar_lea.sflag [#allocation6], %s186_s5 }
  0x18   : > { %p3304_p7 = pneg %p3628_p5 }
  0x1c   : > { %s3624_s15 = scalar_lea.hbm %s4550_s0, %s2404_s12  ;;  %s3307_s10 = scalar_lea.hbm %s4550_s0, 16384 }
  0x1d   : > { %s3302_s7 = scalar_lea.hbm %s3624_s15, 4096  ;;  %p3308_p10 = scmp.lt.u32.totalorder %s3624_s15, %s4550_s0 }
  0x1e   : > { %p3303_p6 = scmp.ne.s32.totalorder %s3624_s15, %s3302_s7  ;;  %p3309_p11 = scmp.lt.u32.totalorder %s3307_s10, %s3302_s7 }
  0x1f   : > { %p3311_p13 = scmp.lt.u32.totalorder %s3302_s7, %s3624_s15 }
  0x20   : > { %p3305_p8 = pnand %p3304_p7, %p3303_p6  ;;  %p3310_p12 = por %p3309_p11, %p3308_p10 }
  0x22   : > { %p3306_p9 = pneg %p3305_p8  ;;  %p3312_p0 = por %p3311_p13, %p3310_p12 }
  0x24   : > { %p3313_p3 = pnand %p3312_p0, %p3306_p9 }
  0x26   : > { %3316 = shalt.err (!%p3313_p3)
}
  0x27   : > { %s3317_s5 = scalar_lea.vmem %s3619_s11, 4096  ;;  %s3504_s14 = smov [#allocation5]  }
  0x28   : > { %p3318_p6 = scmp.ne.s32.totalorder %s3619_s11, %s3317_s5  ;;  %s3322_s8 = sshll.u32 %s3504_s14, 4  ;;  %s3323_s8 = int_to_ptr.vmem [resolvable:$false] %s3322_s8 }
  0x29   : > { %s3324_s9 = scalar_lea.vmem %s3323_s8, 8192  ;;  %p3325_p1 = scmp.lt.s32.totalorder %s3619_s11, %s3323_s8 }
  0x2a   : > { %p3320_p8 = pnand %p3318_p6, %p3304_p7  ;;  %p3326_p10 = scmp.lt.s32.totalorder %s3324_s9, %s3317_s5 }
  0x2c   : > { %p3321_p4 = pneg %p3320_p8  ;;  %p3327_p11 = por %p3326_p10, %p3325_p1 }
  0x2e   : > { %p3328_p12 = pnand %p3327_p11, %p3321_p4 }
  0x30   : > { %3331 = shalt.err (!%p3328_p12)
}
  0x31   : > { %s3505_s7 = smov 256   ;;  %s4540_s10 = smov 128  }
  0x32   : > { %s4541_s12 = smov 8   ;;  %p2408_p1 = scmp.ge.s32.totalorder %s3502_s28, 1 }
  0x33   : > { %2832 = dma.hbm_to_vmem [thread:$0]  (!%p3628_p5), %s3624_s15, 4096, %s3619_s11, %s3632_s6, %s3505_s7, %s4540_s10, %s4541_s12  }
  0x34   : > { %p231_p4 = scmp.lt.s32.totalorder %s3502_s28, 13  ;;  %s4539_s5 = sadd.s32 4294967295, %s3502_s28  }
  0x35   : > { %s34_s14 = sadd.s32 1, %s3490_s25  ;;  %s41_s8 = sadd.s32 1, %s3498_s27 }
  0x36   : > { %p3664_p7 = pnand %p2408_p1, %p231_p4  ;;  %p35_p9 = scmp.ge.s32.totalorder %s34_s14, 2 }
  0x37   : > { %p3673_p13 = scmp.eq.s32.totalorder %s4539_s5, 0  ;;  %p73_p5 = scmp.eq.s32.totalorder %s3498_s27, 0 }
  0x38   : > { %s4587_s14 = smov (%p35_p9, %s34_s14), 0  ;;  %s4589_s29 = smov (!%p35_p9, %s37_s29), %s3494_s26 }
  0x39   : > { %4554 = sst [smem:[#allocation15_spill]] %s4587_s14  ;;  %s46_s15 = ssub.s32 %s3490_s25, %s4587_s14 }
  0x3a   : > { %p3691_p0 = por %p3673_p13, %p63_p2  ;;  %p39_p3 = scmp.ge.s32.totalorder %s4589_s29, 2 }
  0x3b   : > { %p87_p6 = scmp.ne.s32.totalorder %s3462_s19, %s3458_s18  ;;  %p4557_p8 = scmp.eq.s32.totalorder %s3502_s28, 0 }
  0x3c   : > { %s4555_s6 = scalar_select %p3691_p0, 1, 0 }
  0x3d   : > { %s74_s9 = scalar_select %p73_p5, %s3490_s25, 0 }
  0x3e   : > { %s4591_s29 = smov (%p39_p3, %s4589_s29), 0  ;;  %s4593_s8 = smov (!%p39_p3, %s41_s8), %s3498_s27 }
  0x3f   : > { %4556 = sst [smem:[#allocation16_spill]] %s4591_s29  ;;  %s45_s7 = ssub.s32 %s3494_s26, %s4591_s29 }
  0x40   : > { %p3705_p10 = por %p87_p6, %p4557_p8  ;;  %p43_p11 = scmp.ge.s32.totalorder %s4593_s8, 3 }
  0x41   : > { %s47_s20 = sor.u32 %s46_s15, %s45_s7  ;;  %p93_p12 = scmp.ne.s32.totalorder %s3458_s18, %s3454_s17 }
  0x42   : > { %p48_p2 = scmp.eq.s32.totalorder %s47_s20, 0  ;;  %s4595_s8 = smov (%p43_p11, %s4593_s8), 0 }
  0x43   : > { %4559 = sst [smem:[#allocation17_spill]] %s4595_s8  ;;  %p75_p1 = scmp.eq.s32.totalorder %s4595_s8, 0 }
  0x44   : > { %s3716_s10 = scalar_select %p48_p2, %s3474_s22, %s50_s30  }
  0x45   : > { %p3721_p4 = por %p93_p12, %p3673_p13  ;;  %s210_s11 = sand.u32 1, %s3462_s19  }
  0x46   : > { %s2564_s15 = sshll.u32 %s74_s9, 12  ;;  %s2405_s0 = sshll.u32 %s210_s11, 8 }
  0x47   : > { %s4560_s12 = scalar_select %p3721_p4, 1, 0 }
  0x48   : > { %s76_s7 = scalar_select %p75_p1, %s4587_s14, 0 }
  0x49   : > { %s3730_s27 = scalar_lea.hbm %s4533_s1, %s2564_s15  ;;  %s214_s30 = scalar_lea.vmem [#allocation8], %s2405_s0 }
  0x4a   : > { %s77_s20 = ssub.s32 %s74_s9, %s76_s7  ;;  %s223_s16 = sshll.u32 %s214_s30, 4  ;;  %s3745_s16 = int_to_ptr.vmem [resolvable:$true] %s223_s16 }
  0x4b   : > { %p78_p9 = scmp.eq.s32.totalorder %s77_s20, 0  ;;  %p4561_p13 = scmp.lt.s32.totalorder %s3502_s28, 12 }
  0x4c   : > { %s4563_s14 = sadd.s32 1, %s3462_s19  ;;  %s3747_s29 = scalar_lea.sflag [#allocation9], %s210_s11 }
  0x4d   : > { %p3736_p5 = pnand %p4561_p13, %p3705_p10  ;;  %s3332_s15 = scalar_lea.hbm %s3730_s27, 4096 }
  0x4e   : > { %s3743_s9 = scalar_select %p78_p9, %s3462_s19, %s4563_s14  }
  0x4f   : > { %p3333_p3 = scmp.ne.s32.totalorder %s3730_s27, %s3332_s15  ;;  %p3334_p6 = pneg %p3736_p5 }
  0x50   : > { %s3337_s7 = scalar_lea.hbm %s4533_s1, 8192  ;;  %p3338_p11 = scmp.lt.u32.totalorder %s3730_s27, %s4533_s1 }
  0x51   : > { %p3335_p8 = pnand %p3334_p6, %p3333_p3  ;;  %p3339_p2 = scmp.lt.u32.totalorder %s3337_s7, %s3332_s15 }
  0x52   : > { %p3341_p1 = scmp.lt.u32.totalorder %s3332_s15, %s3730_s27 }
  0x53   : > { %p3336_p10 = pneg %p3335_p8  ;;  %p3340_p12 = por %p3339_p2, %p3338_p11 }
  0x55   : > { %p3342_p9 = por %p3341_p1, %p3340_p12 }
  0x57   : > { %p3343_p13 = pnand %p3342_p9, %p3336_p10 }
  0x59   : > { %3346 = shalt.err (!%p3343_p13)
}
  0x5a   : > { %s3347_s14 = scalar_lea.vmem %s3745_s16, 4096  ;;  %s3508_s11 = smov [#allocation8]  }
  0x5b   : > { %p3348_p3 = scmp.ne.s32.totalorder %s3745_s16, %s3347_s14  ;;  %s3352_s30 = sshll.u32 %s3508_s11, 4  ;;  %s3353_s30 = int_to_ptr.vmem [resolvable:$false] %s3352_s30 }
  0x5c   : > { %s3354_s0 = scalar_lea.vmem %s3353_s30, 8192  ;;  %p3355_p0 = scmp.lt.s32.totalorder %s3745_s16, %s3353_s30 }
  0x5d   : > { %p3350_p8 = pnand %p3348_p3, %p3334_p6  ;;  %p3356_p11 = scmp.lt.s32.totalorder %s3354_s0, %s3347_s14 }
  0x5f   : > { %p3351_p4 = pneg %p3350_p8  ;;  %p3357_p2 = por %p3356_p11, %p3355_p0 }
  0x61   : > { %p3358_p12 = pnand %p3357_p2, %p3351_p4 }
  0x63   : > { %3361 = shalt.err (!%p3358_p12)
}
  0x64   : > { %s4564_s15 = smov 8   ;;  %s4565_s5 = smov 128  }
  0x65   : > { %2835 = dma.hbm_to_vmem [thread:$0]  (!%p3736_p5), %s3730_s27, 4096, %s3745_s16, %s3747_s29, %s4565_s5, %s4565_s5, %s4564_s15  }
  0x66   : > { %235 = sbr.rel (%p3664_p7) target bundleno = 1316 (0x524), region = 36  ;;  %s237_s7 = sand.u32 (!%p3664_p7), 1, %s3470_s21  }
  0x67   : > { %s2409_s20 = sshll.u32 (!%p3664_p7), %s237_s7, 8  ;;  %s238_s17 = scalar_lea.sflag (!%p3664_p7), [#allocation6], %s237_s7 }
  0x68   : > { %s3781_s14 = scalar_lea.vmem (!%p3664_p7), [#allocation5], %s2409_s20  ;;  %p4566_p0 = scmp.ne.s32.totalorder (!%p3664_p7), %s4555_s6, 0 }
  0x6d   : > { %3441 = dma.done.wait (%p4566_p0), %s238_s17, 4096  }
  0x6e   : > { %3443 = vsyncadd (%p4566_p0), %s238_s17, 4294963200  ;;  %s246_s8 = sand.u32 1, %s3458_s18   ;;  %p4567_p7 = scmp.ne.s32.totalorder %s4560_s12, 0 }
  0x6f   : > { %s2410_s11 = sshll.u32 %s246_s8, 8  ;;  %s247_s27 = scalar_lea.sflag [#allocation9], %s246_s8 }
  0x70   : > { %s3788_s16 = scalar_lea.vmem [#allocation8], %s2410_s11 }
  0x71   : > { %3445 = dma.done.wait (%p4567_p7), %s247_s27, 4096  }
  0x72   : > { %3447 = vsyncadd (%p4567_p7), %s247_s27, 4294963200  ;;  %s3795_s13 = sshll.u32 %s3482_s3, 8  ;;  %s3797_s29 = sld [smem:[#allocation4]] }
  0x73   : > { %p2412_p4 = scmp.ne.s32.totalorder %s3478_s23, 0 }
  0x74   : > { %v3509_v0 = vmov (!%p2412_p4), 0.0  }
  0x75   : > { %286 = sbr.rel (%p2412_p4) target bundleno = 133 (0x85), region = 48  ;;  %287 = vst [vmem:[#allocation3] sm:$0xff] (!%p2412_p4), %v3509_v0  ;;  %288 = vst [vmem:[#allocation3 + $0x8] sm:$0xff] (!%p2412_p4), %v3509_v0 }
  0x76   : > { %289 = vst [vmem:[#allocation3 + $0x10] sm:$0xff] (!%p2412_p4), %v3509_v0  ;;  %290 = vst [vmem:[#allocation3 + $0x18] sm:$0xff] (!%p2412_p4), %v3509_v0 }
  0x77   : > { %291 = vst [vmem:[#allocation3 + $0x20] sm:$0xff] (!%p2412_p4), %v3509_v0  ;;  %292 = vst [vmem:[#allocation3 + $0x28] sm:$0xff] (!%p2412_p4), %v3509_v0 }
  0x78   : > { %293 = vst [vmem:[#allocation3 + $0x30] sm:$0xff] (!%p2412_p4), %v3509_v0  ;;  %294 = vst [vmem:[#allocation3 + $0x38] sm:$0xff] (!%p2412_p4), %v3509_v0 }
  0x79   : > { %295 = vst [vmem:[#allocation3 + $0x40] sm:$0xff] (!%p2412_p4), %v3509_v0  ;;  %296 = vst [vmem:[#allocation3 + $0x48] sm:$0xff] (!%p2412_p4), %v3509_v0 }
  0x7a   : > { %297 = vst [vmem:[#allocation3 + $0x50] sm:$0xff] (!%p2412_p4), %v3509_v0  ;;  %298 = vst [vmem:[#allocation3 + $0x58] sm:$0xff] (!%p2412_p4), %v3509_v0 }
  0x7b   : > { %299 = vst [vmem:[#allocation3 + $0x60] sm:$0xff] (!%p2412_p4), %v3509_v0  ;;  %300 = vst [vmem:[#allocation3 + $0x68] sm:$0xff] (!%p2412_p4), %v3509_v0 }
  0x7c   : > { %301 = vst [vmem:[#allocation3 + $0x70] sm:$0xff] %v3509_v0  ;;  %302 = vst [vmem:[#allocation3 + $0x78] sm:$0xff] %v3509_v0 }
  0x7d   : > { %303 = vst [vmem:[#allocation3 + $0x80] sm:$0xff] %v3509_v0  ;;  %304 = vst [vmem:[#allocation3 + $0x88] sm:$0xff] %v3509_v0 }
  0x7e   : > { %305 = vst [vmem:[#allocation3 + $0x90] sm:$0xff] %v3509_v0  ;;  %306 = vst [vmem:[#allocation3 + $0x98] sm:$0xff] %v3509_v0 }
  0x7f   : > { %307 = vst [vmem:[#allocation3 + $0xa0] sm:$0xff] %v3509_v0  ;;  %308 = vst [vmem:[#allocation3 + $0xa8] sm:$0xff] %v3509_v0 }
  0x80   : > { %309 = vst [vmem:[#allocation3 + $0xb0] sm:$0xff] %v3509_v0  ;;  %310 = vst [vmem:[#allocation3 + $0xb8] sm:$0xff] %v3509_v0 }
  0x81   : > { %311 = vst [vmem:[#allocation3 + $0xc0] sm:$0xff] %v3509_v0  ;;  %312 = vst [vmem:[#allocation3 + $0xc8] sm:$0xff] %v3509_v0 }
  0x82   : > { %313 = vst [vmem:[#allocation3 + $0xd0] sm:$0xff] %v3509_v0  ;;  %314 = vst [vmem:[#allocation3 + $0xd8] sm:$0xff] %v3509_v0 }
  0x83   : > { %315 = vst [vmem:[#allocation3 + $0xe0] sm:$0xff] %v3509_v0  ;;  %316 = vst [vmem:[#allocation3 + $0xe8] sm:$0xff] %v3509_v0 }
  0x84   : > { %317 = vst [vmem:[#allocation3 + $0xf0] sm:$0xff] %v3509_v0  ;;  %318 = vst [vmem:[#allocation3 + $0xf8] sm:$0xff] %v3509_v0 }
  0x85 PF: > { %p319_p5 = scmp.eq.s32.totalorder %s3486_s24, 0  ;;  %p320_p6 = scmp.eq.s32.totalorder %s3478_s23, %s3482_s3 }
  0x87   : > { %p321_p10 = pnand %p320_p6, %p319_p5 }
  0x88   : > { %v3804_v1 = vld [vmem:[%s3788_s16 + $0x10] sm:$0xff] (!%p321_p10)  ;;  %v3809_v2 = vld [vmem:[%s4534_s2] ss:$0 sm:$0xff] (!%p321_p10)  ;;  %v3819_v6 = vld [vmem:[%s3788_s16 + $0x18] sm:$0xff] (!%p321_p10)  ;;  %s3990_s3 = scalar_lea.vmem (!%p321_p10), [#allocation10], %s3795_s13 }
  0x89   : > { %324 = sbr.rel (%p321_p10) target bundleno = 376 (0x178), region = 52  ;;  %v3812_v3 = vld [vmem:[%s3788_s16] sm:$0xff] (!%p321_p10)  ;;  %v366_v4 = vmul.f32 (!%p321_p10), %v3809_v2, %v3804_v1  ;;  %v3822_v7 = vld [vmem:[%s3788_s16 + $0x8] sm:$0xff] (!%p321_p10)  ;;  %v367_v8 = vmul.f32 (!%p321_p10), %v3809_v2, %v3819_v6  ;;  %v3839_v14 = vld [vmem:[%s3788_s16 + $0x38] sm:$0xff] (!%p321_p10) }
  0x8a   : > { %v364_v5 = vmul.f32 (!%p321_p10), %v3809_v2, %v3812_v3  ;;  %v365_v9 = vmul.f32 (!%p321_p10), %v3809_v2, %v3822_v7  ;;  %v3829_v10 = vld [vmem:[%s3788_s16 + $0x28] sm:$0xff] (!%p321_p10)  ;;  %v3832_v11 = vld [vmem:[%s3788_s16 + $0x20] sm:$0xff] (!%p321_p10)  ;;  %v3842_v15 = vld [vmem:[%s3788_s16 + $0x30] sm:$0xff] (!%p321_p10)  ;;  %v371_v16 = vmul.f32 (!%p321_p10), %v3809_v2, %v3839_v14 }
  0x8b   : > { %400 = vadd.xlane.f32.xlu1 (!%p321_p10), %v366_v4  ;;  %v369_v12 = vmul.f32 (!%p321_p10), %v3809_v2, %v3829_v10  ;;  %v368_v13 = vmul.f32 (!%p321_p10), %v3809_v2, %v3832_v11  ;;  %v370_v17 = vmul.f32 (!%p321_p10), %v3809_v2, %v3842_v15  ;;  %v3849_v18 = vld [vmem:[%s3788_s16 + $0x48] sm:$0xff] (!%p321_p10)  ;;  %v3852_v19 = vld [vmem:[%s3788_s16 + $0x40] sm:$0xff] (!%p321_p10)  ;;  %v3859_v22 = vld [vmem:[%s3788_s16 + $0x58] sm:$0xff] (!%p321_p10) }
  0x8c   : > { %396 = vadd.xlane.f32.xlu0 (!%p321_p10), %v364_v5  ;;  %v373_v20 = vmul.f32 (!%p321_p10), %v3809_v2, %v3849_v18  ;;  %v372_v21 = vmul.f32 (!%p321_p10), %v3809_v2, %v3852_v19  ;;  %v3862_v23 = vld [vmem:[%s3788_s16 + $0x50] sm:$0xff] (!%p321_p10)  ;;  %v375_v24 = vmul.f32 (!%p321_p10), %v3809_v2, %v3859_v22  ;;  %v3869_v26 = vld [vmem:[%s3788_s16 + $0x68] sm:$0xff] (!%p321_p10)  ;;  %v3872_v27 = vld [vmem:[%s3788_s16 + $0x60] sm:$0xff] (!%p321_p10)  ;;  %v3969_v5 = vstv (!%p321_p10), %s3797_s29 }
  0x8d   : > { %v374_v25 = vmul.f32 (!%p321_p10), %v3809_v2, %v3862_v23  ;;  %v377_v28 = vmul.f32 (!%p321_p10), %v3809_v2, %v3869_v26  ;;  %v376_v29 = vmul.f32 (!%p321_p10), %v3809_v2, %v3872_v27  ;;  %v3879_v30 = vld [vmem:[%s3788_s16 + $0x78] sm:$0xff] (!%p321_p10)  ;;  %v3882_v31 = vld [vmem:[%s3788_s16 + $0x70] sm:$0xff] (!%p321_p10)  ;;  %v3889_v34 = vld [vmem:[%s3788_s16 + $0x88] sm:$0xff] (!%p321_p10) }
  0x8e   : > { %v379_v32 = vmul.f32 (!%p321_p10), %v3809_v2, %v3879_v30  ;;  %v378_v33 = vmul.f32 (!%p321_p10), %v3809_v2, %v3882_v31  ;;  %v3892_v35 = vld [vmem:[%s3788_s16 + $0x80] sm:$0xff] (!%p321_p10)  ;;  %v381_v36 = vmul.f32 (!%p321_p10), %v3809_v2, %v3889_v34  ;;  %v3899_v38 = vld [vmem:[%s3788_s16 + $0x98] sm:$0xff] (!%p321_p10)  ;;  %v3902_v39 = vld [vmem:[%s3788_s16 + $0x90] sm:$0xff] (!%p321_p10) }
  0x8f   : > { %402 = vadd.xlane.f32.xlu1 (!%p321_p10), %v367_v8  ;;  %v380_v37 = vmul.f32 (!%p321_p10), %v3809_v2, %v3892_v35  ;;  %v383_v40 = vmul.f32 (!%p321_p10), %v3809_v2, %v3899_v38  ;;  %v382_v41 = vmul.f32 (!%p321_p10), %v3809_v2, %v3902_v39  ;;  %v3909_v42 = vld [vmem:[%s3788_s16 + $0xa8] sm:$0xff] (!%p321_p10)  ;;  %v3912_v43 = vld [vmem:[%s3788_s16 + $0xa0] sm:$0xff] (!%p321_p10)  ;;  %v3919_v46 = vld [vmem:[%s3788_s16 + $0xb8] sm:$0xff] (!%p321_p10) }
  0x90   : > { %398 = vadd.xlane.f32.xlu0 %v365_v9  ;;  %v385_v44 = vmul.f32 %v3809_v2, %v3909_v42  ;;  %v384_v45 = vmul.f32 %v3809_v2, %v3912_v43  ;;  %v3922_v47 = vld [vmem:[%s3788_s16 + $0xb0] sm:$0xff]  ;;  %v387_v48 = vmul.f32 %v3809_v2, %v3919_v46  ;;  %v3929_v50 = vld [vmem:[%s3788_s16 + $0xc8] sm:$0xff]  ;;  %v3932_v51 = vld [vmem:[%s3788_s16 + $0xc0] sm:$0xff] }
  0x91   : > { %v386_v49 = vmul.f32 %v3809_v2, %v3922_v47  ;;  %v389_v52 = vmul.f32 %v3809_v2, %v3929_v50  ;;  %v388_v53 = vmul.f32 %v3809_v2, %v3932_v51  ;;  %v3939_v54 = vld [vmem:[%s3788_s16 + $0xd8] sm:$0xff]  ;;  %v3942_v55 = vld [vmem:[%s3788_s16 + $0xd0] sm:$0xff]  ;;  %v3949_v58 = vld [vmem:[%s3788_s16 + $0xe8] sm:$0xff] }
  0x92   : > { %v391_v56 = vmul.f32 %v3809_v2, %v3939_v54  ;;  %v390_v57 = vmul.f32 %v3809_v2, %v3942_v55  ;;  %v3952_v59 = vld [vmem:[%s3788_s16 + $0xe0] sm:$0xff]  ;;  %v393_v60 = vmul.f32 %v3809_v2, %v3949_v58  ;;  %v3959_v62 = vld [vmem:[%s3788_s16 + $0xf8] sm:$0xff]  ;;  %v3962_v63 = vld [vmem:[%s3788_s16 + $0xf0] sm:$0xff] }
  0x93   : > { %406 = vadd.xlane.f32.xlu1 %v369_v12  ;;  %v392_v61 = vmul.f32 %v3809_v2, %v3952_v59  ;;  %v395_v0 = vmul.f32 %v3809_v2, %v3959_v62  ;;  %v394_v4 = vmul.f32 %v3809_v2, %v3962_v63 }
  0x94   : > { %404 = vadd.xlane.f32.xlu0 %v368_v13 }
  0x97   : > { %410 = vadd.xlane.f32.xlu1 %v371_v16 }
  0x98   : > { %408 = vadd.xlane.f32.xlu0 %v370_v17 }
  0x9b   : > { %414 = vadd.xlane.f32.xlu1 %v373_v20 }
  0x9c   : > { %412 = vadd.xlane.f32.xlu0 %v372_v21 }
  0x9f   : > { %418 = vadd.xlane.f32.xlu1 %v375_v24 }
  0xa0   : > { %416 = vadd.xlane.f32.xlu0 %v374_v25 }
  0xa3   : > { %422 = vadd.xlane.f32.xlu1 %v377_v28 }
  0xa4   : > { %420 = vadd.xlane.f32.xlu0 %v376_v29 }
  0xa7   : > { %426 = vadd.xlane.f32.xlu1 %v379_v32 }
  0xa8   : > { %424 = vadd.xlane.f32.xlu0 %v378_v33 }
  0xab   : > { %430 = vadd.xlane.f32.xlu1 %v381_v36 }
  0xac   : > { %428 = vadd.xlane.f32.xlu0 %v380_v37 }
  0xaf   : > { %434 = vadd.xlane.f32.xlu1 %v383_v40 }
  0xb0   : > { %432 = vadd.xlane.f32.xlu0 %v382_v41 }
  0xb3   : > { %438 = vadd.xlane.f32.xlu1 %v385_v44 }
  0xb4   : > { %436 = vadd.xlane.f32.xlu0 %v384_v45 }
  0xb7   : > { %442 = vadd.xlane.f32.xlu1 %v387_v48 }
  0xb8   : > { %440 = vadd.xlane.f32.xlu0 %v386_v49 }
  0xbb   : > { %446 = vadd.xlane.f32.xlu1 %v389_v52 }
  0xbc   : > { %444 = vadd.xlane.f32.xlu0 %v388_v53 }
  0xbf   : > { %450 = vadd.xlane.f32.xlu1 %v391_v56 }
  0xc0   : > { %448 = vadd.xlane.f32.xlu0 %v390_v57 }
  0xc3   : > { %454 = vadd.xlane.f32.xlu1 %v393_v60 }
  0xc4   : > { %452 = vadd.xlane.f32.xlu0 %v392_v61 }
  0xc7   : > { %458 = vadd.xlane.f32.xlu1 %v395_v0 }
  0xc8   : > { %456 = vadd.xlane.f32.xlu0 %v394_v4 }
 0x118   : > { %v401_v8 = vpop.xlane.xlu1 %400 }
 0x119   : > { %v397_v9 = vpop.xlane.xlu0 %396  ;;  %v463_v12 = vadd.f32 %v3969_v5, %v401_v8 }
 0x11a   : > { %v461_v13 = vadd.f32 %v3969_v5, %v397_v9 }
 0x11b   : > { %v2416_v16 = vmul.f32 -1.442695, %v463_v12 }
 0x11c   : > { %v2414_v17 = vmul.f32 -1.442695, %v461_v13  ;;  %v403_v20 = vpop.xlane.xlu1 %402 }
 0x11d   : > { %v399_v21 = vpop.xlane.xlu0 %398  ;;  %2950 = vpow2.f32 %v2416_v16  ;;  %v464_v24 = vadd.f32 %v3969_v5, %v403_v20 }
 0x11e   : > { %v462_v25 = vadd.f32 %v3969_v5, %v399_v21  ;;  %2952 = vpow2.f32 %v2414_v17 }
 0x11f   : > { %v2417_v2 = vmul.f32 -1.442695, %v464_v24 }
 0x120   : > { %v2415_v28 = vmul.f32 -1.442695, %v462_v25  ;;  %v407_v29 = vpop.xlane.xlu1 %406 }
 0x121   : > { %v405_v32 = vpop.xlane.xlu0 %404  ;;  %2954 = vpow2.f32 %v2417_v2  ;;  %v466_v33 = vadd.f32 %v3969_v5, %v407_v29 }
 0x122   : > { %v465_v36 = vadd.f32 %v3969_v5, %v405_v32  ;;  %2956 = vpow2.f32 %v2415_v28 }
 0x123   : > { %v2419_v37 = vmul.f32 -1.442695, %v466_v33 }
 0x124   : > { %v2418_v40 = vmul.f32 -1.442695, %v465_v36  ;;  %v411_v41 = vpop.xlane.xlu1 %410 }
 0x125   : > { %v409_v44 = vpop.xlane.xlu0 %408  ;;  %2958 = vpow2.f32 %v2419_v37  ;;  %v468_v45 = vadd.f32 %v3969_v5, %v411_v41 }
 0x126   : > { %v467_v48 = vadd.f32 %v3969_v5, %v409_v44  ;;  %2960 = vpow2.f32 %v2418_v40 }
 0x127   : > { %v2951_v49 = vpop.eup %2950  ;;  %v2421_v52 = vmul.f32 -1.442695, %v468_v45 }
 0x128   : > { %v2953_v53 = vpop.eup %2952  ;;  %v591_v56 = vadd.f32 1.0, %v2951_v49  ;;  %v2420_v57 = vmul.f32 -1.442695, %v467_v48  ;;  %v415_v60 = vpop.xlane.xlu1 %414 }
 0x129   : > { %v413_v61 = vpop.xlane.xlu0 %412  ;;  %v589_v0 = vadd.f32 1.0, %v2953_v53  ;;  %2962 = vpow2.f32 %v2421_v52  ;;  %v470_v4 = vadd.f32 %v3969_v5, %v415_v60 }
 0x12a   : > { %v469_v8 = vadd.f32 %v3969_v5, %v413_v61  ;;  %2964 = vrcp.f32 %v591_v56 }
 0x12b   : > { %v2955_v9 = vpop.eup %2954  ;;  %2966 = vrcp.f32 %v589_v0  ;;  %v2423_v12 = vmul.f32 -1.442695, %v470_v4 }
 0x12c   : > { %v2957_v13 = vpop.eup %2956  ;;  %v592_v16 = vadd.f32 1.0, %v2955_v9  ;;  %2968 = vpow2.f32 %v2420_v57  ;;  %v2422_v17 = vmul.f32 -1.442695, %v469_v8  ;;  %v419_v20 = vpop.xlane.xlu1 %418 }
 0x12d   : > { %v417_v21 = vpop.xlane.xlu0 %416  ;;  %v590_v24 = vadd.f32 1.0, %v2957_v13  ;;  %2970 = vpow2.f32 %v2423_v12  ;;  %v472_v25 = vadd.f32 %v3969_v5, %v419_v20 }
 0x12e   : > { %v471_v2 = vadd.f32 %v3969_v5, %v417_v21  ;;  %2972 = vrcp.f32 %v592_v16 }
 0x12f   : > { %v2959_v28 = vpop.eup %2958  ;;  %2974 = vrcp.f32 %v590_v24  ;;  %v2425_v29 = vmul.f32 -1.442695, %v472_v25 }
 0x130   : > { %v2961_v32 = vpop.eup %2960  ;;  %v594_v33 = vadd.f32 1.0, %v2959_v28  ;;  %2976 = vpow2.f32 %v2422_v17  ;;  %v2424_v36 = vmul.f32 -1.442695, %v471_v2  ;;  %v423_v37 = vpop.xlane.xlu1 %422 }
 0x131   : > { %v421_v40 = vpop.xlane.xlu0 %420  ;;  %v593_v41 = vadd.f32 1.0, %v2961_v32  ;;  %2978 = vpow2.f32 %v2425_v29  ;;  %v474_v44 = vadd.f32 %v3969_v5, %v423_v37 }
 0x132   : > { %v473_v45 = vadd.f32 %v3969_v5, %v421_v40  ;;  %2980 = vrcp.f32 %v594_v33 }
 0x133   : > { %v2963_v48 = vpop.eup %2962  ;;  %2982 = vrcp.f32 %v593_v41  ;;  %v2427_v49 = vmul.f32 -1.442695, %v474_v44 }
 0x134   : > { %v2426_v52 = vmul.f32 -1.442695, %v473_v45  ;;  %v2965_v53 = vpop.eup %2964  ;;  %v596_v56 = vadd.f32 1.0, %v2963_v48  ;;  %2984 = vpow2.f32 %v2424_v36  ;;  %v427_v57 = vpop.xlane.xlu1 %426 }
 0x135   : > { %v425_v60 = vpop.xlane.xlu0 %424  ;;  %v2967_v61 = vpop.eup %2966  ;;  %v687_v0 = vmul.f32 %v2965_v53, %v3804_v1  ;;  %2986 = vpow2.f32 %v2427_v49  ;;  %v476_v4 = vadd.f32 %v3969_v5, %v427_v57 }
 0x136   : > { %v475_v8 = vadd.f32 %v3969_v5, %v425_v60  ;;  %v2969_v9 = vpop.eup %2968  ;;  %v685_v12 = vmul.f32 %v2967_v61, %v3812_v3  ;;  %2988 = vrcp.f32 %v596_v56 }
 0x137   : > { %v2971_v13 = vpop.eup %2970  ;;  %720 = vst [vmem:[%s3990_s3 + $0x10] sm:$0xff] %v687_v0  ;;  %v595_v16 = vadd.f32 1.0, %v2969_v9  ;;  %2990 = vpow2.f32 %v2426_v52  ;;  %v2429_v17 = vmul.f32 -1.442695, %v476_v4 }
 0x138   : > { %v2973_v1 = vpop.eup %2972  ;;  %718 = vst [vmem:[%s3990_s3] sm:$0xff] %v685_v12  ;;  %v598_v20 = vadd.f32 1.0, %v2971_v13  ;;  %v2428_v21 = vmul.f32 -1.442695, %v475_v8  ;;  %v431_v24 = vpop.xlane.xlu1 %430 }
 0x139   : > { %v429_v25 = vpop.xlane.xlu0 %428  ;;  %v2975_v2 = vpop.eup %2974  ;;  %v688_v3 = vmul.f32 %v2973_v1, %v3819_v6  ;;  %2992 = vrcp.f32 %v595_v16  ;;  %v478_v28 = vadd.f32 %v3969_v5, %v431_v24 }
 0x13a   : > { %v477_v29 = vadd.f32 %v3969_v5, %v429_v25  ;;  %v2977_v32 = vpop.eup %2976  ;;  %v686_v33 = vmul.f32 %v2975_v2, %v3822_v7  ;;  %2994 = vrcp.f32 %v598_v20 }
 0x13b   : > { %v2979_v36 = vpop.eup %2978  ;;  %721 = vst [vmem:[%s3990_s3 + $0x18] sm:$0xff] %v688_v3  ;;  %v597_v37 = vadd.f32 1.0, %v2977_v32  ;;  %2996 = vpow2.f32 %v2429_v17  ;;  %v2431_v40 = vmul.f32 -1.442695, %v478_v28 }
 0x13c   : > { %v2981_v41 = vpop.eup %2980  ;;  %719 = vst [vmem:[%s3990_s3 + $0x8] sm:$0xff] %v686_v33  ;;  %v600_v44 = vadd.f32 1.0, %v2979_v36  ;;  %2998 = vpow2.f32 %v2428_v21  ;;  %v2430_v6 = vmul.f32 -1.442695, %v477_v29  ;;  %v435_v45 = vpop.xlane.xlu1 %434 }
 0x13d   : > { %v433_v48 = vpop.xlane.xlu0 %432  ;;  %v2983_v49 = vpop.eup %2982  ;;  %v690_v52 = vmul.f32 %v2981_v41, %v3829_v10  ;;  %3000 = vrcp.f32 %v597_v37  ;;  %v480_v7 = vadd.f32 %v3969_v5, %v435_v45 }
 0x13e   : > { %v479_v53 = vadd.f32 %v3969_v5, %v433_v48  ;;  %v2985_v56 = vpop.eup %2984  ;;  %v689_v57 = vmul.f32 %v2983_v49, %v3832_v11  ;;  %3002 = vrcp.f32 %v600_v44 }
 0x13f   : > { %v2987_v60 = vpop.eup %2986  ;;  %723 = vst [vmem:[%s3990_s3 + $0x28] sm:$0xff] %v690_v52  ;;  %v599_v61 = vadd.f32 1.0, %v2985_v56  ;;  %3004 = vpow2.f32 %v2431_v40  ;;  %v2433_v0 = vmul.f32 -1.442695, %v480_v7 }
 0x140   : > { %v2989_v4 = vpop.eup %2988  ;;  %722 = vst [vmem:[%s3990_s3 + $0x20] sm:$0xff] %v689_v57  ;;  %v602_v8 = vadd.f32 1.0, %v2987_v60  ;;  %3006 = vpow2.f32 %v2430_v6  ;;  %v2432_v10 = vmul.f32 -1.442695, %v479_v53  ;;  %v439_v9 = vpop.xlane.xlu1 %438 }
 0x141   : > { %v437_v12 = vpop.xlane.xlu0 %436  ;;  %v2991_v13 = vpop.eup %2990  ;;  %v692_v16 = vmul.f32 %v2989_v4, %v3839_v14  ;;  %3008 = vrcp.f32 %v599_v61  ;;  %v482_v11 = vadd.f32 %v3969_v5, %v439_v9 }
 0x142   : > { %v481_v17 = vadd.f32 %v3969_v5, %v437_v12  ;;  %3010 = vrcp.f32 %v602_v8  ;;  %v601_v1 = vadd.f32 1.0, %v2991_v13 }
 0x143   : > { %v2993_v20 = vpop.eup %2992  ;;  %725 = vst [vmem:[%s3990_s3 + $0x38] sm:$0xff] %v692_v16  ;;  %3012 = vpow2.f32 %v2433_v0  ;;  %v2435_v21 = vmul.f32 -1.442695, %v482_v11 }
 0x144   : > { %v2434_v24 = vmul.f32 -1.442695, %v481_v17  ;;  %v2995_v25 = vpop.eup %2994  ;;  %v691_v2 = vmul.f32 %v2993_v20, %v3842_v15  ;;  %3014 = vrcp.f32 %v601_v1  ;;  %v443_v3 = vpop.xlane.xlu1 %442 }
 0x145   : > { %v441_v14 = vpop.xlane.xlu0 %440  ;;  %v2997_v28 = vpop.eup %2996  ;;  %v694_v29 = vmul.f32 %v2995_v25, %v3849_v18  ;;  %3016 = vpow2.f32 %v2432_v10  ;;  %v484_v32 = vadd.f32 %v3969_v5, %v443_v3 }
 0x146   : > { %v483_v33 = vadd.f32 %v3969_v5, %v441_v14  ;;  %v2999_v36 = vpop.eup %2998  ;;  %724 = vst [vmem:[%s3990_s3 + $0x30] sm:$0xff] %v691_v2  ;;  %v604_v37 = vadd.f32 1.0, %v2997_v28  ;;  %3018 = vpow2.f32 %v2435_v21 }
 0x147   : > { %v3001_v40 = vpop.eup %3000  ;;  %727 = vst [vmem:[%s3990_s3 + $0x48] sm:$0xff] %v694_v29  ;;  %v603_v41 = vadd.f32 1.0, %v2999_v36  ;;  %3020 = vpow2.f32 %v2434_v24  ;;  %v2437_v15 = vmul.f32 -1.442695, %v484_v32 }
 0x148   : > { %v2436_v44 = vmul.f32 -1.442695, %v483_v33  ;;  %v3003_v6 = vpop.eup %3002  ;;  %v693_v18 = vmul.f32 %v3001_v40, %v3852_v19  ;;  %3022 = vrcp.f32 %v604_v37  ;;  %v447_v45 = vpop.xlane.xlu1 %446 }
 0x149   : > { %v445_v48 = vpop.xlane.xlu0 %444  ;;  %v3005_v49 = vpop.eup %3004  ;;  %v696_v52 = vmul.f32 %v3003_v6, %v3859_v22  ;;  %3024 = vrcp.f32 %v603_v41  ;;  %v486_v7 = vadd.f32 %v3969_v5, %v447_v45 }
 0x14a   : > { %v485_v53 = vadd.f32 %v3969_v5, %v445_v48  ;;  %v3007_v56 = vpop.eup %3006  ;;  %726 = vst [vmem:[%s3990_s3 + $0x40] sm:$0xff] %v693_v18  ;;  %v606_v57 = vadd.f32 1.0, %v3005_v49  ;;  %3026 = vpow2.f32 %v2437_v15 }
 0x14b   : > { %v3009_v60 = vpop.eup %3008  ;;  %729 = vst [vmem:[%s3990_s3 + $0x58] sm:$0xff] %v696_v52  ;;  %v605_v61 = vadd.f32 1.0, %v3007_v56  ;;  %3028 = vpow2.f32 %v2436_v44  ;;  %v2439_v19 = vmul.f32 -1.442695, %v486_v7 }
 0x14c   : > { %v2438_v0 = vmul.f32 -1.442695, %v485_v53  ;;  %v3011_v4 = vpop.eup %3010  ;;  %v695_v22 = vmul.f32 %v3009_v60, %v3862_v23  ;;  %3030 = vrcp.f32 %v606_v57  ;;  %v451_v8 = vpop.xlane.xlu1 %450 }
 0x14d   : > { %v449_v10 = vpop.xlane.xlu0 %448  ;;  %v3013_v9 = vpop.eup %3012  ;;  %v698_v12 = vmul.f32 %v3011_v4, %v3869_v26  ;;  %3032 = vrcp.f32 %v605_v61  ;;  %v488_v13 = vadd.f32 %v3969_v5, %v451_v8 }
 0x14e   : > { %v487_v16 = vadd.f32 %v3969_v5, %v449_v10  ;;  %v3015_v11 = vpop.eup %3014  ;;  %728 = vst [vmem:[%s3990_s3 + $0x50] sm:$0xff] %v695_v22  ;;  %v608_v17 = vadd.f32 1.0, %v3013_v9  ;;  %3034 = vpow2.f32 %v2439_v19 }
 0x14f   : > { %v3017_v1 = vpop.eup %3016  ;;  %731 = vst [vmem:[%s3990_s3 + $0x68] sm:$0xff] %v698_v12  ;;  %v697_v23 = vmul.f32 %v3015_v11, %v3872_v27  ;;  %3036 = vpow2.f32 %v2438_v0  ;;  %v2441_v20 = vmul.f32 -1.442695, %v488_v13 }
 0x150   : > { %v3019_v21 = vpop.eup %3018  ;;  %3038 = vrcp.f32 %v608_v17  ;;  %v607_v24 = vadd.f32 1.0, %v3017_v1  ;;  %v2440_v26 = vmul.f32 -1.442695, %v487_v16  ;;  %v455_v25 = vpop.xlane.xlu1 %454 }
 0x151   : > { %v453_v2 = vpop.xlane.xlu0 %452  ;;  %v3021_v3 = vpop.eup %3020  ;;  %730 = vst [vmem:[%s3990_s3 + $0x60] sm:$0xff] %v697_v23  ;;  %v610_v14 = vadd.f32 1.0, %v3019_v21  ;;  %3040 = vpow2.f32 %v2441_v20  ;;  %v490_v28 = vadd.f32 %v3969_v5, %v455_v25 }
 0x152   : > { %v489_v29 = vadd.f32 %v3969_v5, %v453_v2  ;;  %v3023_v32 = vpop.eup %3022  ;;  %3042 = vrcp.f32 %v607_v24  ;;  %v609_v27 = vadd.f32 1.0, %v3021_v3 }
 0x153   : > { %v3025_v33 = vpop.eup %3024  ;;  %v700_v36 = vmul.f32 %v3023_v32, %v3879_v30  ;;  %3044 = vrcp.f32 %v610_v14  ;;  %v2443_v37 = vmul.f32 -1.442695, %v490_v28 }
 0x154   : > { %v3027_v40 = vpop.eup %3026  ;;  %v699_v41 = vmul.f32 %v3025_v33, %v3882_v31  ;;  %3046 = vrcp.f32 %v609_v27  ;;  %v2442_v15 = vmul.f32 -1.442695, %v489_v29  ;;  %v459_v44 = vpop.xlane.xlu1 %458 }
 0x155   : > { %v457_v6 = vpop.xlane.xlu0 %456  ;;  %v3029_v18 = vpop.eup %3028  ;;  %733 = vst [vmem:[%s3990_s3 + $0x78] sm:$0xff] %v700_v36  ;;  %v612_v45 = vadd.f32 1.0, %v3027_v40  ;;  %3048 = vpow2.f32 %v2440_v26  ;;  %v492_v48 = vadd.f32 %v3969_v5, %v459_v44 }
 0x156   : > { %v491_v49 = vadd.f32 %v3969_v5, %v457_v6  ;;  %v3031_v30 = vpop.eup %3030  ;;  %732 = vst [vmem:[%s3990_s3 + $0x70] sm:$0xff] %v699_v41  ;;  %v611_v52 = vadd.f32 1.0, %v3029_v18  ;;  %3050 = vpow2.f32 %v2443_v37 }
 0x157   : > { %v3033_v7 = vpop.eup %3032  ;;  %v702_v31 = vmul.f32 %v3031_v30, %v3889_v34  ;;  %3052 = vrcp.f32 %v612_v45  ;;  %v2445_v53 = vmul.f32 -1.442695, %v492_v48 }
 0x158   : > { %v3035_v56 = vpop.eup %3034  ;;  %v701_v57 = vmul.f32 %v3033_v7, %v3892_v35  ;;  %3054 = vrcp.f32 %v611_v52  ;;  %v2444_v5 = vmul.f32 -1.442695, %v491_v49 }
 0x159   : > { %v3037_v60 = vpop.eup %3036  ;;  %735 = vst [vmem:[%s3990_s3 + $0x88] sm:$0xff] %v702_v31  ;;  %v614_v61 = vadd.f32 1.0, %v3035_v56  ;;  %3056 = vpow2.f32 %v2442_v15 }
 0x15a   : > { %v3039_v19 = vpop.eup %3038  ;;  %734 = vst [vmem:[%s3990_s3 + $0x80] sm:$0xff] %v701_v57  ;;  %v613_v0 = vadd.f32 1.0, %v3037_v60  ;;  %3058 = vpow2.f32 %v2445_v53 }
 0x15b   : > { %v3041_v4 = vpop.eup %3040  ;;  %v704_v34 = vmul.f32 %v3039_v19, %v3899_v38  ;;  %3060 = vrcp.f32 %v614_v61 }
 0x15c   : > { %v3043_v22 = vpop.eup %3042  ;;  %3062 = vrcp.f32 %v613_v0  ;;  %v616_v35 = vadd.f32 1.0, %v3041_v4 }
 0x15d   : > { %v3045_v8 = vpop.eup %3044  ;;  %737 = vst [vmem:[%s3990_s3 + $0x98] sm:$0xff] %v704_v34  ;;  %v703_v10 = vmul.f32 %v3043_v22, %v3902_v39  ;;  %3064 = vpow2.f32 %v2444_v5 }
 0x15e   : > { %v3047_v9 = vpop.eup %3046  ;;  %v706_v12 = vmul.f32 %v3045_v8, %v3909_v42  ;;  %3066 = vrcp.f32 %v616_v35 }
 0x15f   : > { %v3049_v13 = vpop.eup %3048  ;;  %736 = vst [vmem:[%s3990_s3 + $0x90] sm:$0xff] %v703_v10  ;;  %v705_v38 = vmul.f32 %v3047_v9, %v3912_v43 }
 0x160   : > { %v3051_v16 = vpop.eup %3050  ;;  %739 = vst [vmem:[%s3990_s3 + $0xa8] sm:$0xff] %v706_v12  ;;  %v615_v11 = vadd.f32 1.0, %v3049_v13 }
 0x161   : > { %v3053_v17 = vpop.eup %3052  ;;  %738 = vst [vmem:[%s3990_s3 + $0xa0] sm:$0xff] %v705_v38  ;;  %v618_v1 = vadd.f32 1.0, %v3051_v16 }
 0x162   : > { %v3055_v23 = vpop.eup %3054  ;;  %v708_v39 = vmul.f32 %v3053_v17, %v3919_v46  ;;  %3068 = vrcp.f32 %v615_v11 }
 0x163   : > { %v3057_v20 = vpop.eup %3056  ;;  %v707_v42 = vmul.f32 %v3055_v23, %v3922_v47  ;;  %3070 = vrcp.f32 %v618_v1 }
 0x164   : > { %v3059_v21 = vpop.eup %3058  ;;  %741 = vst [vmem:[%s3990_s3 + $0xb8] sm:$0xff] %v708_v39  ;;  %v617_v43 = vadd.f32 1.0, %v3057_v20 }
 0x165   : > { %v3061_v24 = vpop.eup %3060  ;;  %740 = vst [vmem:[%s3990_s3 + $0xb0] sm:$0xff] %v707_v42  ;;  %v620_v26 = vadd.f32 1.0, %v3059_v21 }
 0x166   : > { %v3063_v25 = vpop.eup %3062  ;;  %v710_v2 = vmul.f32 %v3061_v24, %v3929_v50  ;;  %3072 = vrcp.f32 %v617_v43 }
 0x167   : > { %v3065_v46 = vpop.eup %3064  ;;  %v709_v3 = vmul.f32 %v3063_v25, %v3932_v51  ;;  %3074 = vrcp.f32 %v620_v26 }
 0x168   : > { %v3067_v47 = vpop.eup %3066  ;;  %743 = vst [vmem:[%s3990_s3 + $0xc8] sm:$0xff] %v710_v2  ;;  %v619_v14 = vadd.f32 1.0, %v3065_v46 }
 0x169   : > { %742 = vst [vmem:[%s3990_s3 + $0xc0] sm:$0xff] %v709_v3  ;;  %v712_v28 = vmul.f32 %v3067_v47, %v3939_v54 }
 0x16a   : > { %3076 = vrcp.f32 %v619_v14 }
 0x16b   : > { %745 = vst [vmem:[%s3990_s3 + $0xd8] sm:$0xff] %v712_v28 }
 0x16c   : > { %v3069_v29 = vpop.eup %3068 }
 0x16d   : > { %v3071_v50 = vpop.eup %3070  ;;  %v711_v32 = vmul.f32 %v3069_v29, %v3942_v55 }
 0x16e   : > { %v714_v27 = vmul.f32 %v3071_v50, %v3949_v58 }
 0x16f   : > { %744 = vst [vmem:[%s3990_s3 + $0xd0] sm:$0xff] %v711_v32 }
 0x170   : > { %v3073_v51 = vpop.eup %3072  ;;  %747 = vst [vmem:[%s3990_s3 + $0xe8] sm:$0xff] %v714_v27 }
 0x171   : > { %v3075_v33 = vpop.eup %3074  ;;  %v713_v36 = vmul.f32 %v3073_v51, %v3952_v59 }
 0x172   : > { %v716_v37 = vmul.f32 %v3075_v33, %v3959_v62 }
 0x173   : > { %746 = vst [vmem:[%s3990_s3 + $0xe0] sm:$0xff] %v713_v36 }
 0x174   : > { %v3077_v40 = vpop.eup %3076  ;;  %749 = vst [vmem:[%s3990_s3 + $0xf8] sm:$0xff] %v716_v37 }
 0x175   : > { %v715_v54 = vmul.f32 %v3077_v40, %v3962_v63 }
 0x177   : > { %748 = vst [vmem:[%s3990_s3 + $0xf0] sm:$0xff] %v715_v54 }
 0x178 PF: > { %p2446_p1 = scmp.ne.s32.totalorder %s3486_s24, 0 }
 0x179   : > { %v833_v55 = vld [vmem:[%s3788_s16 + $0x80] sm:$0xff] (!%p2446_p1)  ;;  %v834_v58 = vld [vmem:[%s3788_s16 + $0x88] sm:$0xff] (!%p2446_p1)  ;;  %v835_v41 = vld [vmem:[%s3788_s16 + $0x90] sm:$0xff] (!%p2446_p1) }
 0x17a   : > { %752 = sbr.rel (%p2446_p1) target bundleno = 688 (0x2b0), region = 56  ;;  %v817_v59 = vld [vmem:[%s3788_s16] sm:$0xff] (!%p2446_p1)  ;;  %v857_v62 = vpack.c.bf16 (!%p2446_p1), %v834_v58, %v833_v55  ;;  %v818_v63 = vld [vmem:[%s3788_s16 + $0x8] sm:$0xff] (!%p2446_p1)  ;;  %v836_v15 = vld [vmem:[%s3788_s16 + $0x98] sm:$0xff] (!%p2446_p1) }
 0x17b   : > { %v849_v44 = vpack.c.bf16 (!%p2446_p1), %v818_v63, %v817_v59  ;;  %v858_v6 = vpack.c.bf16 (!%p2446_p1), %v836_v15, %v835_v41  ;;  %v819_v18 = vld [vmem:[%s3788_s16 + $0x10] sm:$0xff] (!%p2446_p1)  ;;  %v820_v45 = vld [vmem:[%s3788_s16 + $0x18] sm:$0xff] (!%p2446_p1)  ;;  %v837_v48 = vld [vmem:[%s3788_s16 + $0xa0] sm:$0xff] (!%p2446_p1) }
 0x17c   : > { %2565 = vmatprep.subr.bf16.mxu0 (!%p2446_p1), %v857_v62  ;;  %2789 = vmatprep.subr.bf16.mxu1 (!%p2446_p1), %v857_v62  ;;  %v838_v49 = vld [vmem:[%s3788_s16 + $0xa8] sm:$0xff] (!%p2446_p1)  ;;  %v850_v30 = vpack.c.bf16 (!%p2446_p1), %v820_v45, %v819_v18  ;;  %v821_v7 = vld [vmem:[%s3788_s16 + $0x20] sm:$0xff] (!%p2446_p1)  ;;  %v839_v53 = vld [vmem:[%s3788_s16 + $0xb0] sm:$0xff] (!%p2446_p1) }
 0x17d   : > { %2566 = vmatpush3.bf16.msra.mxu0 (!%p2446_p1), %v849_v44  ;;  %2797 = vmatpush3.bf16.msra.mxu1 (!%p2446_p1), %v849_v44  ;;  %v859_v52 = vpack.c.bf16 (!%p2446_p1), %v838_v49, %v837_v48  ;;  %v822_v31 = vld [vmem:[%s3788_s16 + $0x28] sm:$0xff] (!%p2446_p1)  ;;  %v840_v56 = vld [vmem:[%s3788_s16 + $0xb8] sm:$0xff] (!%p2446_p1)  ;;  %v823_v61 = vld [vmem:[%s3788_s16 + $0x30] sm:$0xff] (!%p2446_p1) }
 0x17e   : > { %2567 = vmatprep.subr.bf16.mxu0 (!%p2446_p1), %v858_v6  ;;  %2790 = vmatprep.subr.bf16.mxu1 (!%p2446_p1), %v858_v6  ;;  %v851_v57 = vpack.c.bf16 (!%p2446_p1), %v822_v31, %v821_v7  ;;  %v860_v60 = vpack.c.bf16 (!%p2446_p1), %v840_v56, %v839_v53  ;;  %v824_v5 = vld [vmem:[%s3788_s16 + $0x38] sm:$0xff] (!%p2446_p1)  ;;  %v841_v19 = vld [vmem:[%s3788_s16 + $0xc0] sm:$0xff] (!%p2446_p1)  ;;  %v842_v0 = vld [vmem:[%s3788_s16 + $0xc8] sm:$0xff] (!%p2446_p1) }
 0x17f   : > { %v825_v4 = vld [vmem:[%s3788_s16 + $0x40] sm:$0xff] (!%p2446_p1)  ;;  %v826_v34 = vld [vmem:[%s3788_s16 + $0x48] sm:$0xff] (!%p2446_p1)  ;;  %v852_v35 = vpack.c.bf16 (!%p2446_p1), %v824_v5, %v823_v61  ;;  %v843_v8 = vld [vmem:[%s3788_s16 + $0xd0] sm:$0xff] (!%p2446_p1)  ;;  %v861_v10 = vpack.c.bf16 (!%p2446_p1), %v842_v0, %v841_v19 }
 0x180   : > { %v3080_v22 = vld [vmem:[%s3781_s14 + $0x4] ss:$8 sps:$4 sm:$0xff] (!%p2446_p1)   ;;  %v844_v12 = vld [vmem:[%s3788_s16 + $0xd8] sm:$0xff] (!%p2446_p1)  ;;  %v853_v13 = vpack.c.bf16 (!%p2446_p1), %v826_v34, %v825_v4  ;;  %v827_v38 = vld [vmem:[%s3788_s16 + $0x50] sm:$0xff] (!%p2446_p1) }
 0x181   : > { %2568 = vmatpush3.bf16.msra.mxu0 %v850_v30  ;;  %2798 = vmatpush3.bf16.msra.mxu1 %v850_v30  ;;  %v3083_v9 = vld [vmem:[%s3781_s14 + $0x84] ss:$8 sps:$4 sm:$0xff]   ;;  %v862_v16 = vpack.c.bf16 %v844_v12, %v843_v8  ;;  %v828_v11 = vld [vmem:[%s3788_s16 + $0x58] sm:$0xff]  ;;  %v847_v21 = vld [vmem:[%s3788_s16 + $0xf0] sm:$0xff] }
 0x182   : > { %2569 = vmatprep.subr.bf16.mxu0 %v859_v52  ;;  %2791 = vmatprep.subr.bf16.mxu1 %v859_v52  ;;  %v845_v17 = vld [vmem:[%s3788_s16 + $0xe0] sm:$0xff]  ;;  %v846_v1 = vld [vmem:[%s3788_s16 + $0xe8] sm:$0xff]  ;;  %v854_v23 = vpack.c.bf16 %v828_v11, %v827_v38  ;;  %v848_v43 = vld [vmem:[%s3788_s16 + $0xf8] sm:$0xff] }
 0x183   : > { %1057 = vmatprep.mubr.bf16.mxu0 %v3080_v22  ;;  %1121 = vmatprep.mubr.bf16.mxu1 %v3083_v9  ;;  %v829_v39 = vld [vmem:[%s3788_s16 + $0x60] sm:$0xff]  ;;  %v830_v20 = vld [vmem:[%s3788_s16 + $0x68] sm:$0xff]  ;;  %v863_v42 = vpack.c.bf16 %v846_v1, %v845_v17  ;;  %v831_v26 = vld [vmem:[%s3788_s16 + $0x70] sm:$0xff]  ;;  %v864_v25 = vpack.c.bf16 %v848_v43, %v847_v21 }
 0x184   : > { %v855_v24 = vpack.c.bf16 %v830_v20, %v829_v39  ;;  %v832_v2 = vld [vmem:[%s3788_s16 + $0x78] sm:$0xff]  ;;  %v3078_v3 = vld [vmem:[%s3781_s14] ss:$8 sps:$4 sm:$0xff]   ;;  %v3090_v32 = vld [vmem:[%s3781_s14 + $0x24] ss:$8 sps:$4 sm:$0xff]  }
 0x185   : > { %2570 = vmatpush3.bf16.msra.mxu0 %v851_v57  ;;  %2799 = vmatpush3.bf16.msra.mxu1 %v851_v57  ;;  %v856_v46 = vpack.c.bf16 %v832_v2, %v831_v26  ;;  %v3081_v47 = vld [vmem:[%s3781_s14 + $0x80] ss:$8 sps:$4 sm:$0xff]   ;;  %v3084_v14 = vld [vmem:[%s3781_s14 + $0x14] ss:$8 sps:$4 sm:$0xff]   ;;  %v3088_v29 = vld [vmem:[%s3781_s14 + $0x10] ss:$8 sps:$4 sm:$0xff]  }
 0x186   : > { %2571 = vmatprep.subr.bf16.mxu0 %v860_v60  ;;  %2792 = vmatprep.subr.bf16.mxu1 %v860_v60  ;;  %v3086_v28 = vld [vmem:[%s3781_s14 + $0x94] ss:$8 sps:$4 sm:$0xff]   ;;  %v3089_v50 = vld [vmem:[%s3781_s14 + $0x90] ss:$8 sps:$4 sm:$0xff]   ;;  %v3092_v27 = vld [vmem:[%s3781_s14 + $0xa4] ss:$8 sps:$4 sm:$0xff]  }
 0x187   : > { %v3094_v51 = vld [vmem:[%s3781_s14 + $0x20] ss:$8 sps:$4 sm:$0xff]   ;;  %v3096_v36 = vld [vmem:[%s3781_s14 + $0x34] ss:$8 sps:$4 sm:$0xff]   ;;  %v3100_v40 = vld [vmem:[%s3781_s14 + $0x30] ss:$8 sps:$4 sm:$0xff]  }
 0x188   : > { %v3095_v33 = vld [vmem:[%s3781_s14 + $0xa0] ss:$8 sps:$4 sm:$0xff]   ;;  %v3098_v37 = vld [vmem:[%s3781_s14 + $0xb4] ss:$8 sps:$4 sm:$0xff]   ;;  %v3101_v54 = vld [vmem:[%s3781_s14 + $0xb0] ss:$8 sps:$4 sm:$0xff]  }
 0x189   : > { %2572 = vmatpush3.bf16.msra.mxu0 %v852_v35  ;;  %2800 = vmatpush3.bf16.msra.mxu1 %v852_v35  ;;  %v3102_v55 = vld [vmem:[%s3781_s14 + $0x44] ss:$8 sps:$4 sm:$0xff]   ;;  %v3106_v59 = vld [vmem:[%s3781_s14 + $0x40] ss:$8 sps:$4 sm:$0xff]   ;;  %v3108_v63 = vld [vmem:[%s3781_s14 + $0x54] ss:$8 sps:$4 sm:$0xff]  }
 0x18a   : > { %2573 = vmatprep.subr.bf16.mxu0 %v861_v10  ;;  %2793 = vmatprep.subr.bf16.mxu1 %v861_v10  ;;  %v3104_v58 = vld [vmem:[%s3781_s14 + $0xc4] ss:$8 sps:$4 sm:$0xff]   ;;  %v3107_v62 = vld [vmem:[%s3781_s14 + $0xc0] ss:$8 sps:$4 sm:$0xff]   ;;  %v3110_v41 = vld [vmem:[%s3781_s14 + $0xd4] ss:$8 sps:$4 sm:$0xff]  }
 0x18b   : > { %v3112_v15 = vld [vmem:[%s3781_s14 + $0x50] ss:$8 sps:$4 sm:$0xff]   ;;  %v3114_v6 = vld [vmem:[%s3781_s14 + $0x64] ss:$8 sps:$4 sm:$0xff]   ;;  %v3118_v45 = vld [vmem:[%s3781_s14 + $0x60] ss:$8 sps:$4 sm:$0xff]  }
 0x18c   : > { %v3113_v44 = vld [vmem:[%s3781_s14 + $0xd0] ss:$8 sps:$4 sm:$0xff]   ;;  %v3116_v18 = vld [vmem:[%s3781_s14 + $0xe4] ss:$8 sps:$4 sm:$0xff]   ;;  %v3119_v48 = vld [vmem:[%s3781_s14 + $0xe0] ss:$8 sps:$4 sm:$0xff]  }
 0x18d   : > { %2574 = vmatpush3.bf16.msra.mxu0 %v853_v13  ;;  %2801 = vmatpush3.bf16.msra.mxu1 %v853_v13  ;;  %v3120_v49 = vld [vmem:[%s3781_s14 + $0x74] ss:$8 sps:$4 sm:$0xff]   ;;  %v3124_v52 = vld [vmem:[%s3781_s14 + $0x70] ss:$8 sps:$4 sm:$0xff]   ;;  %v753_v56 = vld [vmem:[#allocation3] sm:$0xff] }
 0x18e   : > { %2575 = vmatprep.subr.bf16.mxu0 %v862_v16  ;;  %2794 = vmatprep.subr.bf16.mxu1 %v862_v16  ;;  %v3122_v30 = vld [vmem:[%s3781_s14 + $0xf4] ss:$8 sps:$4 sm:$0xff]   ;;  %v3125_v7 = vld [vmem:[%s3781_s14 + $0xf0] ss:$8 sps:$4 sm:$0xff]   ;;  %v769_v60 = vld [vmem:[#allocation3 + $0x80] sm:$0xff] }
 0x18f   : > { %v754_v34 = vld [vmem:[#allocation3 + $0x8] sm:$0xff]  ;;  %v755_v1 = vld [vmem:[#allocation3 + $0x10] sm:$0xff]  ;;  %v756_v26 = vld [vmem:[#allocation3 + $0x18] sm:$0xff] }
 0x190   : > { %v770_v35 = vld [vmem:[#allocation3 + $0x88] sm:$0xff]  ;;  %v771_v39 = vld [vmem:[#allocation3 + $0x90] sm:$0xff]  ;;  %v772_v2 = vld [vmem:[#allocation3 + $0x98] sm:$0xff] }
 0x191   : > { %2576 = vmatpush3.bf16.msra.mxu0 %v854_v23  ;;  %2802 = vmatpush3.bf16.msra.mxu1 %v854_v23 }
 0x192   : > { %2577 = vmatprep.subr.bf16.mxu0 %v863_v42  ;;  %2795 = vmatprep.subr.bf16.mxu1 %v863_v42 }
 0x195   : > { %2578 = vmatpush3.bf16.msra.mxu0 %v855_v24  ;;  %2803 = vmatpush3.bf16.msra.mxu1 %v855_v24 }
 0x196   : > { %2579 = vmatprep.subr.bf16.mxu0 %v864_v25  ;;  %2796 = vmatprep.subr.bf16.mxu1 %v864_v25 }
 0x199   : > { %2580 = vmatpush3.bf16.msra.mxu0 %v856_v46  ;;  %2804 = vmatpush3.bf16.msra.mxu1 %v856_v46 }
 0x19c   : > { %1058 = vmatmul.mubr.bf16.vlgmr.msra.gmra.mrb[0].mxu0 %v3078_v3  ;;  %1122 = vmatmul.mubr.bf16.vlgmr.msra.gmra.mrb[0].mxu1 %v3081_v47 }
 0x19d   : > { %1065 = vmatprep.mubr.bf16.mxu0 %v3084_v14  ;;  %1129 = vmatprep.mubr.bf16.mxu1 %v3086_v28 }
 0x1a4   : > { %1066 = vmatmul.mubr.bf16.gmra.mrb[4].mxu0 %v3088_v29  ;;  %1130 = vmatmul.mubr.bf16.gmra.mrb[4].mxu1 %v3089_v50 }
 0x1a5   : > { %1073 = vmatprep.mubr.bf16.mxu0 %v3090_v32  ;;  %1137 = vmatprep.mubr.bf16.mxu1 %v3092_v27 }
 0x1ac   : > { %1074 = vmatmul.mubr.bf16.gmra.mrb[8].mxu0 %v3094_v51  ;;  %1138 = vmatmul.mubr.bf16.gmra.mrb[8].mxu1 %v3095_v33  ;;  %v757_v51 = vld [vmem:[#allocation3 + $0x20] sm:$0xff] }
 0x1ad   : > { %1081 = vmatprep.mubr.bf16.mxu0 %v3096_v36  ;;  %1145 = vmatprep.mubr.bf16.mxu1 %v3098_v37  ;;  %v773_v36 = vld [vmem:[#allocation3 + $0xa0] sm:$0xff] }
 0x1b4   : > { %1082 = vmatmul.mubr.bf16.gmra.mrb[12].mxu0 %v3100_v40  ;;  %1146 = vmatmul.mubr.bf16.gmra.mrb[12].mxu1 %v3101_v54 }
 0x1b5   : > { %1089 = vmatprep.mubr.bf16.mxu0 %v3102_v55  ;;  %1153 = vmatprep.mubr.bf16.mxu1 %v3104_v58 }
 0x1bc   : > { %1090 = vmatmul.mubr.bf16.gmra.mrb[16].mxu0 %v3106_v59  ;;  %1154 = vmatmul.mubr.bf16.gmra.mrb[16].mxu1 %v3107_v62  ;;  %v758_v59 = vld [vmem:[#allocation3 + $0x28] sm:$0xff] }
 0x1bd   : > { %1097 = vmatprep.mubr.bf16.mxu0 %v3108_v63  ;;  %1161 = vmatprep.mubr.bf16.mxu1 %v3110_v41  ;;  %v774_v63 = vld [vmem:[#allocation3 + $0xa8] sm:$0xff] }
 0x1c4   : > { %1098 = vmatmul.mubr.bf16.gmra.mrb[20].mxu0 %v3112_v15  ;;  %1162 = vmatmul.mubr.bf16.gmra.mrb[20].mxu1 %v3113_v44 }
 0x1c5   : > { %1105 = vmatprep.mubr.bf16.mxu0 %v3114_v6  ;;  %1169 = vmatprep.mubr.bf16.mxu1 %v3116_v18 }
 0x1cc   : > { %1106 = vmatmul.mubr.bf16.gmra.mrb[24].mxu0 %v3118_v45  ;;  %1170 = vmatmul.mubr.bf16.gmra.mrb[24].mxu1 %v3119_v48 }
 0x1cd   : > { %1113 = vmatprep.mubr.bf16.mxu0 %v3120_v49  ;;  %1177 = vmatprep.mubr.bf16.mxu1 %v3122_v30 }
 0x1d4   : > { %1114 = vmatmul.mubr.bf16.gmra.mrb[28].mxu0 %v3124_v52  ;;  %1178 = vmatmul.mubr.bf16.gmra.mrb[28].mxu1 %v3125_v7  ;;  %v759_v52 = vld [vmem:[#allocation3 + $0x30] sm:$0xff] }
 0x26f   : > { %v2581_v31 = vpop.f32.mrb[0].mxu0  ;;  %v2629_v53 = vpop.f32.mrb[0].mxu1 }
 0x270   : > { %v2582_v57 = vpop.f32.mrb[1].mxu0  ;;  %v2630_v61 = vpop.f32.mrb[1].mxu1 }
 0x271   : > { %v2583_v5 = vadd.f32 %v2582_v57, %v2581_v31  ;;  %v2631_v19 = vadd.f32 %v2630_v61, %v2629_v53  ;;  %v2584_v0 = vpop.f32.mrb[2].mxu0  ;;  %v2632_v4 = vpop.f32.mrb[2].mxu1  ;;  %v775_v31 = vld [vmem:[#allocation3 + $0xb0] sm:$0xff] }
 0x272   : > { %v2585_v22 = vpop.f32.mrb[3].mxu0  ;;  %v2633_v8 = vpop.f32.mrb[3].mxu1 }
 0x273   : > { %v1186_v10 = vadd.f32 %v2583_v5, %v753_v56  ;;  %v1202_v9 = vadd.f32 %v2631_v19, %v769_v60  ;;  %v2586_v12 = vadd.f32 %v2585_v22, %v2584_v0  ;;  %v2634_v13 = vadd.f32 %v2633_v8, %v2632_v4  ;;  %v760_v5 = vld [vmem:[#allocation3 + $0x38] sm:$0xff] }
 0x274   : > { %v776_v0 = vld [vmem:[#allocation3 + $0xb8] sm:$0xff] }
 0x275   : > { %1218 = vst [vmem:[#allocation3] sm:$0xff] %v1186_v10  ;;  %1234 = vst [vmem:[#allocation3 + $0x80] sm:$0xff] %v1202_v9  ;;  %v1187_v38 = vadd.f32 %v2586_v12, %v754_v34  ;;  %v1203_v16 = vadd.f32 %v2634_v13, %v770_v35 }
 0x277   : > { %1219 = vst [vmem:[#allocation3 + $0x8] sm:$0xff] %v1187_v38  ;;  %1235 = vst [vmem:[#allocation3 + $0x88] sm:$0xff] %v1203_v16  ;;  %v2587_v11 = vpop.f32.mrb[4].mxu0  ;;  %v2635_v17 = vpop.f32.mrb[4].mxu1  ;;  %v761_v38 = vld [vmem:[#allocation3 + $0x40] sm:$0xff] }
 0x278   : > { %v2588_v23 = vpop.f32.mrb[5].mxu0  ;;  %v2636_v20 = vpop.f32.mrb[5].mxu1 }
 0x279   : > { %v2589_v42 = vadd.f32 %v2588_v23, %v2587_v11  ;;  %v2637_v21 = vadd.f32 %v2636_v20, %v2635_v17  ;;  %v2590_v43 = vpop.f32.mrb[6].mxu0  ;;  %v2638_v24 = vpop.f32.mrb[6].mxu1  ;;  %v777_v11 = vld [vmem:[#allocation3 + $0xc0] sm:$0xff] }
 0x27a   : > { %v2591_v25 = vpop.f32.mrb[7].mxu0  ;;  %v2639_v46 = vpop.f32.mrb[7].mxu1 }
 0x27b   : > { %v1188_v3 = vadd.f32 %v2589_v42, %v755_v1  ;;  %v1204_v47 = vadd.f32 %v2637_v21, %v771_v39  ;;  %v2592_v14 = vadd.f32 %v2591_v25, %v2590_v43  ;;  %v2640_v28 = vadd.f32 %v2639_v46, %v2638_v24  ;;  %v762_v42 = vld [vmem:[#allocation3 + $0x48] sm:$0xff] }
 0x27c   : > { %v778_v43 = vld [vmem:[#allocation3 + $0xc8] sm:$0xff] }
 0x27d   : > { %1220 = vst [vmem:[#allocation3 + $0x10] sm:$0xff] %v1188_v3  ;;  %1236 = vst [vmem:[#allocation3 + $0x90] sm:$0xff] %v1204_v47  ;;  %v1189_v29 = vadd.f32 %v2592_v14, %v756_v26  ;;  %v1205_v50 = vadd.f32 %v2640_v28, %v772_v2 }
 0x27f   : > { %1221 = vst [vmem:[#allocation3 + $0x18] sm:$0xff] %v1189_v29  ;;  %1237 = vst [vmem:[#allocation3 + $0x98] sm:$0xff] %v1205_v50  ;;  %v2593_v32 = vpop.f32.mrb[8].mxu0  ;;  %v2641_v27 = vpop.f32.mrb[8].mxu1  ;;  %v763_v29 = vld [vmem:[#allocation3 + $0x50] sm:$0xff] }
 0x280   : > { %v2594_v33 = vpop.f32.mrb[9].mxu0  ;;  %v2642_v37 = vpop.f32.mrb[9].mxu1 }
 0x281   : > { %v2595_v40 = vadd.f32 %v2594_v33, %v2593_v32  ;;  %v2643_v54 = vadd.f32 %v2642_v37, %v2641_v27  ;;  %v2596_v55 = vpop.f32.mrb[10].mxu0  ;;  %v2644_v58 = vpop.f32.mrb[10].mxu1  ;;  %v779_v32 = vld [vmem:[#allocation3 + $0xd0] sm:$0xff] }
 0x282   : > { %v2597_v62 = vpop.f32.mrb[11].mxu0  ;;  %v2645_v41 = vpop.f32.mrb[11].mxu1 }
 0x283   : > { %v1190_v15 = vadd.f32 %v2595_v40, %v757_v51  ;;  %v1206_v44 = vadd.f32 %v2643_v54, %v773_v36  ;;  %v2598_v6 = vadd.f32 %v2597_v62, %v2596_v55  ;;  %v2646_v18 = vadd.f32 %v2645_v41, %v2644_v58  ;;  %v764_v40 = vld [vmem:[#allocation3 + $0x58] sm:$0xff] }
 0x284   : > { %v780_v55 = vld [vmem:[#allocation3 + $0xd8] sm:$0xff] }
 0x285   : > { %1222 = vst [vmem:[#allocation3 + $0x20] sm:$0xff] %v1190_v15  ;;  %1238 = vst [vmem:[#allocation3 + $0xa0] sm:$0xff] %v1206_v44  ;;  %v1191_v45 = vadd.f32 %v2598_v6, %v758_v59  ;;  %v1207_v48 = vadd.f32 %v2646_v18, %v774_v63 }
 0x287   : > { %1223 = vst [vmem:[#allocation3 + $0x28] sm:$0xff] %v1191_v45  ;;  %1239 = vst [vmem:[#allocation3 + $0xa8] sm:$0xff] %v1207_v48  ;;  %v2599_v49 = vpop.f32.mrb[12].mxu0  ;;  %v2647_v30 = vpop.f32.mrb[12].mxu1  ;;  %v765_v45 = vld [vmem:[#allocation3 + $0x60] sm:$0xff] }
 0x288   : > { %v2600_v7 = vpop.f32.mrb[13].mxu0  ;;  %v2648_v53 = vpop.f32.mrb[13].mxu1 }
 0x289   : > { %v2601_v56 = vadd.f32 %v2600_v7, %v2599_v49  ;;  %v2649_v57 = vadd.f32 %v2648_v53, %v2647_v30  ;;  %v2602_v60 = vpop.f32.mrb[14].mxu0  ;;  %v2650_v61 = vpop.f32.mrb[14].mxu1  ;;  %v781_v49 = vld [vmem:[#allocation3 + $0xe0] sm:$0xff] }
 0x28a   : > { %v2603_v19 = vpop.f32.mrb[15].mxu0  ;;  %v2651_v4 = vpop.f32.mrb[15].mxu1 }
 0x28b   : > { %v1192_v34 = vadd.f32 %v2601_v56, %v759_v52  ;;  %v1208_v22 = vadd.f32 %v2649_v57, %v775_v31  ;;  %v2604_v35 = vadd.f32 %v2603_v19, %v2602_v60  ;;  %v2652_v8 = vadd.f32 %v2651_v4, %v2650_v61  ;;  %v766_v56 = vld [vmem:[#allocation3 + $0x68] sm:$0xff] }
 0x28c   : > { %v782_v60 = vld [vmem:[#allocation3 + $0xe8] sm:$0xff] }
 0x28d   : > { %1224 = vst [vmem:[#allocation3 + $0x30] sm:$0xff] %v1192_v34  ;;  %1240 = vst [vmem:[#allocation3 + $0xb0] sm:$0xff] %v1208_v22  ;;  %v1193_v10 = vadd.f32 %v2604_v35, %v760_v5  ;;  %v1209_v9 = vadd.f32 %v2652_v8, %v776_v0 }
 0x28f   : > { %1225 = vst [vmem:[#allocation3 + $0x38] sm:$0xff] %v1193_v10  ;;  %1241 = vst [vmem:[#allocation3 + $0xb8] sm:$0xff] %v1209_v9  ;;  %v2605_v12 = vpop.f32.mrb[16].mxu0  ;;  %v2653_v13 = vpop.f32.mrb[16].mxu1  ;;  %v767_v10 = vld [vmem:[#allocation3 + $0x70] sm:$0xff] }
 0x290   : > { %v2606_v16 = vpop.f32.mrb[17].mxu0  ;;  %v2654_v17 = vpop.f32.mrb[17].mxu1 }
 0x291   : > { %v2607_v1 = vadd.f32 %v2606_v16, %v2605_v12  ;;  %v2655_v23 = vadd.f32 %v2654_v17, %v2653_v13  ;;  %v2608_v39 = vpop.f32.mrb[18].mxu0  ;;  %v2656_v20 = vpop.f32.mrb[18].mxu1  ;;  %v783_v12 = vld [vmem:[#allocation3 + $0xf0] sm:$0xff] }
 0x292   : > { %v2609_v21 = vpop.f32.mrb[19].mxu0  ;;  %v2657_v24 = vpop.f32.mrb[19].mxu1 }
 0x293   : > { %v1194_v26 = vadd.f32 %v2607_v1, %v761_v38  ;;  %v1210_v25 = vadd.f32 %v2655_v23, %v777_v11  ;;  %v2610_v2 = vadd.f32 %v2609_v21, %v2608_v39  ;;  %v2658_v46 = vadd.f32 %v2657_v24, %v2656_v20  ;;  %v768_v1 = vld [vmem:[#allocation3 + $0x78] sm:$0xff] }
 0x294   : > { %v784_v39 = vld [vmem:[#allocation3 + $0xf8] sm:$0xff] }
 0x295   : > { %1226 = vst [vmem:[#allocation3 + $0x40] sm:$0xff] %v1194_v26  ;;  %1242 = vst [vmem:[#allocation3 + $0xc0] sm:$0xff] %v1210_v25  ;;  %v1195_v3 = vadd.f32 %v2610_v2, %v762_v42  ;;  %v1211_v47 = vadd.f32 %v2658_v46, %v778_v43 }
 0x297   : > { %1227 = vst [vmem:[#allocation3 + $0x48] sm:$0xff] %v1195_v3  ;;  %1243 = vst [vmem:[#allocation3 + $0xc8] sm:$0xff] %v1211_v47  ;;  %v2611_v14 = vpop.f32.mrb[20].mxu0  ;;  %v2659_v28 = vpop.f32.mrb[20].mxu1 }
 0x298   : > { %v2612_v50 = vpop.f32.mrb[21].mxu0  ;;  %v2660_v27 = vpop.f32.mrb[21].mxu1 }
 0x299   : > { %v2613_v51 = vadd.f32 %v2612_v50, %v2611_v14  ;;  %v2661_v33 = vadd.f32 %v2660_v27, %v2659_v28  ;;  %v2614_v36 = vpop.f32.mrb[22].mxu0  ;;  %v2662_v37 = vpop.f32.mrb[22].mxu1 }
 0x29a   : > { %v2615_v54 = vpop.f32.mrb[23].mxu0  ;;  %v2663_v58 = vpop.f32.mrb[23].mxu1 }
 0x29b   : > { %v1196_v59 = vadd.f32 %v2613_v51, %v763_v29  ;;  %v1212_v62 = vadd.f32 %v2661_v33, %v779_v32  ;;  %v2616_v63 = vadd.f32 %v2615_v54, %v2614_v36  ;;  %v2664_v41 = vadd.f32 %v2663_v58, %v2662_v37 }
 0x29d   : > { %1228 = vst [vmem:[#allocation3 + $0x50] sm:$0xff] %v1196_v59  ;;  %1244 = vst [vmem:[#allocation3 + $0xd0] sm:$0xff] %v1212_v62  ;;  %v1197_v15 = vadd.f32 %v2616_v63, %v764_v40  ;;  %v1213_v44 = vadd.f32 %v2664_v41, %v780_v55 }
 0x29f   : > { %1229 = vst [vmem:[#allocation3 + $0x58] sm:$0xff] %v1197_v15  ;;  %1245 = vst [vmem:[#allocation3 + $0xd8] sm:$0xff] %v1213_v44  ;;  %v2617_v6 = vpop.f32.mrb[24].mxu0  ;;  %v2665_v18 = vpop.f32.mrb[24].mxu1 }
 0x2a0   : > { %v2618_v48 = vpop.f32.mrb[25].mxu0  ;;  %v2666_v30 = vpop.f32.mrb[25].mxu1 }
 0x2a1   : > { %v2619_v52 = vadd.f32 %v2618_v48, %v2617_v6  ;;  %v2667_v7 = vadd.f32 %v2666_v30, %v2665_v18  ;;  %v2620_v31 = vpop.f32.mrb[26].mxu0  ;;  %v2668_v53 = vpop.f32.mrb[26].mxu1 }
 0x2a2   : > { %v2621_v57 = vpop.f32.mrb[27].mxu0  ;;  %v2669_v61 = vpop.f32.mrb[27].mxu1 }
 0x2a3   : > { %v1198_v5 = vadd.f32 %v2619_v52, %v765_v45  ;;  %v1214_v19 = vadd.f32 %v2667_v7, %v781_v49  ;;  %v2622_v0 = vadd.f32 %v2621_v57, %v2620_v31  ;;  %v2670_v4 = vadd.f32 %v2669_v61, %v2668_v53 }
 0x2a5   : > { %1230 = vst [vmem:[#allocation3 + $0x60] sm:$0xff] %v1198_v5  ;;  %1246 = vst [vmem:[#allocation3 + $0xe0] sm:$0xff] %v1214_v19  ;;  %v1199_v34 = vadd.f32 %v2622_v0, %v766_v56  ;;  %v1215_v22 = vadd.f32 %v2670_v4, %v782_v60 }
 0x2a7   : > { %1231 = vst [vmem:[#allocation3 + $0x68] sm:$0xff] %v1199_v34  ;;  %1247 = vst [vmem:[#allocation3 + $0xe8] sm:$0xff] %v1215_v22  ;;  %v2623_v35 = vpop.f32.mrb[28].mxu0  ;;  %v2671_v8 = vpop.f32.mrb[28].mxu1 }
 0x2a8   : > { %v2624_v9 = vpop.f32.mrb[29].mxu0  ;;  %v2672_v13 = vpop.f32.mrb[29].mxu1 }
 0x2a9   : > { %v2625_v38 = vadd.f32 %v2624_v9, %v2623_v35  ;;  %v2673_v16 = vadd.f32 %v2672_v13, %v2671_v8  ;;  %v2626_v11 = vpop.f32.mrb[30].mxu0  ;;  %v2674_v17 = vpop.f32.mrb[30].mxu1 }
 0x2aa   : > { %v2627_v23 = vpop.f32.mrb[31].mxu0  ;;  %v2675_v20 = vpop.f32.mrb[31].mxu1 }
 0x2ab   : > { %v1200_v42 = vadd.f32 %v2625_v38, %v767_v10  ;;  %v1216_v21 = vadd.f32 %v2673_v16, %v783_v12  ;;  %v2628_v43 = vadd.f32 %v2627_v23, %v2626_v11  ;;  %v2676_v24 = vadd.f32 %v2675_v20, %v2674_v17 }
 0x2ad   : > { %1232 = vst [vmem:[#allocation3 + $0x70] sm:$0xff] %v1200_v42  ;;  %1248 = vst [vmem:[#allocation3 + $0xf0] sm:$0xff] %v1216_v21  ;;  %v1201_v26 = vadd.f32 %v2628_v43, %v768_v1  ;;  %v1217_v25 = vadd.f32 %v2676_v24, %v784_v39 }
 0x2af   : > { %1233 = vst [vmem:[#allocation3 + $0x78] sm:$0xff] %v1201_v26  ;;  %1249 = vst [vmem:[#allocation3 + $0xf8] sm:$0xff] %v1217_v25 }
 0x2b0 PF: > { %p2479_p9 = scmp.le.s32.totalorder %s3486_s24, 0 }
 0x2b1   : > { %s2480_s30 = sadd.s32 (!%p2479_p9), 4294967295, %s3486_s24  ;;  %v3128_v2 = vld [vmem:[%s3781_s14 + $0x4] ss:$8 sps:$4 sm:$0xff] (!%p2479_p9)   ;;  %s2485_s17 = sshll.u32 (!%p2479_p9), %s3478_s23, 8  ;;  %v3126_v59 = vld [vmem:[%s3781_s14] ss:$8 sps:$4 sm:$0xff] (!%p2479_p9)  }
 0x2b2   : > { %1253 = sbr.rel (%p2479_p9) target bundleno = 1015 (0x3f7), region = 60  ;;  %p1255_p13 = scmp.lt.s32.totalorder (!%p2479_p9), %s2480_s30, 0  ;;  %v3131_v46 = vld [vmem:[%s3781_s14 + $0x84] ss:$8 sps:$4 sm:$0xff] (!%p2479_p9)   ;;  %1546 = vmatprep.mubr.bf16.mxu0 (!%p2479_p9), %v3128_v2  ;;  %v3129_v62 = vld [vmem:[%s3781_s14 + $0x80] ss:$8 sps:$4 sm:$0xff] (!%p2479_p9)  }
 0x2b3   : > { %s1256_s0 = ssub.s32 (!%p2479_p9), 0, %s2480_s30  ;;  %1610 = vmatprep.mubr.bf16.mxu1 (!%p2479_p9), %v3131_v46  ;;  %v3132_v63 = vld [vmem:[%s3781_s14 + $0x14] ss:$8 sps:$4 sm:$0xff] (!%p2479_p9)   ;;  %v3136_v15 = vld [vmem:[%s3781_s14 + $0x10] ss:$8 sps:$4 sm:$0xff] (!%p2479_p9)   ;;  %v1270_v38 = vld [vmem:[#allocation3] sm:$0xff] (!%p2479_p9) }
 0x2b4   : > { %s2481_s15 = smin.u32 (!%p2479_p9), %s2480_s30, %s1256_s0  ;;  %v3134_v41 = vld [vmem:[%s3781_s14 + $0x94] ss:$8 sps:$4 sm:$0xff] (!%p2479_p9)   ;;  %v3137_v44 = vld [vmem:[%s3781_s14 + $0x90] ss:$8 sps:$4 sm:$0xff] (!%p2479_p9)   ;;  %v3138_v6 = vld [vmem:[%s3781_s14 + $0x24] ss:$8 sps:$4 sm:$0xff] (!%p2479_p9)  }
 0x2b5   : > { %s1258_s5 = sand.u32 (!%p2479_p9), 1, %s2481_s15   ;;  %v3140_v18 = vld [vmem:[%s3781_s14 + $0xa4] ss:$8 sps:$4 sm:$0xff] (!%p2479_p9)   ;;  %v3142_v45 = vld [vmem:[%s3781_s14 + $0x20] ss:$8 sps:$4 sm:$0xff] (!%p2479_p9)  }
 0x2b6   : > { %s1259_s7 = ssub.s32 (!%p2479_p9), 0, %s1258_s5  ;;  %v3143_v48 = vld [vmem:[%s3781_s14 + $0xa0] ss:$8 sps:$4 sm:$0xff] (!%p2479_p9)   ;;  %v3144_v49 = vld [vmem:[%s3781_s14 + $0x34] ss:$8 sps:$4 sm:$0xff] (!%p2479_p9)  }
 0x2b7   : > { %v3146_v30 = vld [vmem:[%s3781_s14 + $0xb4] ss:$8 sps:$4 sm:$0xff] (!%p2479_p9)   ;;  %v3148_v52 = vld [vmem:[%s3781_s14 + $0x30] ss:$8 sps:$4 sm:$0xff] (!%p2479_p9)   ;;  %v3150_v31 = vld [vmem:[%s3781_s14 + $0x44] ss:$8 sps:$4 sm:$0xff] (!%p2479_p9)  }
 0x2b8   : > { %v3149_v7 = vld [vmem:[%s3781_s14 + $0xb0] ss:$8 sps:$4 sm:$0xff] (!%p2479_p9)   ;;  %v3152_v53 = vld [vmem:[%s3781_s14 + $0xc4] ss:$8 sps:$4 sm:$0xff] (!%p2479_p9)   ;;  %v3154_v56 = vld [vmem:[%s3781_s14 + $0x40] ss:$8 sps:$4 sm:$0xff] (!%p2479_p9)  }
 0x2b9   : > { %s4597_s7 = smov (!%p1255_p13, %s1259_s7), %s1258_s5  ;;  %v3155_v57 = vld [vmem:[%s3781_s14 + $0xc0] ss:$8 sps:$4 sm:$0xff]   ;;  %v3156_v60 = vld [vmem:[%s3781_s14 + $0x54] ss:$8 sps:$4 sm:$0xff]   ;;  %v3160_v5 = vld [vmem:[%s3781_s14 + $0x50] ss:$8 sps:$4 sm:$0xff]  }
 0x2ba   : > { %p2483_p3 = scmp.lt.s32.totalorder %s4597_s7, 0  ;;  %s1265_s20 = sadd.s32 2, %s4597_s7  ;;  %v3158_v61 = vld [vmem:[%s3781_s14 + $0xd4] ss:$8 sps:$4 sm:$0xff]   ;;  %v3161_v19 = vld [vmem:[%s3781_s14 + $0xd0] ss:$8 sps:$4 sm:$0xff]  }
 0x2bb   : > { %v3162_v0 = vld [vmem:[%s3781_s14 + $0x64] ss:$8 sps:$4 sm:$0xff]   ;;  %v3166_v34 = vld [vmem:[%s3781_s14 + $0x60] ss:$8 sps:$4 sm:$0xff]   ;;  %v3168_v35 = vld [vmem:[%s3781_s14 + $0x74] ss:$8 sps:$4 sm:$0xff]  }
 0x2bc   : > { %s4599_s20 = smov (!%p2483_p3, %s1265_s20), %s4597_s7  ;;  %v3164_v4 = vld [vmem:[%s3781_s14 + $0xe4] ss:$8 sps:$4 sm:$0xff]   ;;  %v3167_v22 = vld [vmem:[%s3781_s14 + $0xe0] ss:$8 sps:$4 sm:$0xff]   ;;  %v3170_v8 = vld [vmem:[%s3781_s14 + $0xf4] ss:$8 sps:$4 sm:$0xff]  }
 0x2bd   : > { %s2484_s8 = sshll.u32 %s4599_s20, 9  ;;  %v3172_v10 = vld [vmem:[%s3781_s14 + $0x70] ss:$8 sps:$4 sm:$0xff]   ;;  %v1286_v11 = vld [vmem:[#allocation3 + $0x80] sm:$0xff]  ;;  %v1271_v42 = vld [vmem:[#allocation3 + $0x8] sm:$0xff] }
 0x2be   : > { %s1269_s11 = sadd.s32 %s2485_s17, %s2484_s8  ;;  %v3173_v9 = vld [vmem:[%s3781_s14 + $0xf0] ss:$8 sps:$4 sm:$0xff]   ;;  %v1287_v43 = vld [vmem:[#allocation3 + $0x88] sm:$0xff] }
 0x2bf   : > { %s1334_s27 = sshra.s32 %s1269_s11, 4 }
 0x2c0   : > { %s2486_s16 = sshll.u32 %s1334_s27, 3 }
 0x2c1   : > { %s4140_s12 = scalar_lea.vmem [#allocation2], %s2486_s16 }
 0x2c2   : > { %v1346_v3 = vld [vmem:[%s4140_s12 + $0x40] sm:$0xff]  ;;  %v1347_v14 = vld [vmem:[%s4140_s12 + $0x48] sm:$0xff]  ;;  %v1348_v29 = vld [vmem:[%s4140_s12 + $0x50] sm:$0xff] }
 0x2c3   : > { %v1338_v47 = vld [vmem:[%s4140_s12] sm:$0xff]  ;;  %2677 = vmatprep.subr.bf16.mxu0 %v1346_v3  ;;  %2805 = vmatprep.subr.bf16.mxu1 %v1346_v3  ;;  %v1339_v28 = vld [vmem:[%s4140_s12 + $0x8] sm:$0xff]  ;;  %v1340_v50 = vld [vmem:[%s4140_s12 + $0x10] sm:$0xff] }
 0x2c4   : > { %2678 = vmatpush3.bf16.msra.mxu0 %v1338_v47  ;;  %2813 = vmatpush3.bf16.msra.mxu1 %v1338_v47  ;;  %v1349_v32 = vld [vmem:[%s4140_s12 + $0x58] sm:$0xff]  ;;  %v1350_v51 = vld [vmem:[%s4140_s12 + $0x60] sm:$0xff]  ;;  %v1351_v36 = vld [vmem:[%s4140_s12 + $0x68] sm:$0xff] }
 0x2c5   : > { %2679 = vmatprep.subr.bf16.mxu0 %v1347_v14  ;;  %2806 = vmatprep.subr.bf16.mxu1 %v1347_v14  ;;  %v1341_v27 = vld [vmem:[%s4140_s12 + $0x18] sm:$0xff]  ;;  %v1342_v33 = vld [vmem:[%s4140_s12 + $0x20] sm:$0xff]  ;;  %v1343_v37 = vld [vmem:[%s4140_s12 + $0x28] sm:$0xff] }
 0x2c6   : > { %v1352_v40 = vld [vmem:[%s4140_s12 + $0x70] sm:$0xff]  ;;  %v1353_v55 = vld [vmem:[%s4140_s12 + $0x78] sm:$0xff] }
 0x2c7   : > { %v1344_v54 = vld [vmem:[%s4140_s12 + $0x30] sm:$0xff]  ;;  %v1345_v58 = vld [vmem:[%s4140_s12 + $0x38] sm:$0xff] }
 0x2c8   : > { %2680 = vmatpush3.bf16.msra.mxu0 %v1339_v28  ;;  %2814 = vmatpush3.bf16.msra.mxu1 %v1339_v28 }
 0x2c9   : > { %2681 = vmatprep.subr.bf16.mxu0 %v1348_v29  ;;  %2807 = vmatprep.subr.bf16.mxu1 %v1348_v29  ;;  %v1272_v29 = vld [vmem:[#allocation3 + $0x10] sm:$0xff] }
 0x2cc   : > { %2682 = vmatpush3.bf16.msra.mxu0 %v1340_v50  ;;  %2815 = vmatpush3.bf16.msra.mxu1 %v1340_v50 }
 0x2cd   : > { %2683 = vmatprep.subr.bf16.mxu0 %v1349_v32  ;;  %2808 = vmatprep.subr.bf16.mxu1 %v1349_v32  ;;  %v1288_v32 = vld [vmem:[#allocation3 + $0x90] sm:$0xff] }
 0x2d0   : > { %2684 = vmatpush3.bf16.msra.mxu0 %v1341_v27  ;;  %2816 = vmatpush3.bf16.msra.mxu1 %v1341_v27 }
 0x2d1   : > { %2685 = vmatprep.subr.bf16.mxu0 %v1350_v51  ;;  %2809 = vmatprep.subr.bf16.mxu1 %v1350_v51 }
 0x2d4   : > { %2686 = vmatpush3.bf16.msra.mxu0 %v1342_v33  ;;  %2817 = vmatpush3.bf16.msra.mxu1 %v1342_v33 }
 0x2d5   : > { %2687 = vmatprep.subr.bf16.mxu0 %v1351_v36  ;;  %2810 = vmatprep.subr.bf16.mxu1 %v1351_v36 }
 0x2d8   : > { %2688 = vmatpush3.bf16.msra.mxu0 %v1343_v37  ;;  %2818 = vmatpush3.bf16.msra.mxu1 %v1343_v37 }
 0x2d9   : > { %2689 = vmatprep.subr.bf16.mxu0 %v1352_v40  ;;  %2811 = vmatprep.subr.bf16.mxu1 %v1352_v40  ;;  %v1273_v40 = vld [vmem:[#allocation3 + $0x18] sm:$0xff] }
 0x2dc   : > { %2690 = vmatpush3.bf16.msra.mxu0 %v1344_v54  ;;  %2819 = vmatpush3.bf16.msra.mxu1 %v1344_v54 }
 0x2dd   : > { %2691 = vmatprep.subr.bf16.mxu0 %v1353_v55  ;;  %2812 = vmatprep.subr.bf16.mxu1 %v1353_v55  ;;  %v1289_v55 = vld [vmem:[#allocation3 + $0x98] sm:$0xff] }
 0x2e0   : > { %2692 = vmatpush3.bf16.msra.mxu0 %v1345_v58  ;;  %2820 = vmatpush3.bf16.msra.mxu1 %v1345_v58 }
 0x2e3   : > { %1547 = vmatmul.mubr.bf16.vlgmr.msra.gmra.mrb[0].mxu0 %v3126_v59  ;;  %1611 = vmatmul.mubr.bf16.vlgmr.msra.gmra.mrb[0].mxu1 %v3129_v62 }
 0x2e4   : > { %1554 = vmatprep.mubr.bf16.mxu0 %v3132_v63  ;;  %1618 = vmatprep.mubr.bf16.mxu1 %v3134_v41 }
 0x2eb   : > { %1555 = vmatmul.mubr.bf16.gmra.mrb[4].mxu0 %v3136_v15  ;;  %1619 = vmatmul.mubr.bf16.gmra.mrb[4].mxu1 %v3137_v44 }
 0x2ec   : > { %1562 = vmatprep.mubr.bf16.mxu0 %v3138_v6  ;;  %1626 = vmatprep.mubr.bf16.mxu1 %v3140_v18 }
 0x2f3   : > { %1563 = vmatmul.mubr.bf16.gmra.mrb[8].mxu0 %v3142_v45  ;;  %1627 = vmatmul.mubr.bf16.gmra.mrb[8].mxu1 %v3143_v48  ;;  %v1274_v45 = vld [vmem:[#allocation3 + $0x20] sm:$0xff] }
 0x2f4   : > { %1570 = vmatprep.mubr.bf16.mxu0 %v3144_v49  ;;  %1634 = vmatprep.mubr.bf16.mxu1 %v3146_v30  ;;  %v1290_v49 = vld [vmem:[#allocation3 + $0xa0] sm:$0xff] }
 0x2fb   : > { %1571 = vmatmul.mubr.bf16.gmra.mrb[12].mxu0 %v3148_v52  ;;  %1635 = vmatmul.mubr.bf16.gmra.mrb[12].mxu1 %v3149_v7 }
 0x2fc   : > { %1578 = vmatprep.mubr.bf16.mxu0 %v3150_v31  ;;  %1642 = vmatprep.mubr.bf16.mxu1 %v3152_v53 }
 0x303   : > { %1579 = vmatmul.mubr.bf16.gmra.mrb[16].mxu0 %v3154_v56  ;;  %1643 = vmatmul.mubr.bf16.gmra.mrb[16].mxu1 %v3155_v57  ;;  %v1275_v56 = vld [vmem:[#allocation3 + $0x28] sm:$0xff] }
 0x304   : > { %1586 = vmatprep.mubr.bf16.mxu0 %v3156_v60  ;;  %1650 = vmatprep.mubr.bf16.mxu1 %v3158_v61  ;;  %v1291_v60 = vld [vmem:[#allocation3 + $0xa8] sm:$0xff] }
 0x30b   : > { %1587 = vmatmul.mubr.bf16.gmra.mrb[20].mxu0 %v3160_v5  ;;  %1651 = vmatmul.mubr.bf16.gmra.mrb[20].mxu1 %v3161_v19 }
 0x30c   : > { %1594 = vmatprep.mubr.bf16.mxu0 %v3162_v0  ;;  %1658 = vmatprep.mubr.bf16.mxu1 %v3164_v4 }
 0x313   : > { %1595 = vmatmul.mubr.bf16.gmra.mrb[24].mxu0 %v3166_v34  ;;  %1659 = vmatmul.mubr.bf16.gmra.mrb[24].mxu1 %v3167_v22 }
 0x314   : > { %1602 = vmatprep.mubr.bf16.mxu0 %v3168_v35  ;;  %1666 = vmatprep.mubr.bf16.mxu1 %v3170_v8 }
 0x31b   : > { %1603 = vmatmul.mubr.bf16.gmra.mrb[28].mxu0 %v3172_v10  ;;  %1667 = vmatmul.mubr.bf16.gmra.mrb[28].mxu1 %v3173_v9  ;;  %v1276_v10 = vld [vmem:[#allocation3 + $0x30] sm:$0xff] }
 0x3b6   : > { %v2693_v12 = vpop.f32.mrb[0].mxu0  ;;  %v2741_v13 = vpop.f32.mrb[0].mxu1 }
 0x3b7   : > { %v2694_v16 = vpop.f32.mrb[1].mxu0  ;;  %v2742_v17 = vpop.f32.mrb[1].mxu1 }
 0x3b8   : > { %v2695_v1 = vadd.f32 %v2694_v16, %v2693_v12  ;;  %v2743_v23 = vadd.f32 %v2742_v17, %v2741_v13  ;;  %v2696_v39 = vpop.f32.mrb[2].mxu0  ;;  %v2744_v20 = vpop.f32.mrb[2].mxu1  ;;  %v1292_v12 = vld [vmem:[#allocation3 + $0xb0] sm:$0xff] }
 0x3b9   : > { %v2697_v21 = vpop.f32.mrb[3].mxu0  ;;  %v2745_v24 = vpop.f32.mrb[3].mxu1 }
 0x3ba   : > { %v1675_v26 = vadd.f32 %v2695_v1, %v1270_v38  ;;  %v1691_v25 = vadd.f32 %v2743_v23, %v1286_v11  ;;  %v2698_v2 = vadd.f32 %v2697_v21, %v2696_v39  ;;  %v2746_v46 = vadd.f32 %v2745_v24, %v2744_v20  ;;  %v1277_v1 = vld [vmem:[#allocation3 + $0x38] sm:$0xff] }
 0x3bb   : > { %v1293_v39 = vld [vmem:[#allocation3 + $0xb8] sm:$0xff] }
 0x3bc   : > { %1707 = vst [vmem:[#allocation3] sm:$0xff] %v1675_v26  ;;  %1723 = vst [vmem:[#allocation3 + $0x80] sm:$0xff] %v1691_v25  ;;  %v1676_v3 = vadd.f32 %v2698_v2, %v1271_v42  ;;  %v1692_v47 = vadd.f32 %v2746_v46, %v1287_v43 }
 0x3be   : > { %1708 = vst [vmem:[#allocation3 + $0x8] sm:$0xff] %v1676_v3  ;;  %1724 = vst [vmem:[#allocation3 + $0x88] sm:$0xff] %v1692_v47  ;;  %v2699_v14 = vpop.f32.mrb[4].mxu0  ;;  %v2747_v28 = vpop.f32.mrb[4].mxu1  ;;  %v1278_v3 = vld [vmem:[#allocation3 + $0x40] sm:$0xff] }
 0x3bf   : > { %v2700_v50 = vpop.f32.mrb[5].mxu0  ;;  %v2748_v27 = vpop.f32.mrb[5].mxu1 }
 0x3c0   : > { %v2701_v51 = vadd.f32 %v2700_v50, %v2699_v14  ;;  %v2749_v33 = vadd.f32 %v2748_v27, %v2747_v28  ;;  %v2702_v36 = vpop.f32.mrb[6].mxu0  ;;  %v2750_v37 = vpop.f32.mrb[6].mxu1  ;;  %v1294_v14 = vld [vmem:[#allocation3 + $0xc0] sm:$0xff] }
 0x3c1   : > { %v2703_v54 = vpop.f32.mrb[7].mxu0  ;;  %v2751_v58 = vpop.f32.mrb[7].mxu1 }
 0x3c2   : > { %v1677_v59 = vadd.f32 %v2701_v51, %v1272_v29  ;;  %v1693_v62 = vadd.f32 %v2749_v33, %v1288_v32  ;;  %v2704_v63 = vadd.f32 %v2703_v54, %v2702_v36  ;;  %v2752_v41 = vadd.f32 %v2751_v58, %v2750_v37  ;;  %v1279_v51 = vld [vmem:[#allocation3 + $0x48] sm:$0xff] }
 0x3c3   : > { %v1295_v36 = vld [vmem:[#allocation3 + $0xc8] sm:$0xff] }
 0x3c4   : > { %1709 = vst [vmem:[#allocation3 + $0x10] sm:$0xff] %v1677_v59  ;;  %1725 = vst [vmem:[#allocation3 + $0x90] sm:$0xff] %v1693_v62  ;;  %v1678_v15 = vadd.f32 %v2704_v63, %v1273_v40  ;;  %v1694_v44 = vadd.f32 %v2752_v41, %v1289_v55 }
 0x3c6   : > { %1710 = vst [vmem:[#allocation3 + $0x18] sm:$0xff] %v1678_v15  ;;  %1726 = vst [vmem:[#allocation3 + $0x98] sm:$0xff] %v1694_v44  ;;  %v2705_v6 = vpop.f32.mrb[8].mxu0  ;;  %v2753_v18 = vpop.f32.mrb[8].mxu1  ;;  %v1280_v15 = vld [vmem:[#allocation3 + $0x50] sm:$0xff] }
 0x3c7   : > { %v2706_v48 = vpop.f32.mrb[9].mxu0  ;;  %v2754_v30 = vpop.f32.mrb[9].mxu1 }
 0x3c8   : > { %v2707_v52 = vadd.f32 %v2706_v48, %v2705_v6  ;;  %v2755_v7 = vadd.f32 %v2754_v30, %v2753_v18  ;;  %v2708_v31 = vpop.f32.mrb[10].mxu0  ;;  %v2756_v53 = vpop.f32.mrb[10].mxu1  ;;  %v1296_v6 = vld [vmem:[#allocation3 + $0xd0] sm:$0xff] }
 0x3c9   : > { %v2709_v57 = vpop.f32.mrb[11].mxu0  ;;  %v2757_v61 = vpop.f32.mrb[11].mxu1 }
 0x3ca   : > { %v1679_v5 = vadd.f32 %v2707_v52, %v1274_v45  ;;  %v1695_v19 = vadd.f32 %v2755_v7, %v1290_v49  ;;  %v2710_v0 = vadd.f32 %v2709_v57, %v2708_v31  ;;  %v2758_v4 = vadd.f32 %v2757_v61, %v2756_v53  ;;  %v1281_v52 = vld [vmem:[#allocation3 + $0x58] sm:$0xff] }
 0x3cb   : > { %v1297_v31 = vld [vmem:[#allocation3 + $0xd8] sm:$0xff] }
 0x3cc   : > { %1711 = vst [vmem:[#allocation3 + $0x20] sm:$0xff] %v1679_v5  ;;  %1727 = vst [vmem:[#allocation3 + $0xa0] sm:$0xff] %v1695_v19  ;;  %v1680_v34 = vadd.f32 %v2710_v0, %v1275_v56  ;;  %v1696_v22 = vadd.f32 %v2758_v4, %v1291_v60 }
 0x3ce   : > { %1712 = vst [vmem:[#allocation3 + $0x28] sm:$0xff] %v1680_v34  ;;  %1728 = vst [vmem:[#allocation3 + $0xa8] sm:$0xff] %v1696_v22  ;;  %v2711_v35 = vpop.f32.mrb[12].mxu0  ;;  %v2759_v8 = vpop.f32.mrb[12].mxu1  ;;  %v1282_v34 = vld [vmem:[#allocation3 + $0x60] sm:$0xff] }
 0x3cf   : > { %v2712_v9 = vpop.f32.mrb[13].mxu0  ;;  %v2760_v13 = vpop.f32.mrb[13].mxu1 }
 0x3d0   : > { %v2713_v38 = vadd.f32 %v2712_v9, %v2711_v35  ;;  %v2761_v16 = vadd.f32 %v2760_v13, %v2759_v8  ;;  %v2714_v11 = vpop.f32.mrb[14].mxu0  ;;  %v2762_v17 = vpop.f32.mrb[14].mxu1  ;;  %v1298_v35 = vld [vmem:[#allocation3 + $0xe0] sm:$0xff] }
 0x3d1   : > { %v2715_v23 = vpop.f32.mrb[15].mxu0  ;;  %v2763_v20 = vpop.f32.mrb[15].mxu1 }
 0x3d2   : > { %v1681_v42 = vadd.f32 %v2713_v38, %v1276_v10  ;;  %v1697_v21 = vadd.f32 %v2761_v16, %v1292_v12  ;;  %v2716_v43 = vadd.f32 %v2715_v23, %v2714_v11  ;;  %v2764_v24 = vadd.f32 %v2763_v20, %v2762_v17  ;;  %v1283_v38 = vld [vmem:[#allocation3 + $0x68] sm:$0xff] }
 0x3d3   : > { %v1299_v11 = vld [vmem:[#allocation3 + $0xe8] sm:$0xff] }
 0x3d4   : > { %1713 = vst [vmem:[#allocation3 + $0x30] sm:$0xff] %v1681_v42  ;;  %1729 = vst [vmem:[#allocation3 + $0xb0] sm:$0xff] %v1697_v21  ;;  %v1682_v26 = vadd.f32 %v2716_v43, %v1277_v1  ;;  %v1698_v25 = vadd.f32 %v2764_v24, %v1293_v39 }
 0x3d6   : > { %1714 = vst [vmem:[#allocation3 + $0x38] sm:$0xff] %v1682_v26  ;;  %1730 = vst [vmem:[#allocation3 + $0xb8] sm:$0xff] %v1698_v25  ;;  %v2717_v2 = vpop.f32.mrb[16].mxu0  ;;  %v2765_v46 = vpop.f32.mrb[16].mxu1  ;;  %v1284_v26 = vld [vmem:[#allocation3 + $0x70] sm:$0xff] }
 0x3d7   : > { %v2718_v47 = vpop.f32.mrb[17].mxu0  ;;  %v2766_v28 = vpop.f32.mrb[17].mxu1 }
 0x3d8   : > { %v2719_v29 = vadd.f32 %v2718_v47, %v2717_v2  ;;  %v2767_v50 = vadd.f32 %v2766_v28, %v2765_v46  ;;  %v2720_v32 = vpop.f32.mrb[18].mxu0  ;;  %v2768_v27 = vpop.f32.mrb[18].mxu1  ;;  %v1300_v2 = vld [vmem:[#allocation3 + $0xf0] sm:$0xff] }
 0x3d9   : > { %v2721_v33 = vpop.f32.mrb[19].mxu0  ;;  %v2769_v37 = vpop.f32.mrb[19].mxu1 }
 0x3da   : > { %v1683_v40 = vadd.f32 %v2719_v29, %v1278_v3  ;;  %v1699_v54 = vadd.f32 %v2767_v50, %v1294_v14  ;;  %v2722_v55 = vadd.f32 %v2721_v33, %v2720_v32  ;;  %v2770_v58 = vadd.f32 %v2769_v37, %v2768_v27  ;;  %v1285_v29 = vld [vmem:[#allocation3 + $0x78] sm:$0xff] }
 0x3db   : > { %v1301_v32 = vld [vmem:[#allocation3 + $0xf8] sm:$0xff] }
 0x3dc   : > { %1715 = vst [vmem:[#allocation3 + $0x40] sm:$0xff] %v1683_v40  ;;  %1731 = vst [vmem:[#allocation3 + $0xc0] sm:$0xff] %v1699_v54  ;;  %v1684_v59 = vadd.f32 %v2722_v55, %v1279_v51  ;;  %v1700_v62 = vadd.f32 %v2770_v58, %v1295_v36 }
 0x3de   : > { %1716 = vst [vmem:[#allocation3 + $0x48] sm:$0xff] %v1684_v59  ;;  %1732 = vst [vmem:[#allocation3 + $0xc8] sm:$0xff] %v1700_v62  ;;  %v2723_v63 = vpop.f32.mrb[20].mxu0  ;;  %v2771_v41 = vpop.f32.mrb[20].mxu1 }
 0x3df   : > { %v2724_v44 = vpop.f32.mrb[21].mxu0  ;;  %v2772_v18 = vpop.f32.mrb[21].mxu1 }
 0x3e0   : > { %v2725_v45 = vadd.f32 %v2724_v44, %v2723_v63  ;;  %v2773_v48 = vadd.f32 %v2772_v18, %v2771_v41  ;;  %v2726_v49 = vpop.f32.mrb[22].mxu0  ;;  %v2774_v30 = vpop.f32.mrb[22].mxu1 }
 0x3e1   : > { %v2727_v7 = vpop.f32.mrb[23].mxu0  ;;  %v2775_v53 = vpop.f32.mrb[23].mxu1 }
 0x3e2   : > { %v1685_v56 = vadd.f32 %v2725_v45, %v1280_v15  ;;  %v1701_v57 = vadd.f32 %v2773_v48, %v1296_v6  ;;  %v2728_v60 = vadd.f32 %v2727_v7, %v2726_v49  ;;  %v2776_v61 = vadd.f32 %v2775_v53, %v2774_v30 }
 0x3e4   : > { %1717 = vst [vmem:[#allocation3 + $0x50] sm:$0xff] %v1685_v56  ;;  %1733 = vst [vmem:[#allocation3 + $0xd0] sm:$0xff] %v1701_v57  ;;  %v1686_v5 = vadd.f32 %v2728_v60, %v1281_v52  ;;  %v1702_v19 = vadd.f32 %v2776_v61, %v1297_v31 }
 0x3e6   : > { %1718 = vst [vmem:[#allocation3 + $0x58] sm:$0xff] %v1686_v5  ;;  %1734 = vst [vmem:[#allocation3 + $0xd8] sm:$0xff] %v1702_v19  ;;  %v2729_v0 = vpop.f32.mrb[24].mxu0  ;;  %v2777_v4 = vpop.f32.mrb[24].mxu1 }
 0x3e7   : > { %v2730_v22 = vpop.f32.mrb[25].mxu0  ;;  %v2778_v8 = vpop.f32.mrb[25].mxu1 }
 0x3e8   : > { %v2731_v10 = vadd.f32 %v2730_v22, %v2729_v0  ;;  %v2779_v9 = vadd.f32 %v2778_v8, %v2777_v4  ;;  %v2732_v12 = vpop.f32.mrb[26].mxu0  ;;  %v2780_v13 = vpop.f32.mrb[26].mxu1 }
 0x3e9   : > { %v2733_v16 = vpop.f32.mrb[27].mxu0  ;;  %v2781_v17 = vpop.f32.mrb[27].mxu1 }
 0x3ea   : > { %v1687_v1 = vadd.f32 %v2731_v10, %v1282_v34  ;;  %v1703_v23 = vadd.f32 %v2779_v9, %v1298_v35  ;;  %v2734_v39 = vadd.f32 %v2733_v16, %v2732_v12  ;;  %v2782_v20 = vadd.f32 %v2781_v17, %v2780_v13 }
 0x3ec   : > { %1719 = vst [vmem:[#allocation3 + $0x60] sm:$0xff] %v1687_v1  ;;  %1735 = vst [vmem:[#allocation3 + $0xe0] sm:$0xff] %v1703_v23  ;;  %v1688_v42 = vadd.f32 %v2734_v39, %v1283_v38  ;;  %v1704_v21 = vadd.f32 %v2782_v20, %v1299_v11 }
 0x3ee   : > { %1720 = vst [vmem:[#allocation3 + $0x68] sm:$0xff] %v1688_v42  ;;  %1736 = vst [vmem:[#allocation3 + $0xe8] sm:$0xff] %v1704_v21  ;;  %v2735_v43 = vpop.f32.mrb[28].mxu0  ;;  %v2783_v24 = vpop.f32.mrb[28].mxu1 }
 0x3ef   : > { %v2736_v25 = vpop.f32.mrb[29].mxu0  ;;  %v2784_v46 = vpop.f32.mrb[29].mxu1 }
 0x3f0   : > { %v2737_v3 = vadd.f32 %v2736_v25, %v2735_v43  ;;  %v2785_v47 = vadd.f32 %v2784_v46, %v2783_v24  ;;  %v2738_v14 = vpop.f32.mrb[30].mxu0  ;;  %v2786_v28 = vpop.f32.mrb[30].mxu1 }
 0x3f1   : > { %v2739_v50 = vpop.f32.mrb[31].mxu0  ;;  %v2787_v27 = vpop.f32.mrb[31].mxu1 }
 0x3f2   : > { %v1689_v51 = vadd.f32 %v2737_v3, %v1284_v26  ;;  %v1705_v33 = vadd.f32 %v2785_v47, %v1300_v2  ;;  %v2740_v36 = vadd.f32 %v2739_v50, %v2738_v14  ;;  %v2788_v37 = vadd.f32 %v2787_v27, %v2786_v28 }
 0x3f4   : > { %1721 = vst [vmem:[#allocation3 + $0x70] sm:$0xff] %v1689_v51  ;;  %1737 = vst [vmem:[#allocation3 + $0xf0] sm:$0xff] %v1705_v33  ;;  %v1690_v40 = vadd.f32 %v2740_v36, %v1285_v29  ;;  %v1706_v54 = vadd.f32 %v2788_v37, %v1301_v32 }
 0x3f6   : > { %1722 = vst [vmem:[#allocation3 + $0x78] sm:$0xff] %v1690_v40  ;;  %1738 = vst [vmem:[#allocation3 + $0xf8] sm:$0xff] %v1706_v54 }
 0x3f7 PF: > { %p2519_p8 = scmp.ne.s32.totalorder %s3478_s23, 1 }
 0x3f8   : > { %v4189_v55 = vld [vmem:[#allocation3] sm:$0xff] (!%p2519_p8)  ;;  %v4191_v58 = vld [vmem:[#allocation3 + $0x8] sm:$0xff] (!%p2519_p8)  ;;  %v4193_v59 = vld [vmem:[#allocation3 + $0x10] sm:$0xff] (!%p2519_p8)  ;;  %p2520_p11 = scmp.ge.s32.totalorder (!%p2519_p8), %s3486_s24, 2 }
 0x3f9   : > { %1742 = sbr.rel (%p2519_p8) target bundleno = 1290 (0x50a), region = 64  ;;  %v4195_v62 = vld [vmem:[#allocation3 + $0x18] sm:$0xff] (!%p2519_p8)  ;;  %v4197_v63 = vld [vmem:[#allocation3 + $0x20] sm:$0xff] (!%p2519_p8)  ;;  %v4199_v41 = vld [vmem:[#allocation3 + $0x28] sm:$0xff] (!%p2519_p8) }
 0x3fa   : > { %v4201_v15 = vld [vmem:[#allocation3 + $0x30] sm:$0xff] (!%p2519_p8)  ;;  %v4203_v44 = vld [vmem:[#allocation3 + $0x38] sm:$0xff] (!%p2519_p8)  ;;  %v4205_v6 = vld [vmem:[#allocation3 + $0x40] sm:$0xff] (!%p2519_p8) }
 0x3fb   : > { %v4207_v18 = vld [vmem:[#allocation3 + $0x48] sm:$0xff] (!%p2519_p8)  ;;  %v4209_v45 = vld [vmem:[#allocation3 + $0x50] sm:$0xff] (!%p2519_p8)  ;;  %v4211_v48 = vld [vmem:[#allocation3 + $0x58] sm:$0xff] (!%p2519_p8) }
 0x3fc   : > { %v4213_v49 = vld [vmem:[#allocation3 + $0x60] sm:$0xff] (!%p2519_p8)  ;;  %v4215_v30 = vld [vmem:[#allocation3 + $0x68] sm:$0xff] (!%p2519_p8)  ;;  %v4217_v52 = vld [vmem:[#allocation3 + $0x70] sm:$0xff] (!%p2519_p8) }
 0x3fd   : > { %v4219_v7 = vld [vmem:[#allocation3 + $0x78] sm:$0xff] (!%p2519_p8)  ;;  %v4221_v31 = vld [vmem:[#allocation3 + $0x80] sm:$0xff] (!%p2519_p8)  ;;  %v4223_v53 = vld [vmem:[#allocation3 + $0x88] sm:$0xff] (!%p2519_p8) }
 0x3fe   : > { %v4225_v56 = vld [vmem:[#allocation3 + $0x90] sm:$0xff] (!%p2519_p8)  ;;  %v4227_v57 = vld [vmem:[#allocation3 + $0x98] sm:$0xff] (!%p2519_p8)  ;;  %v4229_v60 = vld [vmem:[#allocation3 + $0xa0] sm:$0xff] (!%p2519_p8) }
 0x3ff   : > { %v4231_v61 = vld [vmem:[#allocation3 + $0xa8] sm:$0xff] (!%p2519_p8)  ;;  %v4233_v5 = vld [vmem:[#allocation3 + $0xb0] sm:$0xff] (!%p2519_p8)  ;;  %v4235_v19 = vld [vmem:[#allocation3 + $0xb8] sm:$0xff] (!%p2519_p8) }
 0x400   : > { %v4237_v0 = vld [vmem:[#allocation3 + $0xc0] sm:$0xff]  ;;  %v4239_v4 = vld [vmem:[#allocation3 + $0xc8] sm:$0xff]  ;;  %v4241_v34 = vld [vmem:[#allocation3 + $0xd0] sm:$0xff]  ;;  %1778 = sbr.rel (%p2520_p11) target bundleno = 1048 (0x418), region = 68  ;;  %p1779_p2 = scmp.lt.s32.totalorder (!%p2520_p11), %s3486_s24, 0  ;;  %v1793_v12 = vpack.c.bf16 (!%p2520_p11), %v4191_v58, %v4189_v55  ;;  %v1794_v13 = vpack.c.bf16 (!%p2520_p11), %v4195_v62, %v4193_v59  ;;  %v1795_v38 = vpack.c.bf16 (!%p2520_p11), %v4199_v41, %v4197_v63  ;;  %v1796_v16 = vpack.c.bf16 (!%p2520_p11), %v4203_v44, %v4201_v15 }
 0x401   : > { %v4243_v22 = vld [vmem:[#allocation3 + $0xd8] sm:$0xff]  ;;  %v4245_v35 = vld [vmem:[#allocation3 + $0xe0] sm:$0xff]  ;;  %v4247_v8 = vld [vmem:[#allocation3 + $0xe8] sm:$0xff]  ;;  %s1780_s23 = ssub.s32 (!%p2520_p11), 0, %s3486_s24  ;;  %v1797_v11 = vpack.c.bf16 (!%p2520_p11), %v4207_v18, %v4205_v6  ;;  %v1798_v17 = vpack.c.bf16 (!%p2520_p11), %v4211_v48, %v4209_v45  ;;  %v1799_v1 = vpack.c.bf16 (!%p2520_p11), %v4215_v30, %v4213_v49  ;;  %v1800_v23 = vpack.c.bf16 (!%p2520_p11), %v4219_v7, %v4217_v52 }
 0x402   : > { %v4249_v10 = vld [vmem:[#allocation3 + $0xf0] sm:$0xff]  ;;  %v4251_v9 = vld [vmem:[#allocation3 + $0xf8] sm:$0xff]  ;;  %s2521_s14 = smin.u32 (!%p2520_p11), %s3486_s24, %s1780_s23  ;;  %v1801_v39 = vpack.c.bf16 (!%p2520_p11), %v4223_v53, %v4221_v31  ;;  %v1802_v20 = vpack.c.bf16 (!%p2520_p11), %v4227_v57, %v4225_v56  ;;  %v1803_v42 = vpack.c.bf16 (!%p2520_p11), %v4231_v61, %v4229_v60  ;;  %v1804_v21 = vpack.c.bf16 (!%p2520_p11), %v4235_v19, %v4233_v5 }
 0x403   : > { %s1782_s6 = sand.u32 (!%p2520_p11), 1, %s2521_s14   ;;  %v1805_v43 = vpack.c.bf16 (!%p2520_p11), %v4239_v4, %v4237_v0  ;;  %v1806_v24 = vpack.c.bf16 (!%p2520_p11), %v4243_v22, %v4241_v34  ;;  %v1807_v26 = vpack.c.bf16 (!%p2520_p11), %v4247_v8, %v4245_v35  ;;  %v1808_v25 = vpack.c.bf16 (!%p2520_p11), %v4251_v9, %v4249_v10 }
 0x404   : > { %s1783_s3 = ssub.s32 (!%p2520_p11), 0, %s1782_s6 }
 0x407   : > { %s4601_s3 = smov (!%p1779_p2, %s1783_s3), %s1782_s6 }
 0x408   : > { %p2523_p12 = scmp.lt.s32.totalorder %s4601_s3, 0  ;;  %s1789_s30 = sadd.s32 2, %s4601_s3 }
 0x40a   : > { %s4603_s30 = smov (!%p2523_p12, %s1789_s30), %s4601_s3 }
 0x40b   : > { %s2524_s24 = sshll.u32 %s4603_s30, 9 }
 0x40c   : > { %s1792_s0 = sadd.s32 %s2524_s24, %s3795_s13 }
 0x40d   : > { %s1809_s15 = sshra.s32 %s1792_s0, 4 }
 0x40e   : > { %s2525_s5 = sshll.u32 %s1809_s15, 3 }
 0x40f   : > { %s1812_s7 = scalar_lea.vmem [#allocation2], %s2525_s5 }
 0x410   : > { %1813 = vst [vmem:[%s1812_s7] sm:$0xff] %v1793_v12  ;;  %1814 = vst [vmem:[%s1812_s7 + $0x8] sm:$0xff] %v1794_v13 }
 0x411   : > { %1815 = vst [vmem:[%s1812_s7 + $0x10] sm:$0xff] %v1795_v38  ;;  %1816 = vst [vmem:[%s1812_s7 + $0x18] sm:$0xff] %v1796_v16 }
 0x412   : > { %1817 = vst [vmem:[%s1812_s7 + $0x20] sm:$0xff] %v1797_v11  ;;  %1818 = vst [vmem:[%s1812_s7 + $0x28] sm:$0xff] %v1798_v17 }
 0x413   : > { %1819 = vst [vmem:[%s1812_s7 + $0x30] sm:$0xff] %v1799_v1  ;;  %1820 = vst [vmem:[%s1812_s7 + $0x38] sm:$0xff] %v1800_v23 }
 0x414   : > { %1821 = vst [vmem:[%s1812_s7 + $0x40] sm:$0xff] %v1801_v39  ;;  %1822 = vst [vmem:[%s1812_s7 + $0x48] sm:$0xff] %v1802_v20 }
 0x415   : > { %1823 = vst [vmem:[%s1812_s7 + $0x50] sm:$0xff] %v1803_v42  ;;  %1824 = vst [vmem:[%s1812_s7 + $0x58] sm:$0xff] %v1804_v21 }
 0x416   : > { %1825 = vst [vmem:[%s1812_s7 + $0x60] sm:$0xff] %v1805_v43  ;;  %1826 = vst [vmem:[%s1812_s7 + $0x68] sm:$0xff] %v1806_v24 }
 0x417   : > { %1827 = vst [vmem:[%s1812_s7 + $0x70] sm:$0xff] %v1807_v26  ;;  %1828 = vst [vmem:[%s1812_s7 + $0x78] sm:$0xff] %v1808_v25 }
 0x418 PF: > { %v2526_v2 = vld [vmem:[%s4534_s2] ss:$0 sm:$0xff] }
 0x419   : > { %v1871_v46 = vmul.f32 %v2526_v2, %v4193_v59  ;;  %v1869_v3 = vmul.f32 %v2526_v2, %v4189_v55  ;;  %v1872_v47 = vmul.f32 %v2526_v2, %v4195_v62  ;;  %v1870_v14 = vmul.f32 %v2526_v2, %v4191_v58 }
 0x41a   : > { %v1874_v28 = vmul.f32 %v2526_v2, %v4199_v41  ;;  %v1873_v29 = vmul.f32 %v2526_v2, %v4197_v63  ;;  %v1876_v50 = vmul.f32 %v2526_v2, %v4203_v44  ;;  %v1875_v32 = vmul.f32 %v2526_v2, %v4201_v15 }
 0x41b   : > { %1905 = vadd.xlane.f32.xlu1 %v1871_v46  ;;  %1901 = vadd.xlane.f32.xlu0 %v1869_v3  ;;  %v1878_v27 = vmul.f32 %v2526_v2, %v4207_v18  ;;  %v1877_v51 = vmul.f32 %v2526_v2, %v4205_v6  ;;  %v1880_v33 = vmul.f32 %v2526_v2, %v4211_v48  ;;  %v4326_v3 = vstv %s3797_s29  ;;  %s4343_s29 = scalar_lea.vmem [#allocation10], %s3795_s13 }
 0x41c   : > { %v1879_v36 = vmul.f32 %v2526_v2, %v4209_v45  ;;  %v1882_v37 = vmul.f32 %v2526_v2, %v4215_v30  ;;  %v1881_v40 = vmul.f32 %v2526_v2, %v4213_v49  ;;  %v1884_v54 = vmul.f32 %v2526_v2, %v4219_v7 }
 0x41d   : > { %v1883_v12 = vmul.f32 %v2526_v2, %v4217_v52  ;;  %v1886_v13 = vmul.f32 %v2526_v2, %v4223_v53  ;;  %v1885_v38 = vmul.f32 %v2526_v2, %v4221_v31  ;;  %v1888_v16 = vmul.f32 %v2526_v2, %v4227_v57 }
 0x41e   : > { %v1887_v11 = vmul.f32 %v2526_v2, %v4225_v56  ;;  %v1890_v17 = vmul.f32 %v2526_v2, %v4231_v61  ;;  %v1889_v1 = vmul.f32 %v2526_v2, %v4229_v60  ;;  %v1892_v23 = vmul.f32 %v2526_v2, %v4235_v19 }
 0x41f   : > { %1907 = vadd.xlane.f32.xlu1 %v1872_v47  ;;  %1903 = vadd.xlane.f32.xlu0 %v1870_v14  ;;  %v1891_v39 = vmul.f32 %v2526_v2, %v4233_v5  ;;  %v1894_v20 = vmul.f32 %v2526_v2, %v4239_v4  ;;  %v1893_v42 = vmul.f32 %v2526_v2, %v4237_v0 }
 0x420   : > { %v1896_v21 = vmul.f32 %v2526_v2, %v4243_v22  ;;  %v1895_v43 = vmul.f32 %v2526_v2, %v4241_v34  ;;  %v1898_v24 = vmul.f32 %v2526_v2, %v4247_v8  ;;  %v1897_v26 = vmul.f32 %v2526_v2, %v4245_v35 }
 0x421   : > { %v1900_v25 = vmul.f32 %v2526_v2, %v4251_v9  ;;  %v1899_v46 = vmul.f32 %v2526_v2, %v4249_v10 }
 0x423   : > { %1911 = vadd.xlane.f32.xlu1 %v1874_v28  ;;  %1909 = vadd.xlane.f32.xlu0 %v1873_v29 }
 0x427   : > { %1915 = vadd.xlane.f32.xlu1 %v1876_v50  ;;  %1913 = vadd.xlane.f32.xlu0 %v1875_v32 }
 0x42b   : > { %1919 = vadd.xlane.f32.xlu1 %v1878_v27  ;;  %1917 = vadd.xlane.f32.xlu0 %v1877_v51 }
 0x42f   : > { %1923 = vadd.xlane.f32.xlu1 %v1880_v33  ;;  %1921 = vadd.xlane.f32.xlu0 %v1879_v36 }
 0x433   : > { %1927 = vadd.xlane.f32.xlu1 %v1882_v37  ;;  %1925 = vadd.xlane.f32.xlu0 %v1881_v40 }
 0x437   : > { %1931 = vadd.xlane.f32.xlu1 %v1884_v54  ;;  %1929 = vadd.xlane.f32.xlu0 %v1883_v12 }
 0x43b   : > { %1935 = vadd.xlane.f32.xlu1 %v1886_v13  ;;  %1933 = vadd.xlane.f32.xlu0 %v1885_v38 }
 0x43f   : > { %1939 = vadd.xlane.f32.xlu1 %v1888_v16  ;;  %1937 = vadd.xlane.f32.xlu0 %v1887_v11 }
 0x443   : > { %1943 = vadd.xlane.f32.xlu1 %v1890_v17  ;;  %1941 = vadd.xlane.f32.xlu0 %v1889_v1 }
 0x447   : > { %1947 = vadd.xlane.f32.xlu1 %v1892_v23  ;;  %1945 = vadd.xlane.f32.xlu0 %v1891_v39 }
 0x44b   : > { %1951 = vadd.xlane.f32.xlu1 %v1894_v20  ;;  %1949 = vadd.xlane.f32.xlu0 %v1893_v42 }
 0x44f   : > { %1955 = vadd.xlane.f32.xlu1 %v1896_v21  ;;  %1953 = vadd.xlane.f32.xlu0 %v1895_v43 }
 0x453   : > { %1959 = vadd.xlane.f32.xlu1 %v1898_v24  ;;  %1957 = vadd.xlane.f32.xlu0 %v1897_v26 }
 0x457   : > { %1963 = vadd.xlane.f32.xlu1 %v1900_v25  ;;  %1961 = vadd.xlane.f32.xlu0 %v1899_v46 }
 0x4a8   : > { %v1906_v47 = vpop.xlane.xlu1 %1905  ;;  %v1902_v14 = vpop.xlane.xlu0 %1901 }
 0x4a9   : > { %v1968_v28 = vadd.f32 %v4326_v3, %v1906_v47  ;;  %v1966_v29 = vadd.f32 %v4326_v3, %v1902_v14 }
 0x4ab   : > { %v2529_v50 = vmul.f32 -1.442695, %v1968_v28  ;;  %v2527_v32 = vmul.f32 -1.442695, %v1966_v29 }
 0x4ac   : > { %v1908_v27 = vpop.xlane.xlu1 %1907  ;;  %v1904_v51 = vpop.xlane.xlu0 %1903 }
 0x4ad   : > { %3174 = vpow2.f32 %v2529_v50  ;;  %v1969_v33 = vadd.f32 %v4326_v3, %v1908_v27  ;;  %v1967_v36 = vadd.f32 %v4326_v3, %v1904_v51 }
 0x4ae   : > { %3176 = vpow2.f32 %v2527_v32 }
 0x4af   : > { %v2530_v2 = vmul.f32 -1.442695, %v1969_v33  ;;  %v2528_v37 = vmul.f32 -1.442695, %v1967_v36 }
 0x4b0   : > { %v1912_v40 = vpop.xlane.xlu1 %1911  ;;  %v1910_v54 = vpop.xlane.xlu0 %1909 }
 0x4b1   : > { %3178 = vpow2.f32 %v2530_v2  ;;  %v1971_v12 = vadd.f32 %v4326_v3, %v1912_v40  ;;  %v1970_v13 = vadd.f32 %v4326_v3, %v1910_v54 }
 0x4b2   : > { %3180 = vpow2.f32 %v2528_v37 }
 0x4b3   : > { %v2532_v38 = vmul.f32 -1.442695, %v1971_v12  ;;  %v2531_v16 = vmul.f32 -1.442695, %v1970_v13 }
 0x4b4   : > { %v1916_v11 = vpop.xlane.xlu1 %1915  ;;  %v1914_v17 = vpop.xlane.xlu0 %1913 }
 0x4b5   : > { %3182 = vpow2.f32 %v2532_v38  ;;  %v1973_v1 = vadd.f32 %v4326_v3, %v1916_v11  ;;  %v1972_v23 = vadd.f32 %v4326_v3, %v1914_v17 }
 0x4b6   : > { %3184 = vpow2.f32 %v2531_v16 }
 0x4b7   : > { %v3175_v39 = vpop.eup %3174  ;;  %v2534_v20 = vmul.f32 -1.442695, %v1973_v1  ;;  %v2533_v43 = vmul.f32 -1.442695, %v1972_v23 }
 0x4b8   : > { %v3177_v42 = vpop.eup %3176  ;;  %v2096_v21 = vadd.f32 1.0, %v3175_v39  ;;  %v1920_v24 = vpop.xlane.xlu1 %1919 }
 0x4b9   : > { %v1918_v26 = vpop.xlane.xlu0 %1917  ;;  %v2094_v25 = vadd.f32 1.0, %v3177_v42  ;;  %3186 = vpow2.f32 %v2534_v20  ;;  %v1975_v46 = vadd.f32 %v4326_v3, %v1920_v24 }
 0x4ba   : > { %v1974_v47 = vadd.f32 %v4326_v3, %v1918_v26  ;;  %3188 = vrcp.f32 %v2096_v21  ;;  %v1832_v21 = vld [vmem:[%s4343_s29 + $0x10] sm:$0xff] }
 0x4bb   : > { %v3179_v14 = vpop.eup %3178  ;;  %3190 = vrcp.f32 %v2094_v25  ;;  %v2536_v28 = vmul.f32 -1.442695, %v1975_v46 }
 0x4bc   : > { %v3181_v29 = vpop.eup %3180  ;;  %v2097_v50 = vadd.f32 1.0, %v3179_v14  ;;  %3192 = vpow2.f32 %v2533_v43  ;;  %v2535_v32 = vmul.f32 -1.442695, %v1974_v47  ;;  %v1924_v27 = vpop.xlane.xlu1 %1923  ;;  %v1830_v47 = vld [vmem:[%s4343_s29] sm:$0xff] }
 0x4bd   : > { %v1922_v51 = vpop.xlane.xlu0 %1921  ;;  %v2095_v33 = vadd.f32 1.0, %v3181_v29  ;;  %3194 = vpow2.f32 %v2536_v28  ;;  %v1977_v36 = vadd.f32 %v4326_v3, %v1924_v27 }
 0x4be   : > { %v1976_v2 = vadd.f32 %v4326_v3, %v1922_v51  ;;  %3196 = vrcp.f32 %v2097_v50 }
 0x4bf   : > { %v3183_v37 = vpop.eup %3182  ;;  %3198 = vrcp.f32 %v2095_v33  ;;  %v2538_v40 = vmul.f32 -1.442695, %v1977_v36 }
 0x4c0   : > { %v3185_v54 = vpop.eup %3184  ;;  %v2099_v12 = vadd.f32 1.0, %v3183_v37  ;;  %3200 = vpow2.f32 %v2535_v32  ;;  %v2537_v13 = vmul.f32 -1.442695, %v1976_v2  ;;  %v1928_v38 = vpop.xlane.xlu1 %1927  ;;  %v1833_v2 = vld [vmem:[%s4343_s29 + $0x18] sm:$0xff] }
 0x4c1   : > { %v1926_v16 = vpop.xlane.xlu0 %1925  ;;  %v2098_v11 = vadd.f32 1.0, %v3185_v54  ;;  %3202 = vpow2.f32 %v2538_v40  ;;  %v1979_v17 = vadd.f32 %v4326_v3, %v1928_v38 }
 0x4c2   : > { %v1978_v1 = vadd.f32 %v4326_v3, %v1926_v16  ;;  %3204 = vrcp.f32 %v2099_v12 }
 0x4c3   : > { %v3187_v23 = vpop.eup %3186  ;;  %3206 = vrcp.f32 %v2098_v11  ;;  %v2540_v39 = vmul.f32 -1.442695, %v1979_v17 }
 0x4c4   : > { %v2539_v20 = vmul.f32 -1.442695, %v1978_v1  ;;  %v3189_v42 = vpop.eup %3188  ;;  %v2101_v43 = vadd.f32 1.0, %v3187_v23  ;;  %3208 = vpow2.f32 %v2537_v13  ;;  %v1932_v24 = vpop.xlane.xlu1 %1931 }
 0x4c5   : > { %v1930_v26 = vpop.xlane.xlu0 %1929  ;;  %v3191_v25 = vpop.eup %3190  ;;  %v2192_v46 = vmul.f32 %v3189_v42, %v4193_v59  ;;  %3210 = vpow2.f32 %v2540_v39  ;;  %v1981_v14 = vadd.f32 %v4326_v3, %v1932_v24 }
 0x4c6   : > { %v1980_v28 = vadd.f32 %v4326_v3, %v1930_v26  ;;  %v3193_v29 = vpop.eup %3192  ;;  %v2190_v50 = vmul.f32 %v3191_v25, %v4189_v55  ;;  %3212 = vrcp.f32 %v2101_v43  ;;  %v1831_v55 = vld [vmem:[%s4343_s29 + $0x8] sm:$0xff] }
 0x4c7   : > { %v3195_v32 = vpop.eup %3194  ;;  %v2224_v27 = vadd.f32 %v2192_v46, %v1832_v21  ;;  %v2100_v51 = vadd.f32 1.0, %v3193_v29  ;;  %3214 = vpow2.f32 %v2539_v20  ;;  %v2542_v33 = vmul.f32 -1.442695, %v1981_v14  ;;  %v1835_v43 = vld [vmem:[%s4343_s29 + $0x28] sm:$0xff]  ;;  %v1834_v14 = vld [vmem:[%s4343_s29 + $0x20] sm:$0xff] }
 0x4c8   : > { %v3197_v36 = vpop.eup %3196  ;;  %v2222_v59 = vadd.f32 %v2190_v50, %v1830_v47  ;;  %v2103_v37 = vadd.f32 1.0, %v3195_v32  ;;  %v2541_v40 = vmul.f32 -1.442695, %v1980_v28  ;;  %v1936_v54 = vpop.xlane.xlu1 %1935 }
 0x4c9   : > { %v1934_v12 = vpop.xlane.xlu0 %1933  ;;  %v3199_v13 = vpop.eup %3198  ;;  %2256 = vst [vmem:[%s4343_s29 + $0x10] sm:$0xff] %v2224_v27  ;;  %v2193_v38 = vmul.f32 %v3197_v36, %v4195_v62  ;;  %3216 = vrcp.f32 %v2100_v51  ;;  %v1983_v16 = vadd.f32 %v4326_v3, %v1936_v54 }
 0x4ca   : > { %v1982_v11 = vadd.f32 %v4326_v3, %v1934_v12  ;;  %v3201_v17 = vpop.eup %3200  ;;  %2254 = vst [vmem:[%s4343_s29] sm:$0xff] %v2222_v59  ;;  %v2191_v1 = vmul.f32 %v3199_v13, %v4191_v58  ;;  %3218 = vrcp.f32 %v2103_v37 }
 0x4cb   : > { %v3203_v23 = vpop.eup %3202  ;;  %v2225_v39 = vadd.f32 %v2193_v38, %v1833_v2  ;;  %v2102_v20 = vadd.f32 1.0, %v3201_v17  ;;  %3220 = vpow2.f32 %v2542_v33  ;;  %v2544_v42 = vmul.f32 -1.442695, %v1983_v16  ;;  %v1837_v2 = vld [vmem:[%s4343_s29 + $0x38] sm:$0xff] }
 0x4cc   : > { %v3205_v62 = vpop.eup %3204  ;;  %v2223_v21 = vadd.f32 %v2191_v1, %v1831_v55  ;;  %v2105_v24 = vadd.f32 1.0, %v3203_v23  ;;  %3222 = vpow2.f32 %v2541_v40  ;;  %v2543_v26 = vmul.f32 -1.442695, %v1982_v11  ;;  %v1940_v25 = vpop.xlane.xlu1 %1939  ;;  %v1836_v1 = vld [vmem:[%s4343_s29 + $0x30] sm:$0xff] }
 0x4cd   : > { %v1938_v46 = vpop.xlane.xlu0 %1937  ;;  %v3207_v47 = vpop.eup %3206  ;;  %2257 = vst [vmem:[%s4343_s29 + $0x18] sm:$0xff] %v2225_v39  ;;  %v2195_v58 = vmul.f32 %v3205_v62, %v4199_v41  ;;  %3224 = vrcp.f32 %v2102_v20  ;;  %v1985_v28 = vadd.f32 %v4326_v3, %v1940_v25  ;;  %v1839_v62 = vld [vmem:[%s4343_s29 + $0x48] sm:$0xff] }
 0x4ce   : > { %v1984_v29 = vadd.f32 %v4326_v3, %v1938_v46  ;;  %v3209_v50 = vpop.eup %3208  ;;  %2255 = vst [vmem:[%s4343_s29 + $0x8] sm:$0xff] %v2223_v21  ;;  %v2194_v32 = vmul.f32 %v3207_v47, %v4197_v63  ;;  %3226 = vrcp.f32 %v2105_v24 }
 0x4cf   : > { %v3211_v27 = vpop.eup %3210  ;;  %v2227_v51 = vadd.f32 %v2195_v58, %v1835_v43  ;;  %v2104_v33 = vadd.f32 1.0, %v3209_v50  ;;  %3228 = vpow2.f32 %v2544_v42  ;;  %v2546_v36 = vmul.f32 -1.442695, %v1985_v28  ;;  %v1838_v28 = vld [vmem:[%s4343_s29 + $0x40] sm:$0xff] }
 0x4d0   : > { %v3213_v41 = vpop.eup %3212  ;;  %v2226_v59 = vadd.f32 %v2194_v32, %v1834_v14  ;;  %v2107_v37 = vadd.f32 1.0, %v3211_v27  ;;  %3230 = vpow2.f32 %v2543_v26  ;;  %v2545_v40 = vmul.f32 -1.442695, %v1984_v29  ;;  %v1944_v54 = vpop.xlane.xlu1 %1943  ;;  %v1841_v27 = vld [vmem:[%s4343_s29 + $0x58] sm:$0xff] }
 0x4d1   : > { %v1942_v12 = vpop.xlane.xlu0 %1941  ;;  %v3215_v13 = vpop.eup %3214  ;;  %2259 = vst [vmem:[%s4343_s29 + $0x28] sm:$0xff] %v2227_v51  ;;  %v2197_v63 = vmul.f32 %v3213_v41, %v4203_v44  ;;  %3232 = vrcp.f32 %v2104_v33  ;;  %v1987_v38 = vadd.f32 %v4326_v3, %v1944_v54 }
 0x4d2   : > { %v1986_v55 = vadd.f32 %v4326_v3, %v1942_v12  ;;  %2258 = vst [vmem:[%s4343_s29 + $0x20] sm:$0xff] %v2226_v59  ;;  %3234 = vrcp.f32 %v2107_v37  ;;  %v2106_v16 = vadd.f32 1.0, %v3215_v13 }
 0x4d3   : > { %v3217_v11 = vpop.eup %3216  ;;  %v2229_v17 = vadd.f32 %v2197_v63, %v1837_v2  ;;  %3236 = vpow2.f32 %v2546_v36  ;;  %v2548_v23 = vmul.f32 -1.442695, %v1987_v38  ;;  %v1840_v63 = vld [vmem:[%s4343_s29 + $0x50] sm:$0xff] }
 0x4d4   : > { %v2547_v39 = vmul.f32 -1.442695, %v1986_v55  ;;  %v3219_v20 = vpop.eup %3218  ;;  %v2196_v42 = vmul.f32 %v3217_v11, %v4201_v15  ;;  %3238 = vrcp.f32 %v2106_v16  ;;  %v1948_v44 = vpop.xlane.xlu1 %1947  ;;  %v1843_v11 = vld [vmem:[%s4343_s29 + $0x68] sm:$0xff] }
 0x4d5   : > { %v1946_v21 = vpop.xlane.xlu0 %1945  ;;  %v3221_v43 = vpop.eup %3220  ;;  %2261 = vst [vmem:[%s4343_s29 + $0x38] sm:$0xff] %v2229_v17  ;;  %v2199_v24 = vmul.f32 %v3219_v20, %v4207_v18  ;;  %3240 = vpow2.f32 %v2545_v40  ;;  %v1989_v26 = vadd.f32 %v4326_v3, %v1948_v44 }
 0x4d6   : > { %v1988_v25 = vadd.f32 %v4326_v3, %v1946_v21  ;;  %v3223_v46 = vpop.eup %3222  ;;  %v2228_v47 = vadd.f32 %v2196_v42, %v1836_v1  ;;  %v2109_v58 = vadd.f32 1.0, %v3221_v43  ;;  %3242 = vpow2.f32 %v2548_v23  ;;  %v1842_v43 = vld [vmem:[%s4343_s29 + $0x60] sm:$0xff] }
 0x4d7   : > { %v3225_v15 = vpop.eup %3224  ;;  %v2231_v14 = vadd.f32 %v2199_v24, %v1839_v62  ;;  %v2108_v29 = vadd.f32 1.0, %v3223_v46  ;;  %3244 = vpow2.f32 %v2547_v39  ;;  %v2550_v50 = vmul.f32 -1.442695, %v1989_v26 }
 0x4d8   : > { %v3227_v32 = vpop.eup %3226  ;;  %2260 = vst [vmem:[%s4343_s29 + $0x30] sm:$0xff] %v2228_v47  ;;  %v2198_v18 = vmul.f32 %v3225_v15, %v4205_v6  ;;  %3246 = vrcp.f32 %v2109_v58  ;;  %v2549_v51 = vmul.f32 -1.442695, %v1988_v25  ;;  %v1952_v33 = vpop.xlane.xlu1 %1951 }
 0x4d9   : > { %v1950_v36 = vpop.xlane.xlu0 %1949  ;;  %v3229_v41 = vpop.eup %3228  ;;  %2263 = vst [vmem:[%s4343_s29 + $0x48] sm:$0xff] %v2231_v14  ;;  %v2201_v59 = vmul.f32 %v3227_v32, %v4211_v48  ;;  %3248 = vrcp.f32 %v2108_v29  ;;  %v1991_v2 = vadd.f32 %v4326_v3, %v1952_v33 }
 0x4da   : > { %v1990_v37 = vadd.f32 %v4326_v3, %v1950_v36  ;;  %v3231_v40 = vpop.eup %3230  ;;  %v2230_v54 = vadd.f32 %v2198_v18, %v1838_v28  ;;  %v2111_v6 = vadd.f32 1.0, %v3229_v41  ;;  %3250 = vpow2.f32 %v2550_v50  ;;  %v1845_v18 = vld [vmem:[%s4343_s29 + $0x78] sm:$0xff]  ;;  %v1844_v41 = vld [vmem:[%s4343_s29 + $0x70] sm:$0xff] }
 0x4db   : > { %v3233_v12 = vpop.eup %3232  ;;  %v2233_v13 = vadd.f32 %v2201_v59, %v1841_v27  ;;  %v2110_v38 = vadd.f32 1.0, %v3231_v40  ;;  %3252 = vpow2.f32 %v2549_v51  ;;  %v2552_v55 = vmul.f32 -1.442695, %v1991_v2 }
 0x4dc   : > { %v3235_v16 = vpop.eup %3234  ;;  %2262 = vst [vmem:[%s4343_s29 + $0x40] sm:$0xff] %v2230_v54  ;;  %v2200_v48 = vmul.f32 %v3233_v12, %v4209_v45  ;;  %3254 = vrcp.f32 %v2111_v6  ;;  %v2551_v17 = vmul.f32 -1.442695, %v1990_v37  ;;  %v1956_v1 = vpop.xlane.xlu1 %1955 }
 0x4dd   : > { %v1954_v23 = vpop.xlane.xlu0 %1953  ;;  %v3237_v39 = vpop.eup %3236  ;;  %2265 = vst [vmem:[%s4343_s29 + $0x58] sm:$0xff] %v2233_v13  ;;  %v2203_v20 = vmul.f32 %v3235_v16, %v4215_v30  ;;  %3256 = vrcp.f32 %v2110_v38  ;;  %v1993_v42 = vadd.f32 %v4326_v3, %v1956_v1  ;;  %v1847_v16 = vld [vmem:[%s4343_s29 + $0x88] sm:$0xff]  ;;  %v1846_v1 = vld [vmem:[%s4343_s29 + $0x80] sm:$0xff] }
 0x4de   : > { %v1992_v62 = vadd.f32 %v4326_v3, %v1954_v23  ;;  %v3239_v44 = vpop.eup %3238  ;;  %v2232_v21 = vadd.f32 %v2200_v48, %v1840_v63  ;;  %v2113_v45 = vadd.f32 1.0, %v3237_v39  ;;  %3258 = vpow2.f32 %v2552_v55 }
 0x4df   : > { %v3241_v24 = vpop.eup %3240  ;;  %v2235_v26 = vadd.f32 %v2203_v20, %v1843_v11  ;;  %v2202_v25 = vmul.f32 %v3239_v44, %v4213_v49  ;;  %3260 = vpow2.f32 %v2551_v17  ;;  %v2554_v46 = vmul.f32 -1.442695, %v1993_v42 }
 0x4e0   : > { %v3243_v47 = vpop.eup %3242  ;;  %2264 = vst [vmem:[%s4343_s29 + $0x50] sm:$0xff] %v2232_v21  ;;  %3262 = vrcp.f32 %v2113_v45  ;;  %v2112_v30 = vadd.f32 1.0, %v3241_v24  ;;  %v2553_v58 = vmul.f32 -1.442695, %v1992_v62  ;;  %v1960_v15 = vpop.xlane.xlu1 %1959 }
 0x4e1   : > { %v1958_v14 = vpop.xlane.xlu0 %1957  ;;  %v3245_v28 = vpop.eup %3244  ;;  %2267 = vst [vmem:[%s4343_s29 + $0x68] sm:$0xff] %v2235_v26  ;;  %v2234_v29 = vadd.f32 %v2202_v25, %v1842_v43  ;;  %v2115_v50 = vadd.f32 1.0, %v3243_v47  ;;  %3264 = vpow2.f32 %v2554_v46  ;;  %v1995_v32 = vadd.f32 %v4326_v3, %v1960_v15  ;;  %v1848_v25 = vld [vmem:[%s4343_s29 + $0x90] sm:$0xff]  ;;  %v1851_v15 = vld [vmem:[%s4343_s29 + $0xa8] sm:$0xff] }
 0x4e2   : > { %v3247_v49 = vpop.eup %3246  ;;  %3266 = vrcp.f32 %v2112_v30  ;;  %v2114_v27 = vadd.f32 1.0, %v3245_v28  ;;  %v1994_v51 = vadd.f32 %v4326_v3, %v1958_v14 }
 0x4e3   : > { %v3249_v33 = vpop.eup %3248  ;;  %2266 = vst [vmem:[%s4343_s29 + $0x60] sm:$0xff] %v2234_v29  ;;  %v2205_v36 = vmul.f32 %v3247_v49, %v4219_v7  ;;  %3268 = vrcp.f32 %v2115_v50  ;;  %v2556_v59 = vmul.f32 -1.442695, %v1995_v32 }
 0x4e4   : > { %v3251_v2 = vpop.eup %3250  ;;  %v2204_v37 = vmul.f32 %v3249_v33, %v4217_v52  ;;  %3270 = vrcp.f32 %v2114_v27  ;;  %v2555_v40 = vmul.f32 -1.442695, %v1994_v51  ;;  %v1964_v54 = vpop.xlane.xlu1 %1963  ;;  %v1853_v33 = vld [vmem:[%s4343_s29 + $0xb8] sm:$0xff] }
 0x4e5   : > { %v1962_v6 = vpop.xlane.xlu0 %1961  ;;  %v3253_v12 = vpop.eup %3252  ;;  %v2237_v13 = vadd.f32 %v2205_v36, %v1845_v18  ;;  %v2117_v63 = vadd.f32 1.0, %v3251_v2  ;;  %3272 = vpow2.f32 %v2553_v58  ;;  %v1997_v7 = vadd.f32 %v4326_v3, %v1964_v54 }
 0x4e6   : > { %v3255_v38 = vpop.eup %3254  ;;  %v2236_v55 = vadd.f32 %v2204_v37, %v1844_v41  ;;  %v2116_v48 = vadd.f32 1.0, %v3253_v12  ;;  %3274 = vpow2.f32 %v2556_v59  ;;  %v1996_v52 = vadd.f32 %v4326_v3, %v1962_v6  ;;  %v1852_v59 = vld [vmem:[%s4343_s29 + $0xb0] sm:$0xff] }
 0x4e7   : > { %v3257_v11 = vpop.eup %3256  ;;  %2269 = vst [vmem:[%s4343_s29 + $0x78] sm:$0xff] %v2237_v13  ;;  %v2207_v17 = vmul.f32 %v3255_v38, %v4223_v53  ;;  %3276 = vrcp.f32 %v2117_v63  ;;  %v2558_v23 = vmul.f32 -1.442695, %v1997_v7  ;;  %v1849_v53 = vld [vmem:[%s4343_s29 + $0x98] sm:$0xff]  ;;  %v1855_v13 = vld [vmem:[%s4343_s29 + $0xc8] sm:$0xff]  ;;  %v1854_v38 = vld [vmem:[%s4343_s29 + $0xc0] sm:$0xff] }
 0x4e8   : > { %v3259_v39 = vpop.eup %3258  ;;  %2268 = vst [vmem:[%s4343_s29 + $0x70] sm:$0xff] %v2236_v55  ;;  %v2206_v20 = vmul.f32 %v3257_v11, %v4221_v31  ;;  %3278 = vrcp.f32 %v2116_v48  ;;  %v2557_v3 = vmul.f32 -1.442695, %v1996_v52  ;;  %v1857_v52 = vld [vmem:[%s4343_s29 + $0xd8] sm:$0xff] }
 0x4e9   : > { %v3261_v42 = vpop.eup %3260  ;;  %v2239_v62 = vadd.f32 %v2207_v17, %v1847_v16  ;;  %v2119_v44 = vadd.f32 1.0, %v3259_v39  ;;  %3280 = vpow2.f32 %v2555_v40  ;;  %v1856_v39 = vld [vmem:[%s4343_s29 + $0xd0] sm:$0xff] }
 0x4ea   : > { %v3263_v21 = vpop.eup %3262  ;;  %v2238_v43 = vadd.f32 %v2206_v20, %v1846_v1  ;;  %v2118_v45 = vadd.f32 1.0, %v3261_v42  ;;  %3282 = vpow2.f32 %v2558_v23  ;;  %v1859_v42 = vld [vmem:[%s4343_s29 + $0xe8] sm:$0xff] }
 0x4eb   : > { %v3265_v24 = vpop.eup %3264  ;;  %2271 = vst [vmem:[%s4343_s29 + $0x88] sm:$0xff] %v2239_v62  ;;  %v2209_v26 = vmul.f32 %v3263_v21, %v4227_v57  ;;  %3284 = vrcp.f32 %v2119_v44  ;;  %v1850_v57 = vld [vmem:[%s4343_s29 + $0xa0] sm:$0xff] }
 0x4ec   : > { %v3267_v31 = vpop.eup %3266  ;;  %2270 = vst [vmem:[%s4343_s29 + $0x80] sm:$0xff] %v2238_v43  ;;  %3286 = vrcp.f32 %v2118_v45  ;;  %v2121_v46 = vadd.f32 1.0, %v3265_v24  ;;  %v1858_v21 = vld [vmem:[%s4343_s29 + $0xe0] sm:$0xff]  ;;  %v1861_v45 = vld [vmem:[%s4343_s29 + $0xf8] sm:$0xff] }
 0x4ed   : > { %v3269_v47 = vpop.eup %3268  ;;  %v2241_v30 = vadd.f32 %v2209_v26, %v1849_v53  ;;  %v2208_v58 = vmul.f32 %v3267_v31, %v4225_v56  ;;  %3288 = vpow2.f32 %v2557_v3 }
 0x4ee   : > { %v3271_v14 = vpop.eup %3270  ;;  %v2211_v28 = vmul.f32 %v3269_v47, %v4231_v61  ;;  %3290 = vrcp.f32 %v2121_v46 }
 0x4ef   : > { %v3273_v29 = vpop.eup %3272  ;;  %2273 = vst [vmem:[%s4343_s29 + $0x98] sm:$0xff] %v2241_v30  ;;  %v2240_v50 = vadd.f32 %v2208_v58, %v1848_v25  ;;  %v2210_v32 = vmul.f32 %v3271_v14, %v4229_v60  ;;  %v1860_v25 = vld [vmem:[%s4343_s29 + $0xf0] sm:$0xff] }
 0x4f0   : > { %v3275_v49 = vpop.eup %3274  ;;  %v2243_v18 = vadd.f32 %v2211_v28, %v1851_v15  ;;  %v2120_v27 = vadd.f32 1.0, %v3273_v29 }
 0x4f1   : > { %v3277_v56 = vpop.eup %3276  ;;  %2272 = vst [vmem:[%s4343_s29 + $0x90] sm:$0xff] %v2240_v50  ;;  %v2242_v51 = vadd.f32 %v2210_v32, %v1850_v57  ;;  %v2123_v36 = vadd.f32 1.0, %v3275_v49 }
 0x4f2   : > { %v3279_v61 = vpop.eup %3278  ;;  %2275 = vst [vmem:[%s4343_s29 + $0xa8] sm:$0xff] %v2243_v18  ;;  %v2213_v41 = vmul.f32 %v3277_v56, %v4235_v19  ;;  %3292 = vrcp.f32 %v2120_v27 }
 0x4f3   : > { %v3281_v2 = vpop.eup %3280  ;;  %2274 = vst [vmem:[%s4343_s29 + $0xa0] sm:$0xff] %v2242_v51  ;;  %v2212_v60 = vmul.f32 %v3279_v61, %v4233_v5  ;;  %3294 = vrcp.f32 %v2123_v36 }
 0x4f4   : > { %v3283_v37 = vpop.eup %3282  ;;  %v2245_v40 = vadd.f32 %v2213_v41, %v1853_v33  ;;  %v2122_v54 = vadd.f32 1.0, %v3281_v2 }
 0x4f5   : > { %v3285_v6 = vpop.eup %3284  ;;  %v2244_v12 = vadd.f32 %v2212_v60, %v1852_v59  ;;  %v2125_v63 = vadd.f32 1.0, %v3283_v37 }
 0x4f6   : > { %v3287_v7 = vpop.eup %3286  ;;  %2277 = vst [vmem:[%s4343_s29 + $0xb8] sm:$0xff] %v2245_v40  ;;  %v2215_v19 = vmul.f32 %v3285_v6, %v4239_v4  ;;  %3296 = vrcp.f32 %v2122_v54 }
 0x4f7   : > { %v3289_v55 = vpop.eup %3288  ;;  %2276 = vst [vmem:[%s4343_s29 + $0xb0] sm:$0xff] %v2244_v12  ;;  %v2214_v5 = vmul.f32 %v3287_v7, %v4237_v0  ;;  %3298 = vrcp.f32 %v2125_v63 }
 0x4f8   : > { %v3291_v16 = vpop.eup %3290  ;;  %v2247_v48 = vadd.f32 %v2215_v19, %v1855_v13  ;;  %v2124_v11 = vadd.f32 1.0, %v3289_v55 }
 0x4f9   : > { %v2246_v17 = vadd.f32 %v2214_v5, %v1854_v38  ;;  %v2217_v1 = vmul.f32 %v3291_v16, %v4243_v22 }
 0x4fa   : > { %2279 = vst [vmem:[%s4343_s29 + $0xc8] sm:$0xff] %v2247_v48  ;;  %3300 = vrcp.f32 %v2124_v11 }
 0x4fb   : > { %2278 = vst [vmem:[%s4343_s29 + $0xc0] sm:$0xff] %v2246_v17  ;;  %v2249_v4 = vadd.f32 %v2217_v1, %v1857_v52 }
 0x4fc   : > { %v3293_v23 = vpop.eup %3292 }
 0x4fd   : > { %v3295_v0 = vpop.eup %3294  ;;  %2281 = vst [vmem:[%s4343_s29 + $0xd8] sm:$0xff] %v2249_v4  ;;  %v2216_v20 = vmul.f32 %v3293_v23, %v4241_v34 }
 0x4fe   : > { %v2219_v62 = vmul.f32 %v3295_v0, %v4247_v8 }
 0x4ff   : > { %v2248_v44 = vadd.f32 %v2216_v20, %v1856_v39 }
 0x500   : > { %v3297_v22 = vpop.eup %3296  ;;  %v2251_v3 = vadd.f32 %v2219_v62, %v1859_v42 }
 0x501   : > { %v3299_v43 = vpop.eup %3298  ;;  %2280 = vst [vmem:[%s4343_s29 + $0xd0] sm:$0xff] %v2248_v44  ;;  %v2218_v53 = vmul.f32 %v3297_v22, %v4245_v35 }
 0x502   : > { %2283 = vst [vmem:[%s4343_s29 + $0xe8] sm:$0xff] %v2251_v3  ;;  %v2221_v24 = vmul.f32 %v3299_v43, %v4251_v9 }
 0x503   : > { %v2250_v34 = vadd.f32 %v2218_v53, %v1858_v21 }
 0x504   : > { %v3301_v26 = vpop.eup %3300  ;;  %v2253_v31 = vadd.f32 %v2221_v24, %v1861_v45 }
 0x505   : > { %2282 = vst [vmem:[%s4343_s29 + $0xe0] sm:$0xff] %v2250_v34  ;;  %v2220_v8 = vmul.f32 %v3301_v26, %v4249_v10 }
 0x506   : > { %2285 = vst [vmem:[%s4343_s29 + $0xf8] sm:$0xff] %v2253_v31 }
 0x507   : > { %v2252_v46 = vadd.f32 %v2220_v8, %v1860_v25 }
 0x509   : > { %2284 = vst [vmem:[%s4343_s29 + $0xf0] sm:$0xff] %v2252_v46 }
 0x50a PF: > { %s4568_s13 = sadd.s32 4294967295, %s3502_s28   ;;  %s3510_s11 = smov [#allocation10]  }
 0x50b   : > { %p4461_p0 = scmp.eq.s32.totalorder %s4568_s13, 11  ;;  %s2292_s27 = sshll.u32 %s3510_s11, 4  ;;  %s2293_s27 = int_to_ptr.vmem [resolvable:$true] %s2292_s27 }
 0x50c   : > { %s3362_s16 = scalar_lea.vmem %s2293_s27, 8192  ;;  %p3369_p6 = scmp.lt.s32.totalorder %s2293_s27, %s2293_s27 }
 0x50d   : > { %p3363_p7 = scmp.ne.s32.totalorder %s2293_s27, %s3362_s16  ;;  %p3370_p10 = scmp.lt.s32.totalorder %s3362_s16, %s3362_s16 }
 0x50f   : > { %p3364_p4 = pnand %p3363_p7, %p4461_p0  ;;  %p3371_p1 = por %p3370_p10, %p3369_p6 }
 0x511   : > { %p3365_p5 = pneg %p3364_p4 }
 0x513   : > { %p3372_p9 = pnand %p3371_p1, %p3365_p5 }
 0x515   : > { %3375 = shalt.err (!%p3372_p9)
}
 0x516   : > { %s3376_s14 = scalar_lea.hbm %s4536_s4, 8192 }
 0x517   : > { %p3377_p13 = scmp.ne.s32.totalorder %s4536_s4, %s3376_s14  ;;  %p3382_p11 = scmp.lt.u32.totalorder %s3376_s14, %s4536_s4 }
 0x519   : > { %p3378_p3 = pnand %p3377_p13, %p4461_p0 }
 0x51b   : > { %p3379_p8 = pneg %p3378_p3 }
 0x51d   : > { %p3384_p2 = pnand %p3382_p11, %p3379_p8 }
 0x51f   : > { %3387 = shalt.err (!%p3384_p2)
}
 0x520   : > { %s3511_s0 = smov 128   ;;  %s3512_s15 = smov 8  }
 0x521   : > { %2826 = dma.vmem_to_hbm [thread:$0]  (%p4461_p0), %s2293_s27, 8192, %s4536_s4, [#allocation7], %s3511_s0, %s3511_s0, %s3512_s15  }
 0x522   : > { %3449 = dma.done.wait (%p4461_p0), [#allocation7], 8192  }
 0x523   : > { %3451 = vsyncadd (%p4461_p0), [#allocation7], 4294959104 }
 0x524 PF: > { %s22_s28 = sadd.s32 1, %s3502_s28   ;;  %s4571_s24 = sld [smem:[#allocation14_spill]] }
 0x525   : > { %p4488_p12 = scmp.ge.s32.totalorder %s22_s28, 14   ;;  %s4572_s29 = sld [smem:[#allocation15_spill]] }
 0x526   : > { %s4573_s13 = sld [smem:[#allocation16_spill]]  ;;  %s4574_s27 = sld [smem:[#allocation17_spill]] }
 0x527   : > { %s4576_s17 = smov %s3458_s18  ;;  %s4577_s18 = smov %s3462_s19 }
 0x528   : > { %s4578_s19 = smov %s3743_s9  ;;  %s4579_s20 = smov %s3470_s21 }
 0x529   : > { %s4580_s21 = smov %s3474_s22  ;;  %s4581_s22 = smov %s3716_s10 }
 0x52a   : > { %s4582_s23 = smov %s3490_s25  ;;  %s4583_s3 = smov %s3494_s26 }
 0x52b   : > { %s4584_s25 = smov %s4572_s29  ;;  %21 = sbr.rel (!%p4488_p12) target bundleno = 14 (0xe), region = 114 }
 0x52c   : > { %s4585_s26 = smov %s4573_s13 }
 0x532   :  { %2308 = vsyncpa [#allocation6], 1 }
 0x533   :  { %2310 = vsyncpa [#allocation6 + $0x1], 1 }
 0x534   :  { %2311 = vsyncpa [#allocation9], 1 }
 0x535   :  { %2313 = vsyncpa [#allocation9 + $0x1], 1 }
 0x536   :  { %2314 = vsyncpa [#allocation7], 1 }
 0x537   :  { %2316 = vsyncpa [#allocation7 + $0x1], 1 }

</bundles_post_ra>
